<compile_context>
chip_gen: v7x
topology: tpu7x:2x2x1
jax: 0.10.0
libtpu: 0.0.40
codegen_flags: <defaults>
</compile_context>

<pallas_src>
import functools
import math

import jax
import jax.numpy as jnp
from jax import lax
from jax.experimental import pallas as pl
from jax.experimental.pallas import tpu as pltpu

_MIB = 1024 * 1024
# Per-call VMEM budget for picked tiles: safe even on v7x (64 MiB physical).
_VMEM_BUDGET = 40 * _MIB


# ---------------------------------------------------------------------------
# Tile / VMEM sizing helpers (per-generation safe: budget fits v7x's 64 MiB).
# ---------------------------------------------------------------------------
def _pick_tile(total, cap, align=128):
    """Largest divisor of `total` that is <= cap and a multiple of `align`
    (falls back to an 8-aligned divisor, then to the full extent, which is
    always a legal block size)."""
    cap = max(1, min(cap, total))
    for a in (align, 8):
        best = 0
        d = a
        while d <= cap:
            if total % d == 0:
                best = d
            d += a
        if best:
            return best
    return total


def _vmem_limit_bytes(need):
    # ~2x headroom for compiler temporaries; never below the 32 MiB default,
    # capped at 48 MiB so we stay well under v7x's 64 MiB physical VMEM.
    return int(min(max(2 * need, 32 * _MIB), 48 * _MIB))


def _proj_tile(M, E, A, itemsize):
    """Row tile for the QKV projection: as large as the VMEM budget allows."""
    cap = 1024
    while True:
        tm = _pick_tile(M, cap)
        need = (2 * tm * E * itemsize          # x blocks (double-buffered)
                + E * 3 * A * itemsize         # weight (single-buffered)
                + 2 * tm * 3 * A * itemsize    # output blocks (double-buffered)
                + tm * 3 * A * 4)              # f32 matmul accumulator temp
        if need <= _VMEM_BUDGET or cap <= 128:
            return tm, need
        cap = max(128, cap // 2)


def _flash_tiles(S, A, itemsize):
    """Attention tiles: tq up to 512 (cuts K/V refetch, fills MXU rows),
    tk up to 256 (fills the 256-wide MXU on v6e/v7x; fine on v5e)."""
    cap_q, cap_k = 512, 256
    while True:
        tq = _pick_tile(S, cap_q)
        tk = _pick_tile(S, cap_k)
        need = (2 * (2 * tq + 2 * tk) * A * itemsize   # q,o + k,v double-buffered
                + (tq * A + 2 * tq) * 4                # acc, m, l scratch (f32)
                + 3 * tq * tk * 4)                     # s / p intermediates (slack)
        if need <= _VMEM_BUDGET or (cap_q <= 128 and cap_k <= 128):
            return tq, tk, need
        cap_q = max(128, cap_q // 2)
        cap_k = max(128, cap_k // 2)


def _bf16_eup_available():
    """bf16 exp only pays off on chips with a bf16 EUP (v6e / v7x)."""
    try:
        kind = jax.devices()[0].device_kind.lower()
    except Exception:
        return False
    return ("v6" in kind) or ("v7" in kind) or ("7x" in kind)


# ---------------------------------------------------------------------------
# Kernel 1: fused QKV projection over rows = B*S, single (M, 3A) output slab.
# ---------------------------------------------------------------------------
def qkv_proj_kernel(x_ref, w_ref, o_ref):
    # One MXU pass with N = 3A; the 1/sqrt(A) scale is already folded into the
    # Q columns of the weight slab, so there is no per-tile VPU scale here.
    o_ref[...] = jnp.dot(x_ref[...], w_ref[...],
                         preferred_element_type=jnp.float32).astype(o_ref.dtype)


def qkv_projection(x2d, wqkv, *, tm, vmem_limit_bytes):
    M, E = x2d.shape
    N = wqkv.shape[-1]

    def build(w_spec):
        return pl.pallas_call(
            qkv_proj_kernel,
            out_shape=jax.ShapeDtypeStruct((M, N), x2d.dtype),
            grid_spec=pltpu.PrefetchScalarGridSpec(
                num_scalar_prefetch=0,
                grid=(M // tm,),
                in_specs=[
                    pl.BlockSpec((tm, E), lambda i: (i, 0)),
                    w_spec,
                ],
                out_specs=pl.BlockSpec((tm, N), lambda i: (i, 0)),
            ),
            compiler_params=pltpu.CompilerParams(
                dimension_semantics=("parallel",),
                vmem_limit_bytes=vmem_limit_bytes,
            ),
        )

    try:
        # Grid-invariant weight (constant index_map): single-buffer it so the
        # default second buffer doesn't waste VMEM (matters most on v7x for
        # large E*A).
        w_spec = pl.BlockSpec((E, N), lambda i: (0, 0),
                              pipeline_mode=pl.Buffered(1))
        return build(w_spec)(x2d, wqkv)
    except Exception:
        # Graceful fallback if this Pallas build requires >=2 buffers here.
        w_spec = pl.BlockSpec((E, N), lambda i: (0, 0))
        return build(w_spec)(x2d, wqkv)


# ---------------------------------------------------------------------------
# Kernel 2: flash-style attention with online softmax.
# ---------------------------------------------------------------------------
def flash_attn_kernel(q_ref, k_ref, v_ref, o_ref, m_sc, l_sc, acc_sc, *,
                      exp_dtype):
    ki = pl.program_id(2)

    @pl.when(ki == 0)
    def _():
        m_sc[...] = jnp.full_like(m_sc, -jnp.inf)
        l_sc[...] = jnp.zeros_like(l_sc)
        acc_sc[...] = jnp.zeros_like(acc_sc)

    # scores = q @ k^T without materializing k.T: contract over the A axis of
    # both operands so the MXU consumes K directly (no XLU transpose).
    s = lax.dot_general(
        q_ref[...], k_ref[...],
        dimension_numbers=(((1,), (1,)), ((), ())),
        preferred_element_type=jnp.float32)                # (tq, tk), f32

    m_prev = m_sc[...]
    m_new = jnp.maximum(m_prev, jnp.max(s, axis=-1, keepdims=True))
    alpha = jnp.exp(m_prev - m_new)                        # (tq, 1), f32
    # exp in bf16 on v6e/v7x bf16 path (EUP throughput); f32 otherwise.
    p = jnp.exp((s - m_new).astype(exp_dtype))
    # Softmax denominator accumulated in f32 regardless of exp dtype.
    l_sc[...] = alpha * l_sc[...] + jnp.sum(
        p.astype(jnp.float32), axis=-1, keepdims=True)
    acc_sc[...] = alpha * acc_sc[...] + jnp.dot(
        p.astype(v_ref.dtype), v_ref[...], preferred_element_type=jnp.float32)
    m_sc[...] = m_new

    @pl.when(ki == pl.num_programs(2) - 1)
    def _():
        # Exact reciprocal: runs once per q tile so approx=True saves nothing
        # meaningful, and the exact form tightens the output tolerance.
        inv_l = pl.reciprocal(l_sc[...], approx=False)
        o_ref[...] = (acc_sc[...] * inv_l).astype(o_ref.dtype)


def flash_attention(qkv, atten_dim, *, tq, tk, vmem_limit_bytes, exp_dtype):
    """qkv: (B, S, 3A) fused projection slab; returns (B, S, A)."""
    B, S, _ = qkv.shape
    A = atten_dim
    num_q = S // tq
    num_kv = S // tk
    kernel = functools.partial(flash_attn_kernel, exp_dtype=exp_dtype)
    return pl.pallas_call(
        kernel,
        out_shape=jax.ShapeDtypeStruct((B, S, A), qkv.dtype),
        grid_spec=pltpu.PrefetchScalarGridSpec(
            num_scalar_prefetch=0,
            grid=(B, num_q, num_kv),
            in_specs=[
                # Q / K / V are the 0th / 1st / 2nd A-wide lane blocks of the
                # same (B, S, 3A) slab.
                pl.BlockSpec((pl.Squeezed(), tq, A),
                             lambda b, qi, ki: (b, qi, 0)),
                pl.BlockSpec((pl.Squeezed(), tk, A),
                             lambda b, qi, ki: (b, ki, 1)),
                pl.BlockSpec((pl.Squeezed(), tk, A),
                             lambda b, qi, ki: (b, ki, 2)),
            ],
            out_specs=pl.BlockSpec((pl.Squeezed(), tq, A),
                                   lambda b, qi, ki: (b, qi, 0)),
            scratch_shapes=[
                pltpu.VMEM((tq, 1), jnp.float32),   # running max
                pltpu.VMEM((tq, 1), jnp.float32),   # running softmax denom
                pltpu.VMEM((tq, A), jnp.float32),   # f32 output accumulator
            ],
        ),
        compiler_params=pltpu.CompilerParams(
            # b and q-tile axes shard across TensorCores on v7x (2 TCs).
            dimension_semantics=("parallel", "parallel", "arbitrary"),
            vmem_limit_bytes=vmem_limit_bytes,
        ),
    )(qkv, qkv, qkv)


# ---------------------------------------------------------------------------
# Wrapper mirroring SelfAttention.forward.
# ---------------------------------------------------------------------------
def fuse_qkv_weights(wq_t, wk_t, wv_t):
    """Fuse the pre-transposed (E, A) projection weights into one lane-dense
    (E, 3A) slab with the 1/sqrt(A) score scale folded into the Q columns.
    Weights are reused across forwards, so call this ONCE per model (it is
    hoisted out of the per-call path)."""
    A = wq_t.shape[-1]
    return jnp.concatenate([wq_t * (1.0 / math.sqrt(A)), wk_t, wv_t], axis=1)


def self_attention(x, wqkv):
    """x: (B, S, E); wqkv: fused (E, 3A) weight from fuse_qkv_weights()."""
    B, S, E = x.shape
    three_a = wqkv.shape[-1]
    assert three_a % 3 == 0
    A = three_a // 3
    assert A % 128 == 0, (
        "atten_dim must be a multiple of 128 so the Q/K/V thirds of the "
        "fused (B, S, 3A) slab are lane-aligned blocks")
    assert x.dtype == wqkv.dtype
    itemsize = x.dtype.itemsize

    # QKV projection over rows = B*S (big, VMEM-budgeted row tile).
    tm, proj_need = _proj_tile(B * S, E, A, itemsize)
    qkv2d = qkv_projection(x.reshape(B * S, E), wqkv, tm=tm,
                           vmem_limit_bytes=_vmem_limit_bytes(proj_need))
    qkv = qkv2d.reshape(B, S, 3 * A)

    # Flash attention with VMEM-budgeted tiles (budget also fits v7x 64 MiB).
    tq, tk, attn_need = _flash_tiles(S, A, itemsize)
    exp_dtype = (jnp.bfloat16
                 if (x.dtype == jnp.bfloat16 and _bf16_eup_available())
                 else jnp.float32)
    return flash_attention(qkv, A, tq=tq, tk=tk,
                           vmem_limit_bytes=_vmem_limit_bytes(attn_need),
                           exp_dtype=exp_dtype)


def self_attention_ref(x, wq_t, wk_t, wv_t):
    """Pure-JAX reference mirroring the PyTorch forward (f32)."""
    q = x @ wq_t
    k = x @ wk_t
    v = x @ wv_t
    scores = jnp.einsum("bsa,bta->bst", q, k) / math.sqrt(wk_t.shape[-1])
    w = jax.nn.softmax(scores, axis=-1)
    return jnp.einsum("bst,bta->bsa", w, v)


if __name__ == "__main__":
    # Small but non-degenerate shapes: with tq<=512 / tk<=256 this gives
    # 2 kv steps per q tile (exercises the online-softmax accumulation),
    # B * num_q >= 2 (both v7x TensorCores get work), and a lane-dense
    # (multiple-of-128) attention dim.
    B, S, E, A = 2, 512, 64, 128

    key = jax.random.PRNGKey(0)
    kx, kq, kk, kv = jax.random.split(key, 4)

    x = jax.random.normal(kx, (B, S, E), dtype=jnp.float32)

    # nn.Linear(embed_dim, atten_dim, bias=False) weight has shape (A, E);
    # initialize deterministically then pre-transpose to (E, A) for the kernel.
    bound = 1.0 / math.sqrt(E)
    wq = jax.random.uniform(kq, (A, E), minval=-bound, maxval=bound,
                            dtype=jnp.float32)
    wk = jax.random.uniform(kk, (A, E), minval=-bound, maxval=bound,
                            dtype=jnp.float32)
    wv = jax.random.uniform(kv, (A, E), minval=-bound, maxval=bound,
                            dtype=jnp.float32)
    wq_t, wk_t, wv_t = wq.T, wk.T, wv.T

    ref = self_attention_ref(x, wq_t, wk_t, wv_t)

    # Fuse the QKV weights once (hoisted out of the per-forward path).
    wqkv_f32 = fuse_qkv_weights(wq_t, wk_t, wv_t)

    # f32 path (tight check; slack only for MXU precision / softmax reassoc).
    out = jax.block_until_ready(self_attention(x, wqkv_f32))
    assert out.shape == (B, S, A)
    assert jnp.allclose(out, ref, atol=5e-3, rtol=5e-3), "f32 mismatch vs reference"

    # bf16 production path: half the HBM traffic, bf16-native MXU, bf16 exp on
    # v6e/v7x; accumulation stays f32.
    x_bf16 = x.astype(jnp.bfloat16)
    wqkv_bf16 = wqkv_f32.astype(jnp.bfloat16)
    out_bf16 = jax.block_until_ready(self_attention(x_bf16, wqkv_bf16))
    assert out_bf16.shape == (B, S, A)
    assert jnp.allclose(out_bf16.astype(jnp.float32), ref, atol=3e-2, rtol=3e-2), \
        "bf16 mismatch vs reference"

    print("KERNEL_OK")
</pallas_src>

<mosaic_0001>
module attributes {stable_mosaic.version = 11 : i64} {
  func.func @qkv_proj_kernel(%arg0: i32, %arg1: memref<1024x64xf32, #tpu.memory_space<vmem>>, %arg2: memref<64x384xf32, #tpu.memory_space<vmem>>, %arg3: memref<1024x384xf32, #tpu.memory_space<vmem>>) attributes {dimension_semantics = [#tpu.dimension_semantics<parallel>], iteration_bounds = array<i64: 1>, scalar_prefetch = 0 : i64, scratch_operands = 0 : i64, tpu.core_type = #tpu.core_type<tc>, window_params = [{transform_indices = @transform_0, window_bounds = array<i64: 1024, 64>}, {pipeline_mode = #tpu.pipeline_mode<synchronous>, transform_indices = @transform_1, window_bounds = array<i64: 64, 384>}, {transform_indices = @transform_2, window_bounds = array<i64: 1024, 384>}]} {
    %c0 = arith.constant 0 : index
    %c0_0 = arith.constant 0 : index
    %0 = vector.load %arg1[%c0, %c0_0] : memref<1024x64xf32, #tpu.memory_space<vmem>>, vector<1024x64xf32>
    %c0_1 = arith.constant 0 : index
    %c0_2 = arith.constant 0 : index
    %1 = vector.load %arg2[%c0_1, %c0_2] : memref<64x384xf32, #tpu.memory_space<vmem>>, vector<64x384xf32>
    %cst = arith.constant dense<0.000000e+00> : vector<1024x384xf32>
    %2 = tpu.matmul %0, %1, %cst {dimension_numbers = #tpu.dot_dimension_numbers<[1], [0], [0], [1], [0, 0, 1, 1], [], []>} : vector<1024x64xf32>, vector<64x384xf32>, vector<1024x384xf32> -> vector<1024x384xf32>
    %c0_3 = arith.constant 0 : index
    %c0_4 = arith.constant 0 : index
    %3 = vector.load %arg3[%c0_3, %c0_4] : memref<1024x384xf32, #tpu.memory_space<vmem>>, vector<1024x384xf32>
    tpu.vector_store %arg3[%c0_3, %c0_4], %2 {strides = array<i32>} : memref<1024x384xf32, #tpu.memory_space<vmem>>, vector<1024x384xf32>,
    return
  }
  func.func @transform_0(%arg0: i32) -> (i32, i32) {
    %c0_i32 = arith.constant 0 : i32
    %c0_i32_0 = arith.constant 0 : i32
    return %arg0, %c0_i32 : i32, i32
  }
  func.func @transform_1(%arg0: i32) -> (i32, i32) {
    %c0_i32 = arith.constant 0 : i32
    %c0_i32_0 = arith.constant 0 : i32
    %c0_i32_1 = arith.constant 0 : i32
    return %c0_i32, %c0_i32_0 : i32, i32
  }
  func.func @transform_2(%arg0: i32) -> (i32, i32) {
    %c0_i32 = arith.constant 0 : i32
    %c0_i32_0 = arith.constant 0 : i32
    return %arg0, %c0_i32 : i32, i32
  }
}

module attributes {stable_mosaic.version = 11 : i64} {
  func.func @qkv_proj_kernel(%arg0: i32, %arg1: memref<1024x64xf32, #tpu.memory_space<vmem>>, %arg2: memref<64x384xf32, #tpu.memory_space<vmem>>, %arg3: memref<1024x384xf32, #tpu.memory_space<vmem>>) attributes {dimension_semantics = [#tpu.dimension_semantics<parallel>], iteration_bounds = array<i64: 1>, scalar_prefetch = 0 : i64, scratch_operands = 0 : i64, tpu.core_type = #tpu.core_type<tc>, window_params = [{transform_indices = @transform_0, window_bounds = array<i64: 1024, 64>}, {pipeline_mode = #tpu.pipeline_mode<synchronous>, transform_indices = @transform_1, window_bounds = array<i64: 64, 384>}, {transform_indices = @transform_2, window_bounds = array<i64: 1024, 384>}]} {
    %c0 = arith.constant 0 : index
    %c0_0 = arith.constant 0 : index
    %0 = vector.load %arg1[%c0, %c0_0] : memref<1024x64xf32, #tpu.memory_space<vmem>>, vector<1024x64xf32>
    %c0_1 = arith.constant 0 : index
    %c0_2 = arith.constant 0 : index
    %1 = vector.load %arg2[%c0_1, %c0_2] : memref<64x384xf32, #tpu.memory_space<vmem>>, vector<64x384xf32>
    %cst = arith.constant dense<0.000000e+00> : vector<1024x384xf32>
    %2 = tpu.matmul %0, %1, %cst {dimension_numbers = #tpu.dot_dimension_numbers<[1], [0], [0], [1], [0, 0, 1, 1], [], []>} : vector<1024x64xf32>, vector<64x384xf32>, vector<1024x384xf32> -> vector<1024x384xf32>
    %c0_3 = arith.constant 0 : index
    %c0_4 = arith.constant 0 : index
    %3 = vector.load %arg3[%c0_3, %c0_4] : memref<1024x384xf32, #tpu.memory_space<vmem>>, vector<1024x384xf32>
    tpu.vector_store %arg3[%c0_3, %c0_4], %2 {strides = array<i32>} : memref<1024x384xf32, #tpu.memory_space<vmem>>, vector<1024x384xf32>,
    return
  }
  func.func @transform_0(%arg0: i32) -> (i32, i32) {
    %c0_i32 = arith.constant 0 : i32
    %c0_i32_0 = arith.constant 0 : i32
    return %arg0, %c0_i32 : i32, i32
  }
  func.func @transform_1(%arg0: i32) -> (i32, i32) {
    %c0_i32 = arith.constant 0 : i32
    %c0_i32_0 = arith.constant 0 : i32
    %c0_i32_1 = arith.constant 0 : i32
    return %c0_i32, %c0_i32_0 : i32, i32
  }
  func.func @transform_2(%arg0: i32) -> (i32, i32) {
    %c0_i32 = arith.constant 0 : i32
    %c0_i32_0 = arith.constant 0 : i32
    return %arg0, %c0_i32 : i32, i32
  }
}

</mosaic_0001>

<bundles_post_ra>
// kernel: tpu_custom_call.1
= control target key start
LH: loop header
LB: loop body
LE: loop exit
PB: predicated region body
PF: predicated region fallthrough
CT: control target
= control target key end

     0   :  { %7 = vsyncpa [#allocation3], 0  ;;  %s4429_s0 = inlined_call_operand.vmem [shape: f32[1024,64], index: 0, kind: input, shape index: {}]   ;;  %s4430_s1 = inlined_call_operand.hbm [shape: f32[64,384], index: 1, kind: input, shape index: {}]   ;;  %s4431_s2 = inlined_call_operand.hbm [shape: f32[1024,384], index: 2, kind: output, shape index: {}]  }
   0x1   :  { %8 = vsyncpa [#allocation4], 0  ;;  %s3227_s9 = smov [#allocation2]   ;;  %s3179_s13 = scalar_lea.hbm %s4430_s1, 3072 }
   0x2   :  { %s16_s10 = sshll.u32 %s3227_s9, 4  ;;  %p3180_p0 = scmp.ne.s32.totalorder %s4430_s1, %s3179_s13  ;;  %s17_s10 = int_to_ptr.vmem [resolvable:$true] %s16_s10 }
   0x3   :  { %p3183_p1 = scmp.lt.u32.totalorder %s3179_s13, %s4430_s1 }
   0x5   :  { %p3185_p2 = pnand %p3183_p1, %p3180_p0 }
   0x7   :  { %3188 = shalt.err (!%p3185_p2)
}
   0x8   :  { %s3189_s18 = scalar_lea.vmem %s17_s10, 3072  ;;  %p3194_p4 = scmp.lt.s32.totalorder %s17_s10, %s17_s10 }
   0x9   :  { %p3190_p3 = scmp.ne.s32.totalorder %s17_s10, %s3189_s18  ;;  %p3195_p5 = scmp.lt.s32.totalorder %s3189_s18, %s3189_s18 }
   0xb   :  { %p3196_p6 = por %p3195_p5, %p3194_p4 }
   0xd   :  { %p3197_p7 = pnand %p3196_p6, %p3190_p3 }
   0xf   :  { %3200 = shalt.err (!%p3197_p7)
}
  0x10   :  { %s3228_s19 = smov 384   ;;  %s3229_s20 = smov 24  }
  0x11   :  { %22 = dma.hbm_to_vmem [thread:$0]  %s4430_s1, 3072, %s17_s10, [#allocation3], %s3228_s19, %s3228_s19, %s3229_s20  }
  0x12   :  { %3223 = dma.done.wait [#allocation3], 3072  }
  0x13   :  { %3224 = vsyncadd [#allocation3], 4294964224  ;;  %v3230_v0 = vmov 0.0   ;;  %v155_v1 = vld [vmem:[#allocation2 + $0x8] sm:$0xff]  ;;  %v158_v2 = vld [vmem:[#allocation2 + $0x20] sm:$0xff]  ;;  %vm178_vm0 = vcmask 523264  }
  0x14   :  { %627 = vmatprep.mubr.f32.mxu0 %v3230_v0  ;;  %1203 = vmatprep.mubr.f32.mxu1 %v3230_v0  ;;  %v154_v3 = vld [vmem:[#allocation2] sm:$0xff]  ;;  %v3102_v4 = vpack.c.bf16 %v158_v2, %v155_v1  ;;  %v157_v5 = vld [vmem:[#allocation2 + $0x18] sm:$0xff]  ;;  %v164_v7 = vld [vmem:[#allocation2 + $0x50] sm:$0xff] }
  0x15   :  { %v161_v6 = vld [vmem:[#allocation2 + $0x38] sm:$0xff]  ;;  %v3104_v8 = vpack.c.bf16 %v157_v5, %v154_v3  ;;  %v160_v10 = vld [vmem:[#allocation2 + $0x30] sm:$0xff]  ;;  %v163_v11 = vld [vmem:[#allocation2 + $0x48] sm:$0xff] }
  0x16   :  { %v3106_v9 = vpack.c.bf16 %v164_v7, %v161_v6  ;;  %v167_v12 = vld [vmem:[#allocation2 + $0x68] sm:$0xff]  ;;  %3103 = vmatprep.subr.bf16.mxu0 %v3102_v4  ;;  %3134 = vmatprep.subr.bf16.mxu1 %v3102_v4  ;;  %v170_v13 = vld [vmem:[#allocation2 + $0x80] sm:$0xff]  ;;  %v3108_v14 = vpack.c.bf16 %v163_v11, %v160_v10  ;;  %v169_v17 = vld [vmem:[#allocation2 + $0x78] sm:$0xff] }
  0x17   :  { %3105 = vmatpush1.bf16.msra.mxu0 %v3104_v8  ;;  %3138 = vmatpush1.bf16.msra.mxu1 %v3104_v8  ;;  %v3110_v15 = vpack.c.bf16 %v170_v13, %v167_v12  ;;  %v166_v16 = vld [vmem:[#allocation2 + $0x60] sm:$0xff]  ;;  %v173_v18 = vld [vmem:[#allocation2 + $0x98] sm:$0xff]  ;;  %v176_v19 = vld [vmem:[#allocation2 + $0xb0] sm:$0xff] }
  0x18   :  { %3107 = vmatprep.subr.bf16.mxu0 %v3106_v9  ;;  %3135 = vmatprep.subr.bf16.mxu1 %v3106_v9  ;;  %v3112_v20 = vpack.c.bf16 %v169_v17, %v166_v16  ;;  %v3114_v21 = vpack.c.bf16 %v176_v19, %v173_v18  ;;  %v172_v22 = vld [vmem:[#allocation2 + $0x90] sm:$0xff]  ;;  %v175_v23 = vld [vmem:[#allocation2 + $0xa8] sm:$0xff]  ;;  %v162_v28 = vld [vmem:[#allocation2 + $0x40] sm:$0xff] }
  0x19   :  { %v156_v24 = vld [vmem:[#allocation2 + $0x10] sm:$0xff]  ;;  %v159_v25 = vld [vmem:[#allocation2 + $0x28] sm:$0xff]  ;;  %v3116_v26 = vpack.c.bf16 %v175_v23, %v172_v22  ;;  %v165_v29 = vld [vmem:[#allocation2 + $0x58] sm:$0xff] }
  0x1a   :  { %v3118_v27 = vpack.c.bf16 %v159_v25, %v156_v24  ;;  %v3267_v30 = vld [vmem:[%s4429_s0] sm:$0xff]  ;;  %v3122_v32 = vpack.c.bf16 %v165_v29, %v162_v28  ;;  %v168_v33 = vld [vmem:[#allocation2 + $0x70] sm:$0xff]  ;;  %v171_v34 = vld [vmem:[#allocation2 + $0x88] sm:$0xff] }
  0x1b   :  { %3109 = vmatpush1.bf16.msra.mxu0 %v3108_v14  ;;  %3139 = vmatpush1.bf16.msra.mxu1 %v3108_v14  ;;  %v122_v31 = vld [vmem:[%s4429_s0 + $0x300] sm:$0xff]  ;;  %v3279_v35 = vld [vmem:[%s4429_s0 + $0x8] sm:$0xff]  ;;  %v3126_v37 = vpack.c.bf16 %v171_v34, %v168_v33  ;;  %v3291_v38 = vld [vmem:[%s4429_s0 + $0x10] sm:$0xff] }
  0x1c   :  { %3111 = vmatprep.subr.bf16.mxu0 %v3110_v15  ;;  %3136 = vmatprep.subr.bf16.mxu1 %v3110_v15  ;;  %v123_v36 = vld [vmem:[%s4429_s0 + $0x308] sm:$0xff]  ;;  %v124_v39 = vld [vmem:[%s4429_s0 + $0x310] sm:$0xff]  ;;  %v174_v40 = vld [vmem:[#allocation2 + $0xa0] sm:$0xff] }
  0x1d   :  { %v177_v41 = vld [vmem:[#allocation2 + $0xb8] sm:$0xff]  ;;  %v3319_v45 = vld [vmem:[%s4429_s0 + $0x20] sm:$0xff]  ;;  %v3332_v47 = vld [vmem:[%s4429_s0 + $0x28] sm:$0xff] }
  0x1e   :  { %v3130_v42 = vpack.c.bf16 %v177_v41, %v174_v40  ;;  %v3306_v43 = vld [vmem:[%s4429_s0 + $0x18] sm:$0xff]  ;;  %v126_v46 = vld [vmem:[%s4429_s0 + $0x320] sm:$0xff]  ;;  %v127_v48 = vld [vmem:[%s4429_s0 + $0x328] sm:$0xff] }
  0x1f   :  { %3113 = vmatpush1.bf16.msra.mxu0 %v3112_v20  ;;  %3140 = vmatpush1.bf16.msra.mxu1 %v3112_v20  ;;  %v125_v44 = vld [vmem:[%s4429_s0 + $0x318] sm:$0xff]  ;;  %v3345_v49 = vld [vmem:[%s4429_s0 + $0x30] sm:$0xff]  ;;  %v3371_v53 = vld [vmem:[%s4429_s0 + $0x40] sm:$0xff] }
  0x20   :  { %3115 = vmatprep.subr.bf16.mxu0 %v3114_v21  ;;  %3137 = vmatprep.subr.bf16.mxu1 %v3114_v21  ;;  %v128_v50 = vld [vmem:[%s4429_s0 + $0x330] sm:$0xff]  ;;  %v3358_v51 = vld [vmem:[%s4429_s0 + $0x38] sm:$0xff]  ;;  %v130_v54 = vld [vmem:[%s4429_s0 + $0x340] sm:$0xff] }
  0x21   :  { %v129_v52 = vld [vmem:[%s4429_s0 + $0x338] sm:$0xff]  ;;  %v3384_v55 = vld [vmem:[%s4429_s0 + $0x48] sm:$0xff]  ;;  %v3397_v57 = vld [vmem:[%s4429_s0 + $0x50] sm:$0xff] }
  0x22   :  { %v131_v56 = vld [vmem:[%s4429_s0 + $0x348] sm:$0xff]  ;;  %v132_v58 = vld [vmem:[%s4429_s0 + $0x350] sm:$0xff]  ;;  %v3410_v59 = vld [vmem:[%s4429_s0 + $0x58] sm:$0xff] }
  0x23   :  { %3117 = vmatpush1.bf16.msra.mxu0 %v3116_v26  ;;  %3141 = vmatpush1.bf16.msra.mxu1 %v3116_v26  ;;  %v133_v60 = vld [vmem:[%s4429_s0 + $0x358] sm:$0xff]  ;;  %v3423_v61 = vld [vmem:[%s4429_s0 + $0x60] sm:$0xff]  ;;  %v3436_v63 = vld [vmem:[%s4429_s0 + $0x68] sm:$0xff] }
  0x24   :  { %3119 = vmatprep.subr.bf16.mxu1 %v3118_v27  ;;  %v134_v62 = vld [vmem:[%s4429_s0 + $0x360] sm:$0xff]  ;;  %v135_v1 = vld [vmem:[%s4429_s0 + $0x368] sm:$0xff]  ;;  %v3449_v2 = vld [vmem:[%s4429_s0 + $0x70] sm:$0xff] }
  0x25   :  { %v136_v3 = vld [vmem:[%s4429_s0 + $0x370] sm:$0xff]  ;;  %v3462_v4 = vld [vmem:[%s4429_s0 + $0x78] sm:$0xff]  ;;  %v3475_v6 = vld [vmem:[%s4429_s0 + $0x80] sm:$0xff] }
  0x26   :  { %2502 = vmatmul.mubr.msk.f32.vlgmr.msra.gmra.mrb[0].mxu0 %vm178_vm0, %v3267_v30  ;;  %2598 = vmatmul.mubr.msk.f32.vlgmr.msra.gmra.mrb[0].mxu1 %vm178_vm0, %v122_v31  ;;  %v137_v5 = vld [vmem:[%s4429_s0 + $0x378] sm:$0xff]  ;;  %v138_v7 = vld [vmem:[%s4429_s0 + $0x380] sm:$0xff]  ;;  %v3488_v8 = vld [vmem:[%s4429_s0 + $0x88] sm:$0xff] }
  0x27   :  { %3121 = vmatpush3.bf16.msra.mxu1 %v3118_v27  ;;  %633 = vmatprep.mubr.f32.mxu0 %v3230_v0  ;;  %v139_v9 = vld [vmem:[%s4429_s0 + $0x388] sm:$0xff]  ;;  %v3501_v10 = vld [vmem:[%s4429_s0 + $0x90] sm:$0xff]  ;;  %v3514_v12 = vld [vmem:[%s4429_s0 + $0x98] sm:$0xff] }
  0x28   :  { %1209 = vmatprep.mubr.f32.mxu1 %v3230_v0  ;;  %3123 = vmatprep.subr.bf16.mxu1 %v3122_v32  ;;  %v140_v11 = vld [vmem:[%s4429_s0 + $0x390] sm:$0xff]  ;;  %v141_v13 = vld [vmem:[%s4429_s0 + $0x398] sm:$0xff]  ;;  %v3527_v14 = vld [vmem:[%s4429_s0 + $0xa0] sm:$0xff] }
  0x29   :  { %v142_v15 = vld [vmem:[%s4429_s0 + $0x3a0] sm:$0xff]  ;;  %v3540_v16 = vld [vmem:[%s4429_s0 + $0xa8] sm:$0xff]  ;;  %v3553_v18 = vld [vmem:[%s4429_s0 + $0xb0] sm:$0xff] }
  0x2a   :  { %2503 = vmatmul.mubr.msk.f32.gmra.mrb[2].mxu0 %vm178_vm0, %v3279_v35  ;;  %2599 = vmatmul.mubr.msk.f32.gmra.mrb[2].mxu1 %vm178_vm0, %v123_v36  ;;  %v143_v17 = vld [vmem:[%s4429_s0 + $0x3a8] sm:$0xff]  ;;  %v144_v19 = vld [vmem:[%s4429_s0 + $0x3b0] sm:$0xff]  ;;  %v3566_v20 = vld [vmem:[%s4429_s0 + $0xb8] sm:$0xff] }
  0x2b   :  { %639 = vmatprep.mubr.f32.mxu0 %v3230_v0  ;;  %1215 = vmatprep.mubr.f32.mxu1 %v3230_v0  ;;  %v145_v21 = vld [vmem:[%s4429_s0 + $0x3b8] sm:$0xff]  ;;  %v3579_v22 = vld [vmem:[%s4429_s0 + $0xc0] sm:$0xff]  ;;  %v3592_v24 = vld [vmem:[%s4429_s0 + $0xc8] sm:$0xff] }
  0x2c   :  { %3125 = vmatpush3.bf16.msra.mxu1 %v3122_v32  ;;  %v146_v23 = vld [vmem:[%s4429_s0 + $0x3c0] sm:$0xff]  ;;  %v147_v25 = vld [vmem:[%s4429_s0 + $0x3c8] sm:$0xff]  ;;  %v3605_v26 = vld [vmem:[%s4429_s0 + $0xd0] sm:$0xff] }
  0x2d   :  { %3127 = vmatprep.subr.bf16.mxu1 %v3126_v37  ;;  %v148_v27 = vld [vmem:[%s4429_s0 + $0x3d0] sm:$0xff]  ;;  %v3618_v28 = vld [vmem:[%s4429_s0 + $0xd8] sm:$0xff]  ;;  %v3631_v31 = vld [vmem:[%s4429_s0 + $0xe0] sm:$0xff] }
  0x2e   :  { %2504 = vmatmul.mubr.msk.f32.gmra.mrb[4].mxu0 %vm178_vm0, %v3291_v38  ;;  %2600 = vmatmul.mubr.msk.f32.gmra.mrb[4].mxu1 %vm178_vm0, %v124_v39  ;;  %v149_v29 = vld [vmem:[%s4429_s0 + $0x3d8] sm:$0xff]  ;;  %v150_v32 = vld [vmem:[%s4429_s0 + $0x3e0] sm:$0xff]  ;;  %v3644_v33 = vld [vmem:[%s4429_s0 + $0xe8] sm:$0xff] }
  0x2f   :  { %645 = vmatprep.mubr.f32.mxu0 %v3230_v0  ;;  %1221 = vmatprep.mubr.f32.mxu1 %v3230_v0  ;;  %v151_v34 = vld [vmem:[%s4429_s0 + $0x3e8] sm:$0xff]  ;;  %v3657_v36 = vld [vmem:[%s4429_s0 + $0xf0] sm:$0xff]  ;;  %v3670_v39 = vld [vmem:[%s4429_s0 + $0xf8] sm:$0xff] }
  0x30   :  { %3129 = vmatpush3.bf16.msra.mxu1 %v3126_v37  ;;  %v152_v37 = vld [vmem:[%s4429_s0 + $0x3f0] sm:$0xff]  ;;  %v153_v40 = vld [vmem:[%s4429_s0 + $0x3f8] sm:$0xff]  ;;  %v3684_v41 = vld [vmem:[%s4429_s0 + $0x100] sm:$0xff] }
  0x31   :  { %3131 = vmatprep.subr.bf16.mxu1 %v3130_v42 }
  0x32   :  { %2505 = vmatmul.mubr.msk.f32.gmra.mrb[6].mxu0 %vm178_vm0, %v3306_v43  ;;  %2601 = vmatmul.mubr.msk.f32.gmra.mrb[6].mxu1 %vm178_vm0, %v125_v44  ;;  %v3756_v44 = vld [vmem:[%s4429_s0 + $0x130] sm:$0xff] }
  0x33   :  { %651 = vmatprep.mubr.f32.mxu0 %v3230_v0  ;;  %1227 = vmatprep.mubr.f32.mxu1 %v3230_v0 }
  0x34   :  { %3133 = vmatpush3.bf16.msra.mxu1 %v3130_v42  ;;  %v3732_v42 = vld [vmem:[%s4429_s0 + $0x120] sm:$0xff] }
  0x36   :  { %2506 = vmatmul.mubr.msk.f32.gmra.mrb[8].mxu0 %vm178_vm0, %v3319_v45  ;;  %2602 = vmatmul.mubr.msk.f32.gmra.mrb[8].mxu1 %vm178_vm0, %v126_v46  ;;  %v66_v46 = vld [vmem:[%s4429_s0 + $0x140] sm:$0xff] }
  0x37   :  { %657 = vmatprep.mubr.f32.mxu0 %v3230_v0  ;;  %1233 = vmatprep.mubr.f32.mxu1 %v3230_v0 }
  0x3a   :  { %2507 = vmatmul.mubr.msk.f32.gmra.mrb[10].mxu0 %vm178_vm0, %v3332_v47  ;;  %2603 = vmatmul.mubr.msk.f32.gmra.mrb[10].mxu1 %vm178_vm0, %v127_v48  ;;  %v68_v48 = vld [vmem:[%s4429_s0 + $0x150] sm:$0xff] }
  0x3b   :  { %663 = vmatprep.mubr.f32.mxu0 %v3230_v0  ;;  %1239 = vmatprep.mubr.f32.mxu1 %v3230_v0 }
  0x3e   :  { %2508 = vmatmul.mubr.msk.f32.gmra.mrb[12].mxu0 %vm178_vm0, %v3345_v49  ;;  %2604 = vmatmul.mubr.msk.f32.gmra.mrb[12].mxu1 %vm178_vm0, %v128_v50  ;;  %v70_v50 = vld [vmem:[%s4429_s0 + $0x160] sm:$0xff] }
  0x3f   :  { %669 = vmatprep.mubr.f32.mxu0 %v3230_v0  ;;  %1245 = vmatprep.mubr.f32.mxu1 %v3230_v0 }
  0x42   :  { %2509 = vmatmul.mubr.msk.f32.gmra.mrb[14].mxu0 %vm178_vm0, %v3358_v51  ;;  %2605 = vmatmul.mubr.msk.f32.gmra.mrb[14].mxu1 %vm178_vm0, %v129_v52  ;;  %v72_v52 = vld [vmem:[%s4429_s0 + $0x170] sm:$0xff] }
  0x43   :  { %675 = vmatprep.mubr.f32.mxu0 %v3230_v0  ;;  %1251 = vmatprep.mubr.f32.mxu1 %v3230_v0 }
  0x46   :  { %2510 = vmatmul.mubr.msk.f32.gmra.mrb[16].mxu0 %vm178_vm0, %v3371_v53  ;;  %2606 = vmatmul.mubr.msk.f32.gmra.mrb[16].mxu1 %vm178_vm0, %v130_v54  ;;  %v3852_v54 = vld [vmem:[%s4429_s0 + $0x180] sm:$0xff] }
  0x47   :  { %681 = vmatprep.mubr.f32.mxu0 %v3230_v0  ;;  %1257 = vmatprep.mubr.f32.mxu1 %v3230_v0 }
  0x4a   :  { %2511 = vmatmul.mubr.msk.f32.gmra.mrb[18].mxu0 %vm178_vm0, %v3384_v55  ;;  %2607 = vmatmul.mubr.msk.f32.gmra.mrb[18].mxu1 %vm178_vm0, %v131_v56  ;;  %v3876_v56 = vld [vmem:[%s4429_s0 + $0x190] sm:$0xff] }
  0x4b   :  { %687 = vmatprep.mubr.f32.mxu0 %v3230_v0  ;;  %1263 = vmatprep.mubr.f32.mxu1 %v3230_v0 }
  0x4e   :  { %2512 = vmatmul.mubr.msk.f32.gmra.mrb[20].mxu0 %vm178_vm0, %v3397_v57  ;;  %2608 = vmatmul.mubr.msk.f32.gmra.mrb[20].mxu1 %vm178_vm0, %v132_v58  ;;  %v3898_v58 = vld [vmem:[%s4429_s0 + $0x1a0] sm:$0xff] }
  0x4f   :  { %693 = vmatprep.mubr.f32.mxu0 %v3230_v0  ;;  %1269 = vmatprep.mubr.f32.mxu1 %v3230_v0 }
  0x52   :  { %2513 = vmatmul.mubr.msk.f32.gmra.mrb[22].mxu0 %vm178_vm0, %v3410_v59  ;;  %2609 = vmatmul.mubr.msk.f32.gmra.mrb[22].mxu1 %vm178_vm0, %v133_v60 }
  0x53   :  { %699 = vmatprep.mubr.f32.mxu0 %v3230_v0  ;;  %1275 = vmatprep.mubr.f32.mxu1 %v3230_v0 }
  0x56   :  { %2514 = vmatmul.mubr.msk.f32.gmra.mrb[24].mxu0 %vm178_vm0, %v3423_v61  ;;  %2610 = vmatmul.mubr.msk.f32.gmra.mrb[24].mxu1 %vm178_vm0, %v134_v62 }
  0x57   :  { %705 = vmatprep.mubr.f32.mxu0 %v3230_v0  ;;  %1281 = vmatprep.mubr.f32.mxu1 %v3230_v0 }
  0x5a   :  { %2515 = vmatmul.mubr.msk.f32.gmra.mrb[26].mxu0 %vm178_vm0, %v3436_v63  ;;  %2611 = vmatmul.mubr.msk.f32.gmra.mrb[26].mxu1 %vm178_vm0, %v135_v1  ;;  %v3918_v1 = vld [vmem:[%s4429_s0 + $0x1b0] sm:$0xff] }
  0x5b   :  { %711 = vmatprep.mubr.f32.mxu0 %v3230_v0  ;;  %1287 = vmatprep.mubr.f32.mxu1 %v3230_v0 }
  0x5e   :  { %2516 = vmatmul.mubr.msk.f32.gmra.mrb[28].mxu0 %vm178_vm0, %v3449_v2  ;;  %2612 = vmatmul.mubr.msk.f32.gmra.mrb[28].mxu1 %vm178_vm0, %v136_v3 }
  0x5f   :  { %717 = vmatprep.mubr.f32.mxu0 %v3230_v0  ;;  %1293 = vmatprep.mubr.f32.mxu1 %v3230_v0 }
  0x62   :  { %2517 = vmatmul.mubr.msk.f32.gmra.mrb[30].mxu0 %vm178_vm0, %v3462_v4  ;;  %2613 = vmatmul.mubr.msk.f32.gmra.mrb[30].mxu1 %vm178_vm0, %v137_v5 }
  0x63   :  { %723 = vmatprep.mubr.f32.mxu0 %v3230_v0  ;;  %1299 = vmatprep.mubr.f32.mxu1 %v3230_v0 }
  0x66   :  { %2518 = vmatmul.mubr.msk.f32.gmra.mrb[32].mxu0 %vm178_vm0, %v3475_v6  ;;  %2614 = vmatmul.mubr.msk.f32.gmra.mrb[32].mxu1 %vm178_vm0, %v138_v7 }
  0x67   :  { %729 = vmatprep.mubr.f32.mxu0 %v3230_v0  ;;  %1305 = vmatprep.mubr.f32.mxu1 %v3230_v0 }
  0x6a   :  { %2519 = vmatmul.mubr.msk.f32.gmra.mrb[34].mxu0 %vm178_vm0, %v3488_v8  ;;  %2615 = vmatmul.mubr.msk.f32.gmra.mrb[34].mxu1 %vm178_vm0, %v139_v9 }
  0x6b   :  { %735 = vmatprep.mubr.f32.mxu0 %v3230_v0  ;;  %1311 = vmatprep.mubr.f32.mxu1 %v3230_v0 }
  0x6e   :  { %2520 = vmatmul.mubr.msk.f32.gmra.mrb[36].mxu0 %vm178_vm0, %v3501_v10  ;;  %2616 = vmatmul.mubr.msk.f32.gmra.mrb[36].mxu1 %vm178_vm0, %v140_v11  ;;  %v82_v11 = vld [vmem:[%s4429_s0 + $0x1c0] sm:$0xff] }
  0x6f   :  { %741 = vmatprep.mubr.f32.mxu0 %v3230_v0  ;;  %1317 = vmatprep.mubr.f32.mxu1 %v3230_v0 }
  0x72   :  { %2521 = vmatmul.mubr.msk.f32.gmra.mrb[38].mxu0 %vm178_vm0, %v3514_v12  ;;  %2617 = vmatmul.mubr.msk.f32.gmra.mrb[38].mxu1 %vm178_vm0, %v141_v13 }
  0x73   :  { %747 = vmatprep.mubr.f32.mxu0 %v3230_v0  ;;  %1323 = vmatprep.mubr.f32.mxu1 %v3230_v0 }
  0x76   :  { %2522 = vmatmul.mubr.msk.f32.gmra.mrb[40].mxu0 %vm178_vm0, %v3527_v14  ;;  %2618 = vmatmul.mubr.msk.f32.gmra.mrb[40].mxu1 %vm178_vm0, %v142_v15 }
  0x77   :  { %753 = vmatprep.mubr.f32.mxu0 %v3230_v0  ;;  %1329 = vmatprep.mubr.f32.mxu1 %v3230_v0 }
  0x7a   :  { %2523 = vmatmul.mubr.msk.f32.gmra.mrb[42].mxu0 %vm178_vm0, %v3540_v16  ;;  %2619 = vmatmul.mubr.msk.f32.gmra.mrb[42].mxu1 %vm178_vm0, %v143_v17 }
  0x7b   :  { %759 = vmatprep.mubr.f32.mxu0 %v3230_v0  ;;  %1335 = vmatprep.mubr.f32.mxu1 %v3230_v0 }
  0x7e   :  { %2524 = vmatmul.mubr.msk.f32.gmra.mrb[44].mxu0 %vm178_vm0, %v3553_v18  ;;  %2620 = vmatmul.mubr.msk.f32.gmra.mrb[44].mxu1 %vm178_vm0, %v144_v19 }
  0x7f   :  { %765 = vmatprep.mubr.f32.mxu0 %v3230_v0  ;;  %1341 = vmatprep.mubr.f32.mxu1 %v3230_v0 }
  0x82   :  { %2525 = vmatmul.mubr.msk.f32.gmra.mrb[46].mxu0 %vm178_vm0, %v3566_v20  ;;  %2621 = vmatmul.mubr.msk.f32.gmra.mrb[46].mxu1 %vm178_vm0, %v145_v21  ;;  %v84_v21 = vld [vmem:[%s4429_s0 + $0x1d0] sm:$0xff] }
  0x83   :  { %771 = vmatprep.mubr.f32.mxu0 %v3230_v0  ;;  %1347 = vmatprep.mubr.f32.mxu1 %v3230_v0 }
  0x86   :  { %2526 = vmatmul.mubr.msk.f32.gmra.mrb[48].mxu0 %vm178_vm0, %v3579_v22  ;;  %2622 = vmatmul.mubr.msk.f32.gmra.mrb[48].mxu1 %vm178_vm0, %v146_v23 }
  0x87   :  { %777 = vmatprep.mubr.f32.mxu0 %v3230_v0  ;;  %1353 = vmatprep.mubr.f32.mxu1 %v3230_v0 }
  0x8a   :  { %2527 = vmatmul.mubr.msk.f32.gmra.mrb[50].mxu0 %vm178_vm0, %v3592_v24  ;;  %2623 = vmatmul.mubr.msk.f32.gmra.mrb[50].mxu1 %vm178_vm0, %v147_v25 }
  0x8b   :  { %783 = vmatprep.mubr.f32.mxu0 %v3230_v0  ;;  %1359 = vmatprep.mubr.f32.mxu1 %v3230_v0 }
  0x8e   :  { %2528 = vmatmul.mubr.msk.f32.gmra.mrb[52].mxu0 %vm178_vm0, %v3605_v26  ;;  %2624 = vmatmul.mubr.msk.f32.gmra.mrb[52].mxu1 %vm178_vm0, %v148_v27 }
  0x8f   :  { %789 = vmatprep.mubr.f32.mxu0 %v3230_v0  ;;  %1365 = vmatprep.mubr.f32.mxu1 %v3230_v0 }
  0x92   :  { %2529 = vmatmul.mubr.msk.f32.gmra.mrb[54].mxu0 %vm178_vm0, %v3618_v28  ;;  %2625 = vmatmul.mubr.msk.f32.gmra.mrb[54].mxu1 %vm178_vm0, %v149_v29 }
  0x93   :  { %795 = vmatprep.mubr.f32.mxu0 %v3230_v0  ;;  %1371 = vmatprep.mubr.f32.mxu1 %v3230_v0 }
  0x96   :  { %2530 = vmatmul.mubr.msk.f32.gmra.mrb[56].mxu0 %vm178_vm0, %v3631_v31  ;;  %2626 = vmatmul.mubr.msk.f32.gmra.mrb[56].mxu1 %vm178_vm0, %v150_v32  ;;  %v86_v32 = vld [vmem:[%s4429_s0 + $0x1e0] sm:$0xff] }
  0x97   :  { %801 = vmatprep.mubr.f32.mxu0 %v3230_v0  ;;  %1377 = vmatprep.mubr.f32.mxu1 %v3230_v0 }
  0x9a   :  { %2531 = vmatmul.mubr.msk.f32.gmra.mrb[58].mxu0 %vm178_vm0, %v3644_v33  ;;  %2627 = vmatmul.mubr.msk.f32.gmra.mrb[58].mxu1 %vm178_vm0, %v151_v34 }
  0x9b   :  { %807 = vmatprep.mubr.f32.mxu0 %v3230_v0  ;;  %1383 = vmatprep.mubr.f32.mxu1 %v3230_v0 }
  0x9e   :  { %2532 = vmatmul.mubr.msk.f32.gmra.mrb[60].mxu0 %vm178_vm0, %v3657_v36  ;;  %2628 = vmatmul.mubr.msk.f32.gmra.mrb[60].mxu1 %vm178_vm0, %v152_v37 }
  0x9f   :  { %813 = vmatprep.mubr.f32.mxu0 %v3230_v0  ;;  %1389 = vmatprep.mubr.f32.mxu1 %v3230_v0 }
  0xa2   :  { %2533 = vmatmul.mubr.msk.f32.gmra.mrb[62].mxu0 %vm178_vm0, %v3670_v39  ;;  %2629 = vmatmul.mubr.msk.f32.gmra.mrb[62].mxu1 %vm178_vm0, %v153_v40 }
  0xa3   :  { %819 = vmatprep.mubr.f32.mxu0 %v3230_v0  ;;  %2910 = vmatprep.mubr.msk.f32.mxu1 %vm178_vm0, %v3267_v30  ;;  %v3696_v30 = vld [vmem:[%s4429_s0 + $0x108] sm:$0xff] }
  0xa6   :  { %2534 = vmatmul.mubr.msk.f32.gmra.mrb[64].mxu0 %vm178_vm0, %v3684_v41  ;;  %2911 = vmatmul.mubr.msk.f32.vlgmr.msra.gmra.mrb[64].mxu1 %vm178_vm0, %v3279_v35  ;;  %v3708_v35 = vld [vmem:[%s4429_s0 + $0x110] sm:$0xff] }
  0xa7   :  { %825 = vmatprep.mubr.f32.mxu0 %v3230_v0  ;;  %2913 = vmatprep.mubr.msk.f32.mxu1 %vm178_vm0, %v3291_v38  ;;  %v3720_v38 = vld [vmem:[%s4429_s0 + $0x118] sm:$0xff] }
  0xaa   :  { %2535 = vmatmul.mubr.msk.f32.gmra.mrb[66].mxu0 %vm178_vm0, %v3696_v30  ;;  %2914 = vmatmul.mubr.msk.f32.gmra.mrb[66].mxu1 %vm178_vm0, %v3306_v43  ;;  %v3744_v43 = vld [vmem:[%s4429_s0 + $0x128] sm:$0xff] }
  0xab   :  { %831 = vmatprep.mubr.f32.mxu0 %v3230_v0  ;;  %2916 = vmatprep.mubr.msk.f32.mxu1 %vm178_vm0, %v3319_v45  ;;  %v65_v45 = vld [vmem:[%s4429_s0 + $0x138] sm:$0xff] }
  0xae   :  { %2536 = vmatmul.mubr.msk.f32.gmra.mrb[68].mxu0 %vm178_vm0, %v3708_v35  ;;  %2917 = vmatmul.mubr.msk.f32.gmra.mrb[68].mxu1 %vm178_vm0, %v3332_v47  ;;  %v67_v47 = vld [vmem:[%s4429_s0 + $0x148] sm:$0xff] }
  0xaf   :  { %837 = vmatprep.mubr.f32.mxu0 %v3230_v0  ;;  %2919 = vmatprep.mubr.msk.f32.mxu1 %vm178_vm0, %v3345_v49  ;;  %v69_v49 = vld [vmem:[%s4429_s0 + $0x158] sm:$0xff] }
  0xb2   :  { %2537 = vmatmul.mubr.msk.f32.gmra.mrb[70].mxu0 %vm178_vm0, %v3720_v38  ;;  %2920 = vmatmul.mubr.msk.f32.gmra.mrb[70].mxu1 %vm178_vm0, %v3358_v51  ;;  %v71_v51 = vld [vmem:[%s4429_s0 + $0x168] sm:$0xff] }
  0xb3   :  { %843 = vmatprep.mubr.f32.mxu0 %v3230_v0  ;;  %2922 = vmatprep.mubr.msk.f32.mxu1 %vm178_vm0, %v3371_v53  ;;  %v3840_v53 = vld [vmem:[%s4429_s0 + $0x178] sm:$0xff] }
  0xb6   :  { %2538 = vmatmul.mubr.msk.f32.gmra.mrb[72].mxu0 %vm178_vm0, %v3732_v42  ;;  %2923 = vmatmul.mubr.msk.f32.gmra.mrb[72].mxu1 %vm178_vm0, %v3384_v55  ;;  %v3864_v55 = vld [vmem:[%s4429_s0 + $0x188] sm:$0xff] }
  0xb7   :  { %849 = vmatprep.mubr.f32.mxu0 %v3230_v0  ;;  %2925 = vmatprep.mubr.msk.f32.mxu1 %vm178_vm0, %v3397_v57  ;;  %v3888_v57 = vld [vmem:[%s4429_s0 + $0x198] sm:$0xff] }
  0xba   :  { %2539 = vmatmul.mubr.msk.f32.gmra.mrb[74].mxu0 %vm178_vm0, %v3744_v43  ;;  %2926 = vmatmul.mubr.msk.f32.gmra.mrb[74].mxu1 %vm178_vm0, %v3410_v59  ;;  %v3908_v59 = vld [vmem:[%s4429_s0 + $0x1a8] sm:$0xff] }
  0xbb   :  { %855 = vmatprep.mubr.f32.mxu0 %v3230_v0  ;;  %2928 = vmatprep.mubr.msk.f32.mxu1 %vm178_vm0, %v3423_v61 }
  0xbe   :  { %2540 = vmatmul.mubr.msk.f32.gmra.mrb[76].mxu0 %vm178_vm0, %v3756_v44  ;;  %2929 = vmatmul.mubr.msk.f32.gmra.mrb[76].mxu1 %vm178_vm0, %v3436_v63 }
  0xbf   :  { %861 = vmatprep.mubr.f32.mxu0 %v3230_v0  ;;  %2931 = vmatprep.mubr.msk.f32.mxu1 %vm178_vm0, %v3449_v2 }
  0xc2   :  { %2541 = vmatmul.mubr.msk.f32.gmra.mrb[78].mxu0 %vm178_vm0, %v65_v45  ;;  %2932 = vmatmul.mubr.msk.f32.gmra.mrb[78].mxu1 %vm178_vm0, %v3462_v4 }
  0xc3   :  { %867 = vmatprep.mubr.f32.mxu0 %v3230_v0  ;;  %2934 = vmatprep.mubr.msk.f32.mxu1 %vm178_vm0, %v3475_v6  ;;  %v81_v6 = vld [vmem:[%s4429_s0 + $0x1b8] sm:$0xff] }
  0xc6   :  { %2542 = vmatmul.mubr.msk.f32.gmra.mrb[80].mxu0 %vm178_vm0, %v66_v46  ;;  %2935 = vmatmul.mubr.msk.f32.gmra.mrb[80].mxu1 %vm178_vm0, %v3488_v8 }
  0xc7   :  { %873 = vmatprep.mubr.f32.mxu0 %v3230_v0  ;;  %2937 = vmatprep.mubr.msk.f32.mxu1 %vm178_vm0, %v3501_v10 }
  0xca   :  { %2543 = vmatmul.mubr.msk.f32.gmra.mrb[82].mxu0 %vm178_vm0, %v67_v47  ;;  %2938 = vmatmul.mubr.msk.f32.gmra.mrb[82].mxu1 %vm178_vm0, %v3514_v12 }
  0xcb   :  { %879 = vmatprep.mubr.f32.mxu0 %v3230_v0  ;;  %2940 = vmatprep.mubr.msk.f32.mxu1 %vm178_vm0, %v3527_v14 }
  0xce   :  { %2544 = vmatmul.mubr.msk.f32.gmra.mrb[84].mxu0 %vm178_vm0, %v68_v48  ;;  %2941 = vmatmul.mubr.msk.f32.gmra.mrb[84].mxu1 %vm178_vm0, %v3540_v16  ;;  %v83_v16 = vld [vmem:[%s4429_s0 + $0x1c8] sm:$0xff] }
  0xcf   :  { %885 = vmatprep.mubr.f32.mxu0 %v3230_v0  ;;  %2943 = vmatprep.mubr.msk.f32.mxu1 %vm178_vm0, %v3553_v18 }
  0xd2   :  { %2545 = vmatmul.mubr.msk.f32.gmra.mrb[86].mxu0 %vm178_vm0, %v69_v49  ;;  %2944 = vmatmul.mubr.msk.f32.gmra.mrb[86].mxu1 %vm178_vm0, %v3566_v20 }
  0xd3   :  { %891 = vmatprep.mubr.f32.mxu0 %v3230_v0  ;;  %2946 = vmatprep.mubr.msk.f32.mxu1 %vm178_vm0, %v3579_v22 }
  0xd6   :  { %2546 = vmatmul.mubr.msk.f32.gmra.mrb[88].mxu0 %vm178_vm0, %v70_v50  ;;  %2947 = vmatmul.mubr.msk.f32.gmra.mrb[88].mxu1 %vm178_vm0, %v3592_v24 }
  0xd7   :  { %897 = vmatprep.mubr.f32.mxu0 %v3230_v0  ;;  %2949 = vmatprep.mubr.msk.f32.mxu1 %vm178_vm0, %v3605_v26  ;;  %v85_v26 = vld [vmem:[%s4429_s0 + $0x1d8] sm:$0xff] }
  0xda   :  { %2547 = vmatmul.mubr.msk.f32.gmra.mrb[90].mxu0 %vm178_vm0, %v71_v51  ;;  %2950 = vmatmul.mubr.msk.f32.gmra.mrb[90].mxu1 %vm178_vm0, %v3618_v28 }
  0xdb   :  { %903 = vmatprep.mubr.f32.mxu0 %v3230_v0  ;;  %2952 = vmatprep.mubr.msk.f32.mxu1 %vm178_vm0, %v3631_v31 }
  0xde   :  { %2548 = vmatmul.mubr.msk.f32.gmra.mrb[92].mxu0 %vm178_vm0, %v72_v52  ;;  %2953 = vmatmul.mubr.msk.f32.gmra.mrb[92].mxu1 %vm178_vm0, %v3644_v33 }
  0xdf   :  { %909 = vmatprep.mubr.f32.mxu0 %v3230_v0  ;;  %2955 = vmatprep.mubr.msk.f32.mxu1 %vm178_vm0, %v3657_v36 }
  0xe2   :  { %2549 = vmatmul.mubr.msk.f32.gmra.mrb[94].mxu0 %vm178_vm0, %v3840_v53  ;;  %2956 = vmatmul.mubr.msk.f32.gmra.mrb[94].mxu1 %vm178_vm0, %v3670_v39  ;;  %v87_v39 = vld [vmem:[%s4429_s0 + $0x1e8] sm:$0xff] }
  0xe3   :  { %915 = vmatprep.mubr.f32.mxu0 %v3230_v0  ;;  %2958 = vmatprep.mubr.msk.f32.mxu1 %vm178_vm0, %v3684_v41 }
  0xe6   :  { %2550 = vmatmul.mubr.msk.f32.gmra.mrb[96].mxu0 %vm178_vm0, %v3852_v54  ;;  %2959 = vmatmul.mubr.msk.f32.gmra.mrb[96].mxu1 %vm178_vm0, %v3696_v30 }
  0xe7   :  { %921 = vmatprep.mubr.f32.mxu0 %v3230_v0  ;;  %2961 = vmatprep.mubr.msk.f32.mxu1 %vm178_vm0, %v3708_v35 }
  0xea   :  { %2551 = vmatmul.mubr.msk.f32.gmra.mrb[98].mxu0 %vm178_vm0, %v3864_v55  ;;  %2962 = vmatmul.mubr.msk.f32.gmra.mrb[98].mxu1 %vm178_vm0, %v3720_v38  ;;  %v88_v38 = vld [vmem:[%s4429_s0 + $0x1f0] sm:$0xff] }
  0xeb   :  { %927 = vmatprep.mubr.f32.mxu0 %v3230_v0  ;;  %2964 = vmatprep.mubr.msk.f32.mxu1 %vm178_vm0, %v3732_v42 }
  0xee   :  { %2552 = vmatmul.mubr.msk.f32.gmra.mrb[100].mxu0 %vm178_vm0, %v3876_v56  ;;  %2965 = vmatmul.mubr.msk.f32.gmra.mrb[100].mxu1 %vm178_vm0, %v3744_v43 }
  0xef   :  { %933 = vmatprep.mubr.f32.mxu0 %v3230_v0  ;;  %2967 = vmatprep.mubr.msk.f32.mxu1 %vm178_vm0, %v3756_v44 }
  0xf2   :  { %2553 = vmatmul.mubr.msk.f32.gmra.mrb[102].mxu0 %vm178_vm0, %v3888_v57  ;;  %2968 = vmatmul.mubr.msk.f32.gmra.mrb[102].mxu1 %vm178_vm0, %v65_v45 }
  0xf3   :  { %939 = vmatprep.mubr.f32.mxu0 %v3230_v0  ;;  %2970 = vmatprep.mubr.msk.f32.mxu1 %vm178_vm0, %v66_v46  ;;  %v89_v46 = vld [vmem:[%s4429_s0 + $0x1f8] sm:$0xff] }
  0xf6   :  { %2554 = vmatmul.mubr.msk.f32.gmra.mrb[104].mxu0 %vm178_vm0, %v3898_v58  ;;  %2971 = vmatmul.mubr.msk.f32.gmra.mrb[104].mxu1 %vm178_vm0, %v67_v47  ;;  %v90_v47 = vld [vmem:[%s4429_s0 + $0x200] sm:$0xff] }
  0xf7   :  { %945 = vmatprep.mubr.f32.mxu0 %v3230_v0  ;;  %2973 = vmatprep.mubr.msk.f32.mxu1 %vm178_vm0, %v68_v48 }
  0xf9   :  { %v629_v60 = vpop.f32.mrb[0].mxu0  ;;  %v1205_v61 = vpop.f32.mrb[0].mxu1 }
  0xfa   :  { %2101 = vst [vmem:[#allocation5] sm:$0xff] %v629_v60  ;;  %2389 = vst [vmem:[#allocation5 + $0x900] sm:$0xff] %v1205_v61  ;;  %v631_v62 = vpop.f32.mrb[1].mxu0  ;;  %2555 = vmatmul.mubr.msk.f32.gmra.mrb[106].mxu0 %vm178_vm0, %v3908_v59  ;;  %v1207_v63 = vpop.f32.mrb[1].mxu1  ;;  %2974 = vmatmul.mubr.msk.f32.gmra.mrb[106].mxu1 %vm178_vm0, %v69_v49 }
  0xfb   :  { %2102 = vst [vmem:[#allocation5 + $0x8] sm:$0xff] %v631_v62  ;;  %2390 = vst [vmem:[#allocation5 + $0x908] sm:$0xff] %v1207_v63  ;;  %951 = vmatprep.mubr.f32.mxu0 %v3230_v0  ;;  %2976 = vmatprep.mubr.msk.f32.mxu1 %vm178_vm0, %v70_v50 }
  0xfd   :  { %v635_v2 = vpop.f32.mrb[2].mxu0  ;;  %v1211_v3 = vpop.f32.mrb[2].mxu1 }
  0xfe   :  { %2104 = vst [vmem:[#allocation5 + $0x18] sm:$0xff] %v635_v2  ;;  %2392 = vst [vmem:[#allocation5 + $0x918] sm:$0xff] %v1211_v3  ;;  %v637_v4 = vpop.f32.mrb[3].mxu0  ;;  %2556 = vmatmul.mubr.msk.f32.gmra.mrb[108].mxu0 %vm178_vm0, %v3918_v1  ;;  %v1213_v5 = vpop.f32.mrb[3].mxu1  ;;  %2977 = vmatmul.mubr.msk.f32.gmra.mrb[108].mxu1 %vm178_vm0, %v71_v51  ;;  %v96_v2 = vld [vmem:[%s4429_s0 + $0x230] sm:$0xff] }
  0xff   :  { %2105 = vst [vmem:[#allocation5 + $0x20] sm:$0xff] %v637_v4  ;;  %2393 = vst [vmem:[#allocation5 + $0x920] sm:$0xff] %v1213_v5  ;;  %957 = vmatprep.mubr.f32.mxu0 %v3230_v0  ;;  %2979 = vmatprep.mubr.msk.f32.mxu1 %vm178_vm0, %v72_v52  ;;  %v91_v52 = vld [vmem:[%s4429_s0 + $0x208] sm:$0xff] }
 0x101   :  { %v641_v7 = vpop.f32.mrb[4].mxu0  ;;  %v1217_v8 = vpop.f32.mrb[4].mxu1 }
 0x102   :  { %2107 = vst [vmem:[#allocation5 + $0x30] sm:$0xff] %v641_v7  ;;  %2395 = vst [vmem:[#allocation5 + $0x930] sm:$0xff] %v1217_v8  ;;  %v643_v9 = vpop.f32.mrb[5].mxu0  ;;  %2557 = vmatmul.mubr.msk.f32.gmra.mrb[110].mxu0 %vm178_vm0, %v81_v6  ;;  %v1219_v10 = vpop.f32.mrb[5].mxu1  ;;  %2980 = vmatmul.mubr.msk.f32.gmra.mrb[110].mxu1 %vm178_vm0, %v3840_v53  ;;  %v92_v53 = vld [vmem:[%s4429_s0 + $0x210] sm:$0xff]  ;;  %v4032_v7 = vld [vmem:[%s4429_s0 + $0x238] sm:$0xff] }
 0x103   :  { %2108 = vst [vmem:[#allocation5 + $0x38] sm:$0xff] %v643_v9  ;;  %2396 = vst [vmem:[#allocation5 + $0x938] sm:$0xff] %v1219_v10  ;;  %963 = vmatprep.mubr.f32.mxu0 %v3230_v0  ;;  %2982 = vmatprep.mubr.msk.f32.mxu1 %vm178_vm0, %v3852_v54  ;;  %v4037_v8 = vld [vmem:[%s4429_s0 + $0x240] sm:$0xff] }
 0x105   :  { %v647_v12 = vpop.f32.mrb[6].mxu0  ;;  %v1223_v13 = vpop.f32.mrb[6].mxu1 }
 0x106   :  { %2110 = vst [vmem:[#allocation5 + $0x48] sm:$0xff] %v647_v12  ;;  %2398 = vst [vmem:[#allocation5 + $0x948] sm:$0xff] %v1223_v13  ;;  %v649_v14 = vpop.f32.mrb[7].mxu0  ;;  %2558 = vmatmul.mubr.msk.f32.gmra.mrb[112].mxu0 %vm178_vm0, %v82_v11  ;;  %v1225_v15 = vpop.f32.mrb[7].mxu1  ;;  %2983 = vmatmul.mubr.msk.f32.gmra.mrb[112].mxu1 %vm178_vm0, %v3864_v55  ;;  %v4048_v13 = vld [vmem:[%s4429_s0 + $0x248] sm:$0xff] }
 0x107   :  { %2111 = vst [vmem:[#allocation5 + $0x50] sm:$0xff] %v649_v14  ;;  %2399 = vst [vmem:[#allocation5 + $0x950] sm:$0xff] %v1225_v15  ;;  %969 = vmatprep.mubr.f32.mxu0 %v3230_v0  ;;  %2985 = vmatprep.mubr.msk.f32.mxu1 %vm178_vm0, %v3876_v56  ;;  %v4053_v14 = vld [vmem:[%s4429_s0 + $0x250] sm:$0xff] }
 0x109   :  { %v653_v17 = vpop.f32.mrb[8].mxu0  ;;  %v1229_v18 = vpop.f32.mrb[8].mxu1 }
 0x10a   :  { %2113 = vst [vmem:[#allocation5 + $0x60] sm:$0xff] %v653_v17  ;;  %2401 = vst [vmem:[#allocation5 + $0x960] sm:$0xff] %v1229_v18  ;;  %v655_v19 = vpop.f32.mrb[9].mxu0  ;;  %2559 = vmatmul.mubr.msk.f32.gmra.mrb[114].mxu0 %vm178_vm0, %v83_v16  ;;  %v1231_v20 = vpop.f32.mrb[9].mxu1  ;;  %2986 = vmatmul.mubr.msk.f32.gmra.mrb[114].mxu1 %vm178_vm0, %v3888_v57 }
 0x10b   :  { %2114 = vst [vmem:[#allocation5 + $0x68] sm:$0xff] %v655_v19  ;;  %2402 = vst [vmem:[#allocation5 + $0x968] sm:$0xff] %v1231_v20  ;;  %975 = vmatprep.mubr.f32.mxu0 %v3230_v0  ;;  %2988 = vmatprep.mubr.msk.f32.mxu1 %vm178_vm0, %v3898_v58  ;;  %v93_v58 = vld [vmem:[%s4429_s0 + $0x218] sm:$0xff]  ;;  %v4069_v20 = vld [vmem:[%s4429_s0 + $0x260] sm:$0xff] }
 0x10c   :  { %v4064_v19 = vld [vmem:[%s4429_s0 + $0x258] sm:$0xff] }
 0x10d   :  { %v659_v22 = vpop.f32.mrb[10].mxu0  ;;  %v1235_v23 = vpop.f32.mrb[10].mxu1 }
 0x10e   :  { %2116 = vst [vmem:[#allocation5 + $0x78] sm:$0xff] %v659_v22  ;;  %2404 = vst [vmem:[#allocation5 + $0x978] sm:$0xff] %v1235_v23  ;;  %v661_v24 = vpop.f32.mrb[11].mxu0  ;;  %2560 = vmatmul.mubr.msk.f32.gmra.mrb[116].mxu0 %vm178_vm0, %v84_v21  ;;  %v1237_v25 = vpop.f32.mrb[11].mxu1  ;;  %2989 = vmatmul.mubr.msk.f32.gmra.mrb[116].mxu1 %vm178_vm0, %v3908_v59  ;;  %v94_v59 = vld [vmem:[%s4429_s0 + $0x220] sm:$0xff] }
 0x10f   :  { %2117 = vst [vmem:[#allocation5 + $0x80] sm:$0xff] %v661_v24  ;;  %2405 = vst [vmem:[#allocation5 + $0x980] sm:$0xff] %v1237_v25  ;;  %981 = vmatprep.mubr.f32.mxu0 %v3230_v0  ;;  %2991 = vmatprep.mubr.msk.f32.mxu1 %vm178_vm0, %v3918_v1  ;;  %v95_v1 = vld [vmem:[%s4429_s0 + $0x228] sm:$0xff] }
 0x110   :  { %v4080_v25 = vld [vmem:[%s4429_s0 + $0x268] sm:$0xff] }
 0x111   :  { %v665_v27 = vpop.f32.mrb[12].mxu0  ;;  %v1241_v28 = vpop.f32.mrb[12].mxu1 }
 0x112   :  { %2119 = vst [vmem:[#allocation5 + $0x90] sm:$0xff] %v665_v27  ;;  %2407 = vst [vmem:[#allocation5 + $0x990] sm:$0xff] %v1241_v28  ;;  %v667_v29 = vpop.f32.mrb[13].mxu0  ;;  %2561 = vmatmul.mubr.msk.f32.gmra.mrb[118].mxu0 %vm178_vm0, %v85_v26  ;;  %v1243_v31 = vpop.f32.mrb[13].mxu1  ;;  %2992 = vmatmul.mubr.msk.f32.gmra.mrb[118].mxu1 %vm178_vm0, %v81_v6 }
 0x113   :  { %2120 = vst [vmem:[#allocation5 + $0x98] sm:$0xff] %v667_v29  ;;  %2408 = vst [vmem:[#allocation5 + $0x998] sm:$0xff] %v1243_v31  ;;  %987 = vmatprep.mubr.f32.mxu0 %v3230_v0  ;;  %2994 = vmatprep.mubr.msk.f32.mxu1 %vm178_vm0, %v82_v11 }
 0x115   :  { %v671_v33 = vpop.f32.mrb[14].mxu0  ;;  %v1247_v34 = vpop.f32.mrb[14].mxu1 }
 0x116   :  { %2122 = vst [vmem:[#allocation5 + $0xa8] sm:$0xff] %v671_v33  ;;  %2410 = vst [vmem:[#allocation5 + $0x9a8] sm:$0xff] %v1247_v34  ;;  %v673_v36 = vpop.f32.mrb[15].mxu0  ;;  %2562 = vmatmul.mubr.msk.f32.gmra.mrb[120].mxu0 %vm178_vm0, %v86_v32  ;;  %v1249_v37 = vpop.f32.mrb[15].mxu1  ;;  %2995 = vmatmul.mubr.msk.f32.gmra.mrb[120].mxu1 %vm178_vm0, %v83_v16  ;;  %v4101_v33 = vld [vmem:[%s4429_s0 + $0x280] sm:$0xff] }
 0x117   :  { %2123 = vst [vmem:[#allocation5 + $0xb0] sm:$0xff] %v673_v36  ;;  %2411 = vst [vmem:[#allocation5 + $0x9b0] sm:$0xff] %v1249_v37  ;;  %993 = vmatprep.mubr.f32.mxu0 %v3230_v0  ;;  %2997 = vmatprep.mubr.msk.f32.mxu1 %vm178_vm0, %v84_v21 }
 0x119   :  { %v677_v40 = vpop.f32.mrb[16].mxu0  ;;  %v1253_v41 = vpop.f32.mrb[16].mxu1 }
 0x11a   :  { %2125 = vst [vmem:[#allocation5 + $0xc0] sm:$0xff] %v677_v40  ;;  %2413 = vst [vmem:[#allocation5 + $0x9c0] sm:$0xff] %v1253_v41  ;;  %v679_v30 = vpop.f32.mrb[17].mxu0  ;;  %2563 = vmatmul.mubr.msk.f32.gmra.mrb[122].mxu0 %vm178_vm0, %v87_v39  ;;  %v1255_v35 = vpop.f32.mrb[17].mxu1  ;;  %2998 = vmatmul.mubr.msk.f32.gmra.mrb[122].mxu1 %vm178_vm0, %v85_v26  ;;  %v4085_v26 = vld [vmem:[%s4429_s0 + $0x270] sm:$0xff]  ;;  %v4113_v40 = vld [vmem:[%s4429_s0 + $0x288] sm:$0xff] }
 0x11b   :  { %2126 = vst [vmem:[#allocation5 + $0xc8] sm:$0xff] %v679_v30  ;;  %2414 = vst [vmem:[#allocation5 + $0x9c8] sm:$0xff] %v1255_v35  ;;  %999 = vmatprep.mubr.f32.mxu0 %v3230_v0  ;;  %3000 = vmatprep.mubr.msk.f32.mxu1 %vm178_vm0, %v86_v32  ;;  %v4096_v32 = vld [vmem:[%s4429_s0 + $0x278] sm:$0xff]  ;;  %v4118_v41 = vld [vmem:[%s4429_s0 + $0x290] sm:$0xff] }
 0x11d   :  { %v683_v42 = vpop.f32.mrb[18].mxu0  ;;  %v1259_v43 = vpop.f32.mrb[18].mxu1 }
 0x11e   :  { %2128 = vst [vmem:[#allocation5 + $0xd8] sm:$0xff] %v683_v42  ;;  %2416 = vst [vmem:[#allocation5 + $0x9d8] sm:$0xff] %v1259_v43  ;;  %v685_v44 = vpop.f32.mrb[19].mxu0  ;;  %2564 = vmatmul.mubr.msk.f32.gmra.mrb[124].mxu0 %vm178_vm0, %v88_v38  ;;  %v1261_v45 = vpop.f32.mrb[19].mxu1  ;;  %3001 = vmatmul.mubr.msk.f32.gmra.mrb[124].mxu1 %vm178_vm0, %v87_v39  ;;  %v4130_v43 = vld [vmem:[%s4429_s0 + $0x298] sm:$0xff] }
 0x11f   :  { %2129 = vst [vmem:[#allocation5 + $0xe0] sm:$0xff] %v685_v44  ;;  %2417 = vst [vmem:[#allocation5 + $0x9e0] sm:$0xff] %v1261_v45  ;;  %1005 = vmatprep.mubr.f32.mxu0 %v3230_v0  ;;  %3003 = vmatprep.mubr.msk.f32.mxu1 %vm178_vm0, %v88_v38  ;;  %v4135_v44 = vld [vmem:[%s4429_s0 + $0x2a0] sm:$0xff] }
 0x121   :  { %v689_v48 = vpop.f32.mrb[20].mxu0  ;;  %v1265_v49 = vpop.f32.mrb[20].mxu1 }
 0x122   :  { %2131 = vst [vmem:[#allocation5 + $0xf0] sm:$0xff] %v689_v48  ;;  %2419 = vst [vmem:[#allocation5 + $0x9f0] sm:$0xff] %v1265_v49  ;;  %v691_v50 = vpop.f32.mrb[21].mxu0  ;;  %2565 = vmatmul.mubr.msk.f32.gmra.mrb[126].mxu0 %vm178_vm0, %v89_v46  ;;  %v1267_v51 = vpop.f32.mrb[21].mxu1  ;;  %3004 = vmatmul.mubr.msk.f32.gmra.mrb[126].mxu1 %vm178_vm0, %v89_v46  ;;  %v4147_v49 = vld [vmem:[%s4429_s0 + $0x2a8] sm:$0xff] }
 0x123   :  { %2132 = vst [vmem:[#allocation5 + $0xf8] sm:$0xff] %v691_v50  ;;  %2420 = vst [vmem:[#allocation5 + $0x9f8] sm:$0xff] %v1267_v51  ;;  %1011 = vmatprep.mubr.f32.mxu0 %v3230_v0  ;;  %3006 = vmatprep.mubr.msk.f32.mxu1 %vm178_vm0, %v90_v47  ;;  %v4152_v50 = vld [vmem:[%s4429_s0 + $0x2b0] sm:$0xff] }
 0x125   :  { %v695_v54 = vpop.f32.mrb[22].mxu0  ;;  %v1271_v55 = vpop.f32.mrb[22].mxu1 }
 0x126   :  { %2134 = vst [vmem:[#allocation5 + $0x108] sm:$0xff] %v695_v54  ;;  %2422 = vst [vmem:[#allocation5 + $0xa08] sm:$0xff] %v1271_v55  ;;  %v697_v56 = vpop.f32.mrb[23].mxu0  ;;  %2566 = vmatmul.mubr.msk.f32.gmra.mrb[128].mxu0 %vm178_vm0, %v90_v47  ;;  %v1273_v57 = vpop.f32.mrb[23].mxu1  ;;  %3007 = vmatmul.mubr.msk.f32.gmra.mrb[128].mxu1 %vm178_vm0, %v91_v52  ;;  %v4164_v55 = vld [vmem:[%s4429_s0 + $0x2b8] sm:$0xff] }
 0x127   :  { %2135 = vst [vmem:[#allocation5 + $0x110] sm:$0xff] %v697_v56  ;;  %2423 = vst [vmem:[#allocation5 + $0xa10] sm:$0xff] %v1273_v57  ;;  %1017 = vmatprep.mubr.f32.mxu0 %v3230_v0  ;;  %3009 = vmatprep.mubr.msk.f32.mxu1 %vm178_vm0, %v92_v53  ;;  %v4169_v56 = vld [vmem:[%s4429_s0 + $0x2c0] sm:$0xff] }
 0x129   :  { %v701_v60 = vpop.f32.mrb[24].mxu0  ;;  %v1277_v61 = vpop.f32.mrb[24].mxu1 }
 0x12a   :  { %2137 = vst [vmem:[#allocation5 + $0x120] sm:$0xff] %v701_v60  ;;  %2425 = vst [vmem:[#allocation5 + $0xa20] sm:$0xff] %v1277_v61  ;;  %v703_v62 = vpop.f32.mrb[25].mxu0  ;;  %2567 = vmatmul.mubr.msk.f32.gmra.mrb[130].mxu0 %vm178_vm0, %v91_v52  ;;  %v1279_v63 = vpop.f32.mrb[25].mxu1  ;;  %3010 = vmatmul.mubr.msk.f32.gmra.mrb[130].mxu1 %vm178_vm0, %v93_v58  ;;  %v4181_v61 = vld [vmem:[%s4429_s0 + $0x2c8] sm:$0xff] }
 0x12b   :  { %2138 = vst [vmem:[#allocation5 + $0x128] sm:$0xff] %v703_v62  ;;  %2426 = vst [vmem:[#allocation5 + $0xa28] sm:$0xff] %v1279_v63  ;;  %1023 = vmatprep.mubr.f32.mxu0 %v3230_v0  ;;  %3012 = vmatprep.mubr.msk.f32.mxu1 %vm178_vm0, %v94_v59  ;;  %v4186_v62 = vld [vmem:[%s4429_s0 + $0x2d0] sm:$0xff] }
 0x12d   :  { %v707_v3 = vpop.f32.mrb[26].mxu0  ;;  %v1283_v4 = vpop.f32.mrb[26].mxu1 }
 0x12e   :  { %2140 = vst [vmem:[#allocation5 + $0x138] sm:$0xff] %v707_v3  ;;  %2428 = vst [vmem:[#allocation5 + $0xa38] sm:$0xff] %v1283_v4  ;;  %v709_v5 = vpop.f32.mrb[27].mxu0  ;;  %2568 = vmatmul.mubr.msk.f32.gmra.mrb[132].mxu0 %vm178_vm0, %v92_v53  ;;  %v1285_v6 = vpop.f32.mrb[27].mxu1  ;;  %3013 = vmatmul.mubr.msk.f32.gmra.mrb[132].mxu1 %vm178_vm0, %v95_v1  ;;  %v4198_v4 = vld [vmem:[%s4429_s0 + $0x2d8] sm:$0xff] }
 0x12f   :  { %2141 = vst [vmem:[#allocation5 + $0x140] sm:$0xff] %v709_v5  ;;  %2429 = vst [vmem:[#allocation5 + $0xa40] sm:$0xff] %v1285_v6  ;;  %1029 = vmatprep.mubr.f32.mxu0 %v3230_v0  ;;  %3015 = vmatprep.mubr.msk.f32.mxu1 %vm178_vm0, %v96_v2  ;;  %v4203_v5 = vld [vmem:[%s4429_s0 + $0x2e0] sm:$0xff] }
 0x131   :  { %v713_v9 = vpop.f32.mrb[28].mxu0  ;;  %v1289_v10 = vpop.f32.mrb[28].mxu1 }
 0x132   :  { %2143 = vst [vmem:[#allocation5 + $0x150] sm:$0xff] %v713_v9  ;;  %2431 = vst [vmem:[#allocation5 + $0xa50] sm:$0xff] %v1289_v10  ;;  %v715_v11 = vpop.f32.mrb[29].mxu0  ;;  %2569 = vmatmul.mubr.msk.f32.gmra.mrb[134].mxu0 %vm178_vm0, %v93_v58  ;;  %v1291_v12 = vpop.f32.mrb[29].mxu1  ;;  %3016 = vmatmul.mubr.msk.f32.gmra.mrb[134].mxu1 %vm178_vm0, %v4032_v7  ;;  %v4215_v10 = vld [vmem:[%s4429_s0 + $0x2e8] sm:$0xff] }
 0x133   :  { %2144 = vst [vmem:[#allocation5 + $0x158] sm:$0xff] %v715_v11  ;;  %2432 = vst [vmem:[#allocation5 + $0xa58] sm:$0xff] %v1291_v12  ;;  %1035 = vmatprep.mubr.f32.mxu0 %v3230_v0  ;;  %3018 = vmatprep.mubr.msk.f32.mxu1 %vm178_vm0, %v4037_v8  ;;  %v4220_v11 = vld [vmem:[%s4429_s0 + $0x2f0] sm:$0xff] }
 0x135   :  { %v719_v15 = vpop.f32.mrb[30].mxu0  ;;  %v1295_v16 = vpop.f32.mrb[30].mxu1 }
 0x136   :  { %2146 = vst [vmem:[#allocation5 + $0x168] sm:$0xff] %v719_v15  ;;  %2434 = vst [vmem:[#allocation5 + $0xa68] sm:$0xff] %v1295_v16  ;;  %v721_v17 = vpop.f32.mrb[31].mxu0  ;;  %2570 = vmatmul.mubr.msk.f32.gmra.mrb[136].mxu0 %vm178_vm0, %v94_v59  ;;  %v1297_v18 = vpop.f32.mrb[31].mxu1  ;;  %3019 = vmatmul.mubr.msk.f32.gmra.mrb[136].mxu1 %vm178_vm0, %v4048_v13  ;;  %v4232_v16 = vld [vmem:[%s4429_s0 + $0x2f8] sm:$0xff] }
 0x137   :  { %2147 = vst [vmem:[#allocation5 + $0x170] sm:$0xff] %v721_v17  ;;  %2435 = vst [vmem:[#allocation5 + $0xa70] sm:$0xff] %v1297_v18  ;;  %1041 = vmatprep.mubr.f32.mxu0 %v3230_v0  ;;  %3021 = vmatprep.mubr.msk.f32.mxu1 %vm178_vm0, %v4053_v14 }
 0x139   :  { %v725_v21 = vpop.f32.mrb[32].mxu0  ;;  %v1301_v22 = vpop.f32.mrb[32].mxu1 }
 0x13a   :  { %2149 = vst [vmem:[#allocation5 + $0x180] sm:$0xff] %v725_v21  ;;  %2437 = vst [vmem:[#allocation5 + $0xa80] sm:$0xff] %v1301_v22  ;;  %v727_v23 = vpop.f32.mrb[33].mxu0  ;;  %2571 = vmatmul.mubr.msk.f32.gmra.mrb[138].mxu0 %vm178_vm0, %v95_v1  ;;  %v1303_v24 = vpop.f32.mrb[33].mxu1  ;;  %3022 = vmatmul.mubr.msk.f32.gmra.mrb[138].mxu1 %vm178_vm0, %v4064_v19  ;;  %v3147_v21 = vld [vmem:[%s4429_s0 + $0x300] sm:$0xff] }
 0x13b   :  { %2150 = vst [vmem:[#allocation5 + $0x188] sm:$0xff] %v727_v23  ;;  %2438 = vst [vmem:[#allocation5 + $0xa88] sm:$0xff] %v1303_v24  ;;  %1047 = vmatprep.mubr.f32.mxu0 %v3230_v0  ;;  %3024 = vmatprep.mubr.msk.f32.mxu1 %vm178_vm0, %v4069_v20 }
 0x13d   :  { %v731_v27 = vpop.f32.mrb[34].mxu0  ;;  %v1307_v28 = vpop.f32.mrb[34].mxu1 }
 0x13e   :  { %2152 = vst [vmem:[#allocation5 + $0x198] sm:$0xff] %v731_v27  ;;  %2440 = vst [vmem:[#allocation5 + $0xa98] sm:$0xff] %v1307_v28  ;;  %v733_v29 = vpop.f32.mrb[35].mxu0  ;;  %2572 = vmatmul.mubr.msk.f32.gmra.mrb[140].mxu0 %vm178_vm0, %v96_v2  ;;  %v1309_v31 = vpop.f32.mrb[35].mxu1  ;;  %3025 = vmatmul.mubr.msk.f32.gmra.mrb[140].mxu1 %vm178_vm0, %v4080_v25  ;;  %v3149_v27 = vld [vmem:[%s4429_s0 + $0x310] sm:$0xff] }
 0x13f   :  { %2153 = vst [vmem:[#allocation5 + $0x1a0] sm:$0xff] %v733_v29  ;;  %2441 = vst [vmem:[#allocation5 + $0xaa0] sm:$0xff] %v1309_v31  ;;  %1053 = vmatprep.mubr.f32.mxu0 %v3230_v0  ;;  %3027 = vmatprep.mubr.msk.f32.mxu1 %vm178_vm0, %v4085_v26 }
 0x141   :  { %v737_v34 = vpop.f32.mrb[36].mxu0  ;;  %v1313_v36 = vpop.f32.mrb[36].mxu1 }
 0x142   :  { %2155 = vst [vmem:[#allocation5 + $0x1b0] sm:$0xff] %v737_v34  ;;  %2443 = vst [vmem:[#allocation5 + $0xab0] sm:$0xff] %v1313_v36  ;;  %v739_v37 = vpop.f32.mrb[37].mxu0  ;;  %2573 = vmatmul.mubr.msk.f32.gmra.mrb[142].mxu0 %vm178_vm0, %v4032_v7  ;;  %v1315_v39 = vpop.f32.mrb[37].mxu1  ;;  %3028 = vmatmul.mubr.msk.f32.gmra.mrb[142].mxu1 %vm178_vm0, %v4096_v32  ;;  %v3151_v34 = vld [vmem:[%s4429_s0 + $0x320] sm:$0xff] }
 0x143   :  { %2156 = vst [vmem:[#allocation5 + $0x1b8] sm:$0xff] %v739_v37  ;;  %2444 = vst [vmem:[#allocation5 + $0xab8] sm:$0xff] %v1315_v39  ;;  %1059 = vmatprep.mubr.f32.mxu0 %v3230_v0  ;;  %3030 = vmatprep.mubr.msk.f32.mxu1 %vm178_vm0, %v4101_v33 }
 0x145   :  { %v743_v30 = vpop.f32.mrb[38].mxu0  ;;  %v1319_v35 = vpop.f32.mrb[38].mxu1 }
 0x146   :  { %2158 = vst [vmem:[#allocation5 + $0x1c8] sm:$0xff] %v743_v30  ;;  %2446 = vst [vmem:[#allocation5 + $0xac8] sm:$0xff] %v1319_v35  ;;  %v745_v38 = vpop.f32.mrb[39].mxu0  ;;  %2574 = vmatmul.mubr.msk.f32.gmra.mrb[144].mxu0 %vm178_vm0, %v4037_v8  ;;  %v1321_v42 = vpop.f32.mrb[39].mxu1  ;;  %3031 = vmatmul.mubr.msk.f32.gmra.mrb[144].mxu1 %vm178_vm0, %v4113_v40  ;;  %v3152_v30 = vld [vmem:[%s4429_s0 + $0x328] sm:$0xff]  ;;  %v3153_v35 = vld [vmem:[%s4429_s0 + $0x330] sm:$0xff] }
 0x147   :  { %2159 = vst [vmem:[#allocation5 + $0x1d0] sm:$0xff] %v745_v38  ;;  %2447 = vst [vmem:[#allocation5 + $0xad0] sm:$0xff] %v1321_v42  ;;  %1065 = vmatprep.mubr.f32.mxu0 %v3230_v0  ;;  %3033 = vmatprep.mubr.msk.f32.mxu1 %vm178_vm0, %v4118_v41 }
 0x149   :  { %v749_v45 = vpop.f32.mrb[40].mxu0  ;;  %v1325_v46 = vpop.f32.mrb[40].mxu1 }
 0x14a   :  { %2161 = vst [vmem:[#allocation5 + $0x1e0] sm:$0xff] %v749_v45  ;;  %2449 = vst [vmem:[#allocation5 + $0xae0] sm:$0xff] %v1325_v46  ;;  %v751_v47 = vpop.f32.mrb[41].mxu0  ;;  %2575 = vmatmul.mubr.msk.f32.gmra.mrb[146].mxu0 %vm178_vm0, %v4048_v13  ;;  %v1327_v48 = vpop.f32.mrb[41].mxu1  ;;  %3034 = vmatmul.mubr.msk.f32.gmra.mrb[146].mxu1 %vm178_vm0, %v4130_v43  ;;  %v3154_v46 = vld [vmem:[%s4429_s0 + $0x338] sm:$0xff] }
 0x14b   :  { %2162 = vst [vmem:[#allocation5 + $0x1e8] sm:$0xff] %v751_v47  ;;  %2450 = vst [vmem:[#allocation5 + $0xae8] sm:$0xff] %v1327_v48  ;;  %1071 = vmatprep.mubr.f32.mxu0 %v3230_v0  ;;  %3036 = vmatprep.mubr.msk.f32.mxu1 %vm178_vm0, %v4135_v44  ;;  %v3155_v47 = vld [vmem:[%s4429_s0 + $0x340] sm:$0xff] }
 0x14d   :  { %v755_v51 = vpop.f32.mrb[42].mxu0  ;;  %v1331_v52 = vpop.f32.mrb[42].mxu1 }
 0x14e   :  { %2164 = vst [vmem:[#allocation5 + $0x1f8] sm:$0xff] %v755_v51  ;;  %2452 = vst [vmem:[#allocation5 + $0xaf8] sm:$0xff] %v1331_v52  ;;  %v757_v53 = vpop.f32.mrb[43].mxu0  ;;  %2576 = vmatmul.mubr.msk.f32.gmra.mrb[148].mxu0 %vm178_vm0, %v4053_v14  ;;  %v1333_v54 = vpop.f32.mrb[43].mxu1  ;;  %3037 = vmatmul.mubr.msk.f32.gmra.mrb[148].mxu1 %vm178_vm0, %v4147_v49 }
 0x14f   :  { %2165 = vst [vmem:[#allocation5 + $0x200] sm:$0xff] %v757_v53  ;;  %2453 = vst [vmem:[#allocation5 + $0xb00] sm:$0xff] %v1333_v54  ;;  %1077 = vmatprep.mubr.f32.mxu0 %v3230_v0  ;;  %3039 = vmatprep.mubr.msk.f32.mxu1 %vm178_vm0, %v4152_v50  ;;  %v3156_v53 = vld [vmem:[%s4429_s0 + $0x348] sm:$0xff]  ;;  %v3157_v54 = vld [vmem:[%s4429_s0 + $0x350] sm:$0xff] }
 0x151   :  { %v761_v57 = vpop.f32.mrb[44].mxu0  ;;  %v1337_v58 = vpop.f32.mrb[44].mxu1 }
 0x152   :  { %2167 = vst [vmem:[#allocation5 + $0x210] sm:$0xff] %v761_v57  ;;  %2455 = vst [vmem:[#allocation5 + $0xb10] sm:$0xff] %v1337_v58  ;;  %v763_v59 = vpop.f32.mrb[45].mxu0  ;;  %2577 = vmatmul.mubr.msk.f32.gmra.mrb[150].mxu0 %vm178_vm0, %v4064_v19  ;;  %v1339_v60 = vpop.f32.mrb[45].mxu1  ;;  %3040 = vmatmul.mubr.msk.f32.gmra.mrb[150].mxu1 %vm178_vm0, %v4164_v55 }
 0x153   :  { %2168 = vst [vmem:[#allocation5 + $0x218] sm:$0xff] %v763_v59  ;;  %2456 = vst [vmem:[#allocation5 + $0xb18] sm:$0xff] %v1339_v60  ;;  %1083 = vmatprep.mubr.f32.mxu0 %v3230_v0  ;;  %3042 = vmatprep.mubr.msk.f32.mxu1 %vm178_vm0, %v4169_v56  ;;  %v3158_v60 = vld [vmem:[%s4429_s0 + $0x358] sm:$0xff] }
 0x155   :  { %v767_v63 = vpop.f32.mrb[46].mxu0  ;;  %v1343_v1 = vpop.f32.mrb[46].mxu1 }
 0x156   :  { %2170 = vst [vmem:[#allocation5 + $0x228] sm:$0xff] %v767_v63  ;;  %2458 = vst [vmem:[#allocation5 + $0xb28] sm:$0xff] %v1343_v1  ;;  %v769_v2 = vpop.f32.mrb[47].mxu0  ;;  %2578 = vmatmul.mubr.msk.f32.gmra.mrb[152].mxu0 %vm178_vm0, %v4069_v20  ;;  %v1345_v3 = vpop.f32.mrb[47].mxu1  ;;  %3043 = vmatmul.mubr.msk.f32.gmra.mrb[152].mxu1 %vm178_vm0, %v4181_v61  ;;  %v3159_v63 = vld [vmem:[%s4429_s0 + $0x360] sm:$0xff] }
 0x157   :  { %2171 = vst [vmem:[#allocation5 + $0x230] sm:$0xff] %v769_v2  ;;  %2459 = vst [vmem:[#allocation5 + $0xb30] sm:$0xff] %v1345_v3  ;;  %1089 = vmatprep.mubr.f32.mxu0 %v3230_v0  ;;  %3045 = vmatprep.mubr.msk.f32.mxu1 %vm178_vm0, %v4186_v62 }
 0x159   :  { %v773_v6 = vpop.f32.mrb[48].mxu0  ;;  %v1349_v7 = vpop.f32.mrb[48].mxu1 }
 0x15a   :  { %2173 = vst [vmem:[#allocation5 + $0x240] sm:$0xff] %v773_v6  ;;  %2461 = vst [vmem:[#allocation5 + $0xb40] sm:$0xff] %v1349_v7  ;;  %v775_v8 = vpop.f32.mrb[49].mxu0  ;;  %2579 = vmatmul.mubr.msk.f32.gmra.mrb[154].mxu0 %vm178_vm0, %v4080_v25  ;;  %v1351_v9 = vpop.f32.mrb[49].mxu1  ;;  %3046 = vmatmul.mubr.msk.f32.gmra.mrb[154].mxu1 %vm178_vm0, %v4198_v4  ;;  %v3160_v6 = vld [vmem:[%s4429_s0 + $0x368] sm:$0xff]  ;;  %v3161_v7 = vld [vmem:[%s4429_s0 + $0x370] sm:$0xff] }
 0x15b   :  { %2174 = vst [vmem:[#allocation5 + $0x248] sm:$0xff] %v775_v8  ;;  %2462 = vst [vmem:[#allocation5 + $0xb48] sm:$0xff] %v1351_v9  ;;  %1095 = vmatprep.mubr.f32.mxu0 %v3230_v0  ;;  %3048 = vmatprep.mubr.msk.f32.mxu1 %vm178_vm0, %v4203_v5 }
 0x15d   :  { %v779_v12 = vpop.f32.mrb[50].mxu0  ;;  %v1355_v13 = vpop.f32.mrb[50].mxu1 }
 0x15e   :  { %2176 = vst [vmem:[#allocation5 + $0x258] sm:$0xff] %v779_v12  ;;  %2464 = vst [vmem:[#allocation5 + $0xb58] sm:$0xff] %v1355_v13  ;;  %v781_v14 = vpop.f32.mrb[51].mxu0  ;;  %2580 = vmatmul.mubr.msk.f32.gmra.mrb[156].mxu0 %vm178_vm0, %v4085_v26  ;;  %v1357_v15 = vpop.f32.mrb[51].mxu1  ;;  %3049 = vmatmul.mubr.msk.f32.gmra.mrb[156].mxu1 %vm178_vm0, %v4215_v10  ;;  %v3148_v26 = vld [vmem:[%s4429_s0 + $0x308] sm:$0xff]  ;;  %v3162_v13 = vld [vmem:[%s4429_s0 + $0x378] sm:$0xff] }
 0x15f   :  { %2177 = vst [vmem:[#allocation5 + $0x260] sm:$0xff] %v781_v14  ;;  %2465 = vst [vmem:[#allocation5 + $0xb60] sm:$0xff] %v1357_v15  ;;  %1101 = vmatprep.mubr.f32.mxu0 %v3230_v0  ;;  %3051 = vmatprep.mubr.msk.f32.mxu1 %vm178_vm0, %v4220_v11  ;;  %v3163_v14 = vld [vmem:[%s4429_s0 + $0x380] sm:$0xff] }
 0x161   :  { %v785_v17 = vpop.f32.mrb[52].mxu0  ;;  %v1361_v18 = vpop.f32.mrb[52].mxu1 }
 0x162   :  { %2179 = vst [vmem:[#allocation5 + $0x270] sm:$0xff] %v785_v17  ;;  %2467 = vst [vmem:[#allocation5 + $0xb70] sm:$0xff] %v1361_v18  ;;  %v787_v19 = vpop.f32.mrb[53].mxu0  ;;  %2581 = vmatmul.mubr.msk.f32.gmra.mrb[158].mxu0 %vm178_vm0, %v4096_v32  ;;  %v1363_v20 = vpop.f32.mrb[53].mxu1  ;;  %3052 = vmatmul.mubr.msk.f32.gmra.mrb[158].mxu1 %vm178_vm0, %v4232_v16 }
 0x163   :  { %2180 = vst [vmem:[#allocation5 + $0x278] sm:$0xff] %v787_v19  ;;  %2468 = vst [vmem:[#allocation5 + $0xb78] sm:$0xff] %v1363_v20  ;;  %1107 = vmatprep.mubr.f32.mxu0 %v3230_v0  ;;  %3054 = vmatprep.mubr.msk.f32.mxu1 %vm178_vm0, %v3147_v21  ;;  %v3164_v19 = vld [vmem:[%s4429_s0 + $0x388] sm:$0xff]  ;;  %v3165_v20 = vld [vmem:[%s4429_s0 + $0x390] sm:$0xff] }
 0x165   :  { %v791_v22 = vpop.f32.mrb[54].mxu0  ;;  %v1367_v23 = vpop.f32.mrb[54].mxu1 }
 0x166   :  { %2182 = vst [vmem:[#allocation5 + $0x288] sm:$0xff] %v791_v22  ;;  %2470 = vst [vmem:[#allocation5 + $0xb88] sm:$0xff] %v1367_v23  ;;  %v793_v24 = vpop.f32.mrb[55].mxu0  ;;  %2582 = vmatmul.mubr.msk.f32.gmra.mrb[160].mxu0 %vm178_vm0, %v4101_v33  ;;  %v1369_v25 = vpop.f32.mrb[55].mxu1  ;;  %3055 = vmatmul.mubr.msk.f32.gmra.mrb[160].mxu1 %vm178_vm0, %v3148_v26  ;;  %v3150_v33 = vld [vmem:[%s4429_s0 + $0x318] sm:$0xff] }
 0x167   :  { %2183 = vst [vmem:[#allocation5 + $0x290] sm:$0xff] %v793_v24  ;;  %2471 = vst [vmem:[#allocation5 + $0xb90] sm:$0xff] %v1369_v25  ;;  %1113 = vmatprep.mubr.f32.mxu0 %v3230_v0  ;;  %3057 = vmatprep.mubr.msk.f32.mxu1 %vm178_vm0, %v3149_v27  ;;  %v3166_v24 = vld [vmem:[%s4429_s0 + $0x398] sm:$0xff]  ;;  %v3167_v25 = vld [vmem:[%s4429_s0 + $0x3a0] sm:$0xff] }
 0x169   :  { %v797_v28 = vpop.f32.mrb[56].mxu0  ;;  %v1373_v29 = vpop.f32.mrb[56].mxu1 }
 0x16a   :  { %2185 = vst [vmem:[#allocation5 + $0x2a0] sm:$0xff] %v797_v28  ;;  %2473 = vst [vmem:[#allocation5 + $0xba0] sm:$0xff] %v1373_v29  ;;  %v799_v31 = vpop.f32.mrb[57].mxu0  ;;  %2583 = vmatmul.mubr.msk.f32.gmra.mrb[162].mxu0 %vm178_vm0, %v4113_v40  ;;  %v1375_v32 = vpop.f32.mrb[57].mxu1  ;;  %3058 = vmatmul.mubr.msk.f32.gmra.mrb[162].mxu1 %vm178_vm0, %v3150_v33  ;;  %v3168_v29 = vld [vmem:[%s4429_s0 + $0x3a8] sm:$0xff] }
 0x16b   :  { %2186 = vst [vmem:[#allocation5 + $0x2a8] sm:$0xff] %v799_v31  ;;  %2474 = vst [vmem:[#allocation5 + $0xba8] sm:$0xff] %v1375_v32  ;;  %1119 = vmatprep.mubr.f32.mxu0 %v3230_v0  ;;  %3060 = vmatprep.mubr.msk.f32.mxu1 %vm178_vm0, %v3151_v34  ;;  %v3169_v31 = vld [vmem:[%s4429_s0 + $0x3b0] sm:$0xff] }
 0x16d   :  { %v803_v36 = vpop.f32.mrb[58].mxu0  ;;  %v1379_v37 = vpop.f32.mrb[58].mxu1 }
 0x16e   :  { %2188 = vst [vmem:[#allocation5 + $0x2b8] sm:$0xff] %v803_v36  ;;  %2476 = vst [vmem:[#allocation5 + $0xbb8] sm:$0xff] %v1379_v37  ;;  %v805_v39 = vpop.f32.mrb[59].mxu0  ;;  %2584 = vmatmul.mubr.msk.f32.gmra.mrb[164].mxu0 %vm178_vm0, %v4118_v41  ;;  %v1381_v40 = vpop.f32.mrb[59].mxu1  ;;  %3061 = vmatmul.mubr.msk.f32.gmra.mrb[164].mxu1 %vm178_vm0, %v3152_v30  ;;  %v3170_v36 = vld [vmem:[%s4429_s0 + $0x3b8] sm:$0xff]  ;;  %v3171_v37 = vld [vmem:[%s4429_s0 + $0x3c0] sm:$0xff] }
 0x16f   :  { %2189 = vst [vmem:[#allocation5 + $0x2c0] sm:$0xff] %v805_v39  ;;  %2477 = vst [vmem:[#allocation5 + $0xbc0] sm:$0xff] %v1381_v40  ;;  %1125 = vmatprep.mubr.f32.mxu0 %v3230_v0  ;;  %3063 = vmatprep.mubr.msk.f32.mxu1 %vm178_vm0, %v3153_v35  ;;  %v3172_v35 = vld [vmem:[%s4429_s0 + $0x3c8] sm:$0xff] }
 0x171   :  { %v809_v38 = vpop.f32.mrb[60].mxu0  ;;  %v1385_v42 = vpop.f32.mrb[60].mxu1 }
 0x172   :  { %2191 = vst [vmem:[#allocation5 + $0x2d0] sm:$0xff] %v809_v38  ;;  %2479 = vst [vmem:[#allocation5 + $0xbd0] sm:$0xff] %v1385_v42  ;;  %v811_v41 = vpop.f32.mrb[61].mxu0  ;;  %2585 = vmatmul.mubr.msk.f32.gmra.mrb[166].mxu0 %vm178_vm0, %v4130_v43  ;;  %v1387_v45 = vpop.f32.mrb[61].mxu1  ;;  %3064 = vmatmul.mubr.msk.f32.gmra.mrb[166].mxu1 %vm178_vm0, %v3154_v46  ;;  %v3173_v38 = vld [vmem:[%s4429_s0 + $0x3d0] sm:$0xff]  ;;  %v3174_v46 = vld [vmem:[%s4429_s0 + $0x3d8] sm:$0xff] }
 0x173   :  { %2192 = vst [vmem:[#allocation5 + $0x2d8] sm:$0xff] %v811_v41  ;;  %2480 = vst [vmem:[#allocation5 + $0xbd8] sm:$0xff] %v1387_v45  ;;  %1131 = vmatprep.mubr.f32.mxu0 %v3230_v0  ;;  %3066 = vmatprep.mubr.msk.f32.mxu1 %vm178_vm0, %v3155_v47  ;;  %v3175_v47 = vld [vmem:[%s4429_s0 + $0x3e0] sm:$0xff] }
 0x175   :  { %v815_v48 = vpop.f32.mrb[62].mxu0  ;;  %v1391_v51 = vpop.f32.mrb[62].mxu1 }
 0x176   :  { %2194 = vst [vmem:[#allocation5 + $0x2e8] sm:$0xff] %v815_v48  ;;  %2482 = vst [vmem:[#allocation5 + $0xbe8] sm:$0xff] %v1391_v51  ;;  %v817_v43 = vpop.f32.mrb[63].mxu0  ;;  %2586 = vmatmul.mubr.msk.f32.gmra.mrb[168].mxu0 %vm178_vm0, %v4135_v44  ;;  %v1393_v52 = vpop.f32.mrb[63].mxu1  ;;  %3067 = vmatmul.mubr.msk.f32.gmra.mrb[168].mxu1 %vm178_vm0, %v3156_v53  ;;  %v3177_v53 = vld [vmem:[%s4429_s0 + $0x3f0] sm:$0xff] }
 0x177   :  { %2195 = vst [vmem:[#allocation5 + $0x2f0] sm:$0xff] %v817_v43  ;;  %2483 = vst [vmem:[#allocation5 + $0xbf0] sm:$0xff] %v1393_v52  ;;  %1137 = vmatprep.mubr.f32.mxu0 %v3230_v0  ;;  %3069 = vmatprep.mubr.msk.f32.mxu1 %vm178_vm0, %v3157_v54  ;;  %v3176_v52 = vld [vmem:[%s4429_s0 + $0x3e8] sm:$0xff] }
 0x179   :  { %v821_v57 = vpop.f32.mrb[64].mxu0  ;;  %v2912_v58 = vpop.f32.mrb[64].mxu1 }
 0x17a   :  { %2197 = vst [vmem:[#allocation5 + $0x300] sm:$0xff] %v821_v57  ;;  %2106 = vst [vmem:[#allocation5 + $0x28] sm:$0xff] %v2912_v58  ;;  %v823_v44 = vpop.f32.mrb[65].mxu0  ;;  %2587 = vmatmul.mubr.msk.f32.gmra.mrb[170].mxu0 %vm178_vm0, %v4147_v49  ;;  %v1462_v59 = vpop.f32.mrb[65].mxu1  ;;  %3070 = vmatmul.mubr.msk.f32.gmra.mrb[170].mxu1 %vm178_vm0, %v3158_v60 }
 0x17b   :  { %2198 = vst [vmem:[#allocation5 + $0x308] sm:$0xff] %v823_v44  ;;  %2103 = vst [vmem:[#allocation5 + $0x10] sm:$0xff] %v1462_v59  ;;  %1143 = vmatprep.mubr.f32.mxu0 %v3230_v0  ;;  %3072 = vmatprep.mubr.msk.f32.mxu1 %vm178_vm0, %v3159_v63  ;;  %v3178_v44 = vld [vmem:[%s4429_s0 + $0x3f8] sm:$0xff]  ;;  %s3231_s0 = smov [#allocation5]  }
 0x17c   :  { %s2490_s17 = sshll.u32 %s3231_s0, 4  ;;  %s2491_s17 = int_to_ptr.vmem [resolvable:$true] %s2490_s17 }
 0x17d   :  { %v827_v1 = vpop.f32.mrb[66].mxu0  ;;  %v2915_v2 = vpop.f32.mrb[66].mxu1  ;;  %s3201_s18 = scalar_lea.vmem %s2491_s17, 49152  ;;  %p3206_p9 = scmp.lt.s32.totalorder %s2491_s17, %s2491_s17 }
 0x17e   :  { %2200 = vst [vmem:[#allocation5 + $0x318] sm:$0xff] %v827_v1  ;;  %2112 = vst [vmem:[#allocation5 + $0x58] sm:$0xff] %v2915_v2  ;;  %v829_v49 = vpop.f32.mrb[67].mxu0  ;;  %2588 = vmatmul.mubr.msk.f32.gmra.mrb[172].mxu0 %vm178_vm0, %v4152_v50  ;;  %v1472_v3 = vpop.f32.mrb[67].mxu1  ;;  %3073 = vmatmul.mubr.msk.f32.gmra.mrb[172].mxu1 %vm178_vm0, %v3160_v6  ;;  %p3202_p8 = scmp.ne.s32.totalorder %s2491_s17, %s3201_s18  ;;  %p3207_p10 = scmp.lt.s32.totalorder %s3201_s18, %s3201_s18 }
 0x17f   :  { %2201 = vst [vmem:[#allocation5 + $0x320] sm:$0xff] %v829_v49  ;;  %2109 = vst [vmem:[#allocation5 + $0x40] sm:$0xff] %v1472_v3  ;;  %1149 = vmatprep.mubr.f32.mxu0 %v3230_v0  ;;  %3075 = vmatprep.mubr.msk.f32.mxu1 %vm178_vm0, %v3161_v7 }
 0x180   :  { %p3208_p11 = por %p3207_p10, %p3206_p9 }
 0x181   :  { %v833_v8 = vpop.f32.mrb[68].mxu0  ;;  %v2918_v9 = vpop.f32.mrb[68].mxu1 }
 0x182   :  { %2203 = vst [vmem:[#allocation5 + $0x330] sm:$0xff] %v833_v8  ;;  %2118 = vst [vmem:[#allocation5 + $0x88] sm:$0xff] %v2918_v9  ;;  %v835_v50 = vpop.f32.mrb[69].mxu0  ;;  %2589 = vmatmul.mubr.msk.f32.gmra.mrb[174].mxu0 %vm178_vm0, %v4164_v55  ;;  %v1482_v12 = vpop.f32.mrb[69].mxu1  ;;  %3076 = vmatmul.mubr.msk.f32.gmra.mrb[174].mxu1 %vm178_vm0, %v3162_v13  ;;  %p3209_p12 = pnand %p3208_p11, %p3202_p8 }
 0x183   :  { %2204 = vst [vmem:[#allocation5 + $0x338] sm:$0xff] %v835_v50  ;;  %2115 = vst [vmem:[#allocation5 + $0x70] sm:$0xff] %v1482_v12  ;;  %1155 = vmatprep.mubr.f32.mxu0 %v3230_v0  ;;  %3078 = vmatprep.mubr.msk.f32.mxu1 %vm178_vm0, %v3163_v14 }
 0x185   :  { %v839_v15 = vpop.f32.mrb[70].mxu0  ;;  %v2921_v17 = vpop.f32.mrb[70].mxu1 }
 0x186   :  { %2206 = vst [vmem:[#allocation5 + $0x348] sm:$0xff] %v839_v15  ;;  %2124 = vst [vmem:[#allocation5 + $0xb8] sm:$0xff] %v2921_v17  ;;  %v841_v55 = vpop.f32.mrb[71].mxu0  ;;  %2590 = vmatmul.mubr.msk.f32.gmra.mrb[176].mxu0 %vm178_vm0, %v4169_v56  ;;  %v1492_v18 = vpop.f32.mrb[71].mxu1  ;;  %3079 = vmatmul.mubr.msk.f32.gmra.mrb[176].mxu1 %vm178_vm0, %v3164_v19 }
 0x187   :  { %2207 = vst [vmem:[#allocation5 + $0x350] sm:$0xff] %v841_v55  ;;  %2121 = vst [vmem:[#allocation5 + $0xa0] sm:$0xff] %v1492_v18  ;;  %1161 = vmatprep.mubr.f32.mxu0 %v3230_v0  ;;  %3081 = vmatprep.mubr.msk.f32.mxu1 %vm178_vm0, %v3165_v20 }
 0x189   :  { %v845_v21 = vpop.f32.mrb[72].mxu0  ;;  %v2924_v22 = vpop.f32.mrb[72].mxu1 }
 0x18a   :  { %2209 = vst [vmem:[#allocation5 + $0x360] sm:$0xff] %v845_v21  ;;  %2130 = vst [vmem:[#allocation5 + $0xe8] sm:$0xff] %v2924_v22  ;;  %v847_v56 = vpop.f32.mrb[73].mxu0  ;;  %2591 = vmatmul.mubr.msk.f32.gmra.mrb[178].mxu0 %vm178_vm0, %v4181_v61  ;;  %v1502_v23 = vpop.f32.mrb[73].mxu1  ;;  %3082 = vmatmul.mubr.msk.f32.gmra.mrb[178].mxu1 %vm178_vm0, %v3166_v24 }
 0x18b   :  { %2210 = vst [vmem:[#allocation5 + $0x368] sm:$0xff] %v847_v56  ;;  %2127 = vst [vmem:[#allocation5 + $0xd0] sm:$0xff] %v1502_v23  ;;  %1167 = vmatprep.mubr.f32.mxu0 %v3230_v0  ;;  %3084 = vmatprep.mubr.msk.f32.mxu1 %vm178_vm0, %v3167_v25 }
 0x18d   :  { %v851_v26 = vpop.f32.mrb[74].mxu0  ;;  %v2927_v27 = vpop.f32.mrb[74].mxu1 }
 0x18e   :  { %2212 = vst [vmem:[#allocation5 + $0x378] sm:$0xff] %v851_v26  ;;  %2136 = vst [vmem:[#allocation5 + $0x118] sm:$0xff] %v2927_v27  ;;  %v853_v61 = vpop.f32.mrb[75].mxu0  ;;  %2592 = vmatmul.mubr.msk.f32.gmra.mrb[180].mxu0 %vm178_vm0, %v4186_v62  ;;  %v1512_v28 = vpop.f32.mrb[75].mxu1  ;;  %3085 = vmatmul.mubr.msk.f32.gmra.mrb[180].mxu1 %vm178_vm0, %v3168_v29 }
 0x18f   :  { %2213 = vst [vmem:[#allocation5 + $0x380] sm:$0xff] %v853_v61  ;;  %2133 = vst [vmem:[#allocation5 + $0x100] sm:$0xff] %v1512_v28  ;;  %1173 = vmatprep.mubr.f32.mxu0 %v3230_v0  ;;  %3087 = vmatprep.mubr.msk.f32.mxu1 %vm178_vm0, %v3169_v31 }
 0x191   :  { %v857_v32 = vpop.f32.mrb[76].mxu0  ;;  %v2930_v33 = vpop.f32.mrb[76].mxu1 }
 0x192   :  { %2215 = vst [vmem:[#allocation5 + $0x390] sm:$0xff] %v857_v32  ;;  %2142 = vst [vmem:[#allocation5 + $0x148] sm:$0xff] %v2930_v33  ;;  %v859_v62 = vpop.f32.mrb[77].mxu0  ;;  %2593 = vmatmul.mubr.msk.f32.gmra.mrb[182].mxu0 %vm178_vm0, %v4198_v4  ;;  %v1522_v34 = vpop.f32.mrb[77].mxu1  ;;  %3088 = vmatmul.mubr.msk.f32.gmra.mrb[182].mxu1 %vm178_vm0, %v3170_v36 }
 0x193   :  { %2216 = vst [vmem:[#allocation5 + $0x398] sm:$0xff] %v859_v62  ;;  %2139 = vst [vmem:[#allocation5 + $0x130] sm:$0xff] %v1522_v34  ;;  %1179 = vmatprep.mubr.f32.mxu0 %v3230_v0  ;;  %3090 = vmatprep.mubr.msk.f32.mxu1 %vm178_vm0, %v3171_v37 }
 0x195   :  { %v863_v39 = vpop.f32.mrb[78].mxu0  ;;  %v2933_v40 = vpop.f32.mrb[78].mxu1 }
 0x196   :  { %2218 = vst [vmem:[#allocation5 + $0x3a8] sm:$0xff] %v863_v39  ;;  %2148 = vst [vmem:[#allocation5 + $0x178] sm:$0xff] %v2933_v40  ;;  %v865_v4 = vpop.f32.mrb[79].mxu0  ;;  %2594 = vmatmul.mubr.msk.f32.gmra.mrb[184].mxu0 %vm178_vm0, %v4203_v5  ;;  %v1532_v30 = vpop.f32.mrb[79].mxu1  ;;  %3091 = vmatmul.mubr.msk.f32.gmra.mrb[184].mxu1 %vm178_vm0, %v3172_v35 }
 0x197   :  { %2219 = vst [vmem:[#allocation5 + $0x3b0] sm:$0xff] %v865_v4  ;;  %2145 = vst [vmem:[#allocation5 + $0x160] sm:$0xff] %v1532_v30  ;;  %1185 = vmatprep.mubr.f32.mxu0 %v3230_v0  ;;  %3093 = vmatprep.mubr.msk.f32.mxu1 %vm178_vm0, %v3173_v38 }
 0x199   :  { %v869_v42 = vpop.f32.mrb[80].mxu0  ;;  %v2936_v41 = vpop.f32.mrb[80].mxu1 }
 0x19a   :  { %2221 = vst [vmem:[#allocation5 + $0x3c0] sm:$0xff] %v869_v42  ;;  %2154 = vst [vmem:[#allocation5 + $0x1a8] sm:$0xff] %v2936_v41  ;;  %v871_v5 = vpop.f32.mrb[81].mxu0  ;;  %2595 = vmatmul.mubr.msk.f32.gmra.mrb[186].mxu0 %vm178_vm0, %v4215_v10  ;;  %v1542_v45 = vpop.f32.mrb[81].mxu1  ;;  %3094 = vmatmul.mubr.msk.f32.gmra.mrb[186].mxu1 %vm178_vm0, %v3174_v46 }
 0x19b   :  { %2222 = vst [vmem:[#allocation5 + $0x3c8] sm:$0xff] %v871_v5  ;;  %2151 = vst [vmem:[#allocation5 + $0x190] sm:$0xff] %v1542_v45  ;;  %1191 = vmatprep.mubr.f32.mxu0 %v3230_v0  ;;  %3096 = vmatprep.mubr.msk.f32.mxu1 %vm178_vm0, %v3175_v47 }
 0x19d   :  { %v875_v48 = vpop.f32.mrb[82].mxu0  ;;  %v2939_v51 = vpop.f32.mrb[82].mxu1 }
 0x19e   :  { %2224 = vst [vmem:[#allocation5 + $0x3d8] sm:$0xff] %v875_v48  ;;  %2160 = vst [vmem:[#allocation5 + $0x1d8] sm:$0xff] %v2939_v51  ;;  %v877_v10 = vpop.f32.mrb[83].mxu0  ;;  %2596 = vmatmul.mubr.msk.f32.gmra.mrb[188].mxu0 %vm178_vm0, %v4220_v11  ;;  %v1552_v43 = vpop.f32.mrb[83].mxu1  ;;  %3097 = vmatmul.mubr.msk.f32.gmra.mrb[188].mxu1 %vm178_vm0, %v3176_v52 }
 0x19f   :  { %2225 = vst [vmem:[#allocation5 + $0x3e0] sm:$0xff] %v877_v10  ;;  %2157 = vst [vmem:[#allocation5 + $0x1c0] sm:$0xff] %v1552_v43  ;;  %1197 = vmatprep.mubr.f32.mxu0 %v3230_v0  ;;  %3099 = vmatprep.mubr.msk.f32.mxu1 %vm178_vm0, %v3177_v53 }
 0x1a1   :  { %v881_v54 = vpop.f32.mrb[84].mxu0  ;;  %v2942_v57 = vpop.f32.mrb[84].mxu1 }
 0x1a2   :  { %2227 = vst [vmem:[#allocation5 + $0x3f0] sm:$0xff] %v881_v54  ;;  %2166 = vst [vmem:[#allocation5 + $0x208] sm:$0xff] %v2942_v57  ;;  %v883_v11 = vpop.f32.mrb[85].mxu0  ;;  %2597 = vmatmul.mubr.msk.f32.gmra.mrb[190].mxu0 %vm178_vm0, %v4232_v16  ;;  %v1562_v58 = vpop.f32.mrb[85].mxu1  ;;  %3100 = vmatmul.mubr.msk.f32.gmra.mrb[190].mxu1 %vm178_vm0, %v3178_v44 }
 0x1a3   :  { %2228 = vst [vmem:[#allocation5 + $0x3f8] sm:$0xff] %v883_v11  ;;  %2163 = vst [vmem:[#allocation5 + $0x1f0] sm:$0xff] %v1562_v58 }
 0x1a5   :  { %v887_v0 = vpop.f32.mrb[86].mxu0  ;;  %v2945_v59 = vpop.f32.mrb[86].mxu1 }
 0x1a6   :  { %2230 = vst [vmem:[#allocation5 + $0x408] sm:$0xff] %v887_v0  ;;  %2172 = vst [vmem:[#allocation5 + $0x238] sm:$0xff] %v2945_v59  ;;  %v889_v60 = vpop.f32.mrb[87].mxu0  ;;  %v1572_v63 = vpop.f32.mrb[87].mxu1 }
 0x1a7   :  { %2231 = vst [vmem:[#allocation5 + $0x410] sm:$0xff] %v889_v60  ;;  %2169 = vst [vmem:[#allocation5 + $0x220] sm:$0xff] %v1572_v63 }
 0x1a9   :  { %v893_v1 = vpop.f32.mrb[88].mxu0  ;;  %v2948_v2 = vpop.f32.mrb[88].mxu1 }
 0x1aa   :  { %2233 = vst [vmem:[#allocation5 + $0x420] sm:$0xff] %v893_v1  ;;  %2178 = vst [vmem:[#allocation5 + $0x268] sm:$0xff] %v2948_v2  ;;  %v895_v16 = vpop.f32.mrb[89].mxu0  ;;  %v1582_v49 = vpop.f32.mrb[89].mxu1 }
 0x1ab   :  { %2234 = vst [vmem:[#allocation5 + $0x428] sm:$0xff] %v895_v16  ;;  %2175 = vst [vmem:[#allocation5 + $0x250] sm:$0xff] %v1582_v49 }
 0x1ad   :  { %v899_v3 = vpop.f32.mrb[90].mxu0  ;;  %v2951_v6 = vpop.f32.mrb[90].mxu1 }
 0x1ae   :  { %2236 = vst [vmem:[#allocation5 + $0x438] sm:$0xff] %v899_v3  ;;  %2184 = vst [vmem:[#allocation5 + $0x298] sm:$0xff] %v2951_v6  ;;  %v901_v7 = vpop.f32.mrb[91].mxu0  ;;  %v1592_v8 = vpop.f32.mrb[91].mxu1 }
 0x1af   :  { %2237 = vst [vmem:[#allocation5 + $0x440] sm:$0xff] %v901_v7  ;;  %2181 = vst [vmem:[#allocation5 + $0x280] sm:$0xff] %v1592_v8 }
 0x1b1   :  { %v905_v9 = vpop.f32.mrb[92].mxu0  ;;  %v2954_v50 = vpop.f32.mrb[92].mxu1 }
 0x1b2   :  { %2239 = vst [vmem:[#allocation5 + $0x450] sm:$0xff] %v905_v9  ;;  %2190 = vst [vmem:[#allocation5 + $0x2c8] sm:$0xff] %v2954_v50  ;;  %v907_v12 = vpop.f32.mrb[93].mxu0  ;;  %v1602_v13 = vpop.f32.mrb[93].mxu1 }
 0x1b3   :  { %2240 = vst [vmem:[#allocation5 + $0x458] sm:$0xff] %v907_v12  ;;  %2187 = vst [vmem:[#allocation5 + $0x2b0] sm:$0xff] %v1602_v13 }
 0x1b5   :  { %v911_v14 = vpop.f32.mrb[94].mxu0  ;;  %v2957_v15 = vpop.f32.mrb[94].mxu1 }
 0x1b6   :  { %2242 = vst [vmem:[#allocation5 + $0x468] sm:$0xff] %v911_v14  ;;  %2196 = vst [vmem:[#allocation5 + $0x2f8] sm:$0xff] %v2957_v15  ;;  %v913_v17 = vpop.f32.mrb[95].mxu0  ;;  %v1612_v55 = vpop.f32.mrb[95].mxu1 }
 0x1b7   :  { %2243 = vst [vmem:[#allocation5 + $0x470] sm:$0xff] %v913_v17  ;;  %2193 = vst [vmem:[#allocation5 + $0x2e0] sm:$0xff] %v1612_v55 }
 0x1b9   :  { %v917_v18 = vpop.f32.mrb[96].mxu0  ;;  %v2960_v19 = vpop.f32.mrb[96].mxu1 }
 0x1ba   :  { %2245 = vst [vmem:[#allocation5 + $0x480] sm:$0xff] %v917_v18  ;;  %2202 = vst [vmem:[#allocation5 + $0x328] sm:$0xff] %v2960_v19  ;;  %v919_v20 = vpop.f32.mrb[97].mxu0  ;;  %v1622_v21 = vpop.f32.mrb[97].mxu1 }
 0x1bb   :  { %2246 = vst [vmem:[#allocation5 + $0x488] sm:$0xff] %v919_v20  ;;  %2199 = vst [vmem:[#allocation5 + $0x310] sm:$0xff] %v1622_v21 }
 0x1bd   :  { %v923_v22 = vpop.f32.mrb[98].mxu0  ;;  %v2963_v56 = vpop.f32.mrb[98].mxu1 }
 0x1be   :  { %2248 = vst [vmem:[#allocation5 + $0x498] sm:$0xff] %v923_v22  ;;  %2208 = vst [vmem:[#allocation5 + $0x358] sm:$0xff] %v2963_v56  ;;  %v925_v23 = vpop.f32.mrb[99].mxu0  ;;  %v1632_v24 = vpop.f32.mrb[99].mxu1 }
 0x1bf   :  { %2249 = vst [vmem:[#allocation5 + $0x4a0] sm:$0xff] %v925_v23  ;;  %2205 = vst [vmem:[#allocation5 + $0x340] sm:$0xff] %v1632_v24 }
 0x1c1   :  { %v929_v25 = vpop.f32.mrb[100].mxu0  ;;  %v2966_v26 = vpop.f32.mrb[100].mxu1 }
 0x1c2   :  { %2251 = vst [vmem:[#allocation5 + $0x4b0] sm:$0xff] %v929_v25  ;;  %2214 = vst [vmem:[#allocation5 + $0x388] sm:$0xff] %v2966_v26  ;;  %v931_v27 = vpop.f32.mrb[101].mxu0  ;;  %v1642_v61 = vpop.f32.mrb[101].mxu1 }
 0x1c3   :  { %2252 = vst [vmem:[#allocation5 + $0x4b8] sm:$0xff] %v931_v27  ;;  %2211 = vst [vmem:[#allocation5 + $0x370] sm:$0xff] %v1642_v61 }
 0x1c5   :  { %v935_v28 = vpop.f32.mrb[102].mxu0  ;;  %v2969_v29 = vpop.f32.mrb[102].mxu1 }
 0x1c6   :  { %2254 = vst [vmem:[#allocation5 + $0x4c8] sm:$0xff] %v935_v28  ;;  %2220 = vst [vmem:[#allocation5 + $0x3b8] sm:$0xff] %v2969_v29  ;;  %v937_v31 = vpop.f32.mrb[103].mxu0  ;;  %v1652_v32 = vpop.f32.mrb[103].mxu1 }
 0x1c7   :  { %2255 = vst [vmem:[#allocation5 + $0x4d0] sm:$0xff] %v937_v31  ;;  %2217 = vst [vmem:[#allocation5 + $0x3a0] sm:$0xff] %v1652_v32 }
 0x1c9   :  { %v941_v33 = vpop.f32.mrb[104].mxu0  ;;  %v2972_v62 = vpop.f32.mrb[104].mxu1 }
 0x1ca   :  { %2257 = vst [vmem:[#allocation5 + $0x4e0] sm:$0xff] %v941_v33  ;;  %2226 = vst [vmem:[#allocation5 + $0x3e8] sm:$0xff] %v2972_v62  ;;  %v943_v34 = vpop.f32.mrb[105].mxu0  ;;  %v1662_v36 = vpop.f32.mrb[105].mxu1 }
 0x1cb   :  { %2258 = vst [vmem:[#allocation5 + $0x4e8] sm:$0xff] %v943_v34  ;;  %2223 = vst [vmem:[#allocation5 + $0x3d0] sm:$0xff] %v1662_v36 }
 0x1cd   :  { %v947_v37 = vpop.f32.mrb[106].mxu0  ;;  %v2975_v39 = vpop.f32.mrb[106].mxu1 }
 0x1ce   :  { %2260 = vst [vmem:[#allocation5 + $0x4f8] sm:$0xff] %v947_v37  ;;  %2232 = vst [vmem:[#allocation5 + $0x418] sm:$0xff] %v2975_v39  ;;  %v949_v40 = vpop.f32.mrb[107].mxu0  ;;  %v1672_v4 = vpop.f32.mrb[107].mxu1 }
 0x1cf   :  { %2261 = vst [vmem:[#allocation5 + $0x500] sm:$0xff] %v949_v40  ;;  %2229 = vst [vmem:[#allocation5 + $0x400] sm:$0xff] %v1672_v4 }
 0x1d1   :  { %v953_v30 = vpop.f32.mrb[108].mxu0  ;;  %v2978_v35 = vpop.f32.mrb[108].mxu1 }
 0x1d2   :  { %2263 = vst [vmem:[#allocation5 + $0x510] sm:$0xff] %v953_v30  ;;  %2238 = vst [vmem:[#allocation5 + $0x448] sm:$0xff] %v2978_v35  ;;  %v955_v38 = vpop.f32.mrb[109].mxu0  ;;  %v1682_v42 = vpop.f32.mrb[109].mxu1 }
 0x1d3   :  { %2264 = vst [vmem:[#allocation5 + $0x518] sm:$0xff] %v955_v38  ;;  %2235 = vst [vmem:[#allocation5 + $0x430] sm:$0xff] %v1682_v42 }
 0x1d5   :  { %v959_v41 = vpop.f32.mrb[110].mxu0  ;;  %v2981_v5 = vpop.f32.mrb[110].mxu1 }
 0x1d6   :  { %2266 = vst [vmem:[#allocation5 + $0x528] sm:$0xff] %v959_v41  ;;  %2244 = vst [vmem:[#allocation5 + $0x478] sm:$0xff] %v2981_v5  ;;  %v961_v45 = vpop.f32.mrb[111].mxu0  ;;  %v1692_v46 = vpop.f32.mrb[111].mxu1 }
 0x1d7   :  { %2267 = vst [vmem:[#allocation5 + $0x530] sm:$0xff] %v961_v45  ;;  %2241 = vst [vmem:[#allocation5 + $0x460] sm:$0xff] %v1692_v46 }
 0x1d9   :  { %v965_v47 = vpop.f32.mrb[112].mxu0  ;;  %v2984_v48 = vpop.f32.mrb[112].mxu1 }
 0x1da   :  { %2269 = vst [vmem:[#allocation5 + $0x540] sm:$0xff] %v965_v47  ;;  %2250 = vst [vmem:[#allocation5 + $0x4a8] sm:$0xff] %v2984_v48  ;;  %v967_v51 = vpop.f32.mrb[113].mxu0  ;;  %v1702_v10 = vpop.f32.mrb[113].mxu1 }
 0x1db   :  { %2270 = vst [vmem:[#allocation5 + $0x548] sm:$0xff] %v967_v51  ;;  %2247 = vst [vmem:[#allocation5 + $0x490] sm:$0xff] %v1702_v10 }
 0x1dd   :  { %v971_v43 = vpop.f32.mrb[114].mxu0  ;;  %v2987_v52 = vpop.f32.mrb[114].mxu1 }
 0x1de   :  { %2272 = vst [vmem:[#allocation5 + $0x558] sm:$0xff] %v971_v43  ;;  %2256 = vst [vmem:[#allocation5 + $0x4d8] sm:$0xff] %v2987_v52  ;;  %v973_v53 = vpop.f32.mrb[115].mxu0  ;;  %v1712_v54 = vpop.f32.mrb[115].mxu1 }
 0x1df   :  { %2273 = vst [vmem:[#allocation5 + $0x560] sm:$0xff] %v973_v53  ;;  %2253 = vst [vmem:[#allocation5 + $0x4c0] sm:$0xff] %v1712_v54 }
 0x1e1   :  { %v977_v57 = vpop.f32.mrb[116].mxu0  ;;  %v2990_v11 = vpop.f32.mrb[116].mxu1 }
 0x1e2   :  { %2275 = vst [vmem:[#allocation5 + $0x570] sm:$0xff] %v977_v57  ;;  %2262 = vst [vmem:[#allocation5 + $0x508] sm:$0xff] %v2990_v11  ;;  %v979_v58 = vpop.f32.mrb[117].mxu0  ;;  %v1722_v44 = vpop.f32.mrb[117].mxu1 }
 0x1e3   :  { %2276 = vst [vmem:[#allocation5 + $0x578] sm:$0xff] %v979_v58  ;;  %2259 = vst [vmem:[#allocation5 + $0x4f0] sm:$0xff] %v1722_v44 }
 0x1e5   :  { %v983_v0 = vpop.f32.mrb[118].mxu0  ;;  %v2993_v59 = vpop.f32.mrb[118].mxu1 }
 0x1e6   :  { %2278 = vst [vmem:[#allocation5 + $0x588] sm:$0xff] %v983_v0  ;;  %2268 = vst [vmem:[#allocation5 + $0x538] sm:$0xff] %v2993_v59  ;;  %v985_v60 = vpop.f32.mrb[119].mxu0  ;;  %v1732_v63 = vpop.f32.mrb[119].mxu1 }
 0x1e7   :  { %2279 = vst [vmem:[#allocation5 + $0x590] sm:$0xff] %v985_v60  ;;  %2265 = vst [vmem:[#allocation5 + $0x520] sm:$0xff] %v1732_v63 }
 0x1e9   :  { %v989_v1 = vpop.f32.mrb[120].mxu0  ;;  %v2996_v2 = vpop.f32.mrb[120].mxu1 }
 0x1ea   :  { %2281 = vst [vmem:[#allocation5 + $0x5a0] sm:$0xff] %v989_v1  ;;  %2274 = vst [vmem:[#allocation5 + $0x568] sm:$0xff] %v2996_v2  ;;  %v991_v16 = vpop.f32.mrb[121].mxu0  ;;  %v1742_v49 = vpop.f32.mrb[121].mxu1 }
 0x1eb   :  { %2282 = vst [vmem:[#allocation5 + $0x5a8] sm:$0xff] %v991_v16  ;;  %2271 = vst [vmem:[#allocation5 + $0x550] sm:$0xff] %v1742_v49 }
 0x1ed   :  { %v995_v3 = vpop.f32.mrb[122].mxu0  ;;  %v2999_v6 = vpop.f32.mrb[122].mxu1 }
 0x1ee   :  { %2284 = vst [vmem:[#allocation5 + $0x5b8] sm:$0xff] %v995_v3  ;;  %2280 = vst [vmem:[#allocation5 + $0x598] sm:$0xff] %v2999_v6  ;;  %v997_v7 = vpop.f32.mrb[123].mxu0  ;;  %v1752_v8 = vpop.f32.mrb[123].mxu1 }
 0x1ef   :  { %2285 = vst [vmem:[#allocation5 + $0x5c0] sm:$0xff] %v997_v7  ;;  %2277 = vst [vmem:[#allocation5 + $0x580] sm:$0xff] %v1752_v8 }
 0x1f1   :  { %v1001_v9 = vpop.f32.mrb[124].mxu0  ;;  %v3002_v50 = vpop.f32.mrb[124].mxu1 }
 0x1f2   :  { %2287 = vst [vmem:[#allocation5 + $0x5d0] sm:$0xff] %v1001_v9  ;;  %2286 = vst [vmem:[#allocation5 + $0x5c8] sm:$0xff] %v3002_v50  ;;  %v1003_v12 = vpop.f32.mrb[125].mxu0  ;;  %v1762_v13 = vpop.f32.mrb[125].mxu1 }
 0x1f3   :  { %2288 = vst [vmem:[#allocation5 + $0x5d8] sm:$0xff] %v1003_v12  ;;  %2283 = vst [vmem:[#allocation5 + $0x5b0] sm:$0xff] %v1762_v13 }
 0x1f5   :  { %v1007_v14 = vpop.f32.mrb[126].mxu0  ;;  %v3005_v15 = vpop.f32.mrb[126].mxu1 }
 0x1f6   :  { %2290 = vst [vmem:[#allocation5 + $0x5e8] sm:$0xff] %v1007_v14  ;;  %2292 = vst [vmem:[#allocation5 + $0x5f8] sm:$0xff] %v3005_v15  ;;  %v1009_v17 = vpop.f32.mrb[127].mxu0  ;;  %v1772_v55 = vpop.f32.mrb[127].mxu1 }
 0x1f7   :  { %2291 = vst [vmem:[#allocation5 + $0x5f0] sm:$0xff] %v1009_v17  ;;  %2289 = vst [vmem:[#allocation5 + $0x5e0] sm:$0xff] %v1772_v55 }
 0x1f9   :  { %v1013_v18 = vpop.f32.mrb[128].mxu0  ;;  %v3008_v19 = vpop.f32.mrb[128].mxu1 }
 0x1fa   :  { %2293 = vst [vmem:[#allocation5 + $0x600] sm:$0xff] %v1013_v18  ;;  %2298 = vst [vmem:[#allocation5 + $0x628] sm:$0xff] %v3008_v19  ;;  %v1015_v20 = vpop.f32.mrb[129].mxu0  ;;  %v1782_v21 = vpop.f32.mrb[129].mxu1 }
 0x1fb   :  { %2294 = vst [vmem:[#allocation5 + $0x608] sm:$0xff] %v1015_v20  ;;  %2295 = vst [vmem:[#allocation5 + $0x610] sm:$0xff] %v1782_v21 }
 0x1fd   :  { %v1019_v22 = vpop.f32.mrb[130].mxu0  ;;  %v3011_v56 = vpop.f32.mrb[130].mxu1 }
 0x1fe   :  { %2296 = vst [vmem:[#allocation5 + $0x618] sm:$0xff] %v1019_v22  ;;  %2304 = vst [vmem:[#allocation5 + $0x658] sm:$0xff] %v3011_v56  ;;  %v1021_v23 = vpop.f32.mrb[131].mxu0  ;;  %v1792_v24 = vpop.f32.mrb[131].mxu1 }
 0x1ff   :  { %2297 = vst [vmem:[#allocation5 + $0x620] sm:$0xff] %v1021_v23  ;;  %2301 = vst [vmem:[#allocation5 + $0x640] sm:$0xff] %v1792_v24 }
 0x201   :  { %v1025_v25 = vpop.f32.mrb[132].mxu0  ;;  %v3014_v26 = vpop.f32.mrb[132].mxu1 }
 0x202   :  { %2299 = vst [vmem:[#allocation5 + $0x630] sm:$0xff] %v1025_v25  ;;  %2310 = vst [vmem:[#allocation5 + $0x688] sm:$0xff] %v3014_v26  ;;  %v1027_v27 = vpop.f32.mrb[133].mxu0  ;;  %v1802_v61 = vpop.f32.mrb[133].mxu1 }
 0x203   :  { %2300 = vst [vmem:[#allocation5 + $0x638] sm:$0xff] %v1027_v27  ;;  %2307 = vst [vmem:[#allocation5 + $0x670] sm:$0xff] %v1802_v61 }
 0x205   :  { %v1031_v28 = vpop.f32.mrb[134].mxu0  ;;  %v3017_v29 = vpop.f32.mrb[134].mxu1 }
 0x206   :  { %2302 = vst [vmem:[#allocation5 + $0x648] sm:$0xff] %v1031_v28  ;;  %2316 = vst [vmem:[#allocation5 + $0x6b8] sm:$0xff] %v3017_v29  ;;  %v1033_v31 = vpop.f32.mrb[135].mxu0  ;;  %v1812_v32 = vpop.f32.mrb[135].mxu1 }
 0x207   :  { %2303 = vst [vmem:[#allocation5 + $0x650] sm:$0xff] %v1033_v31  ;;  %2313 = vst [vmem:[#allocation5 + $0x6a0] sm:$0xff] %v1812_v32 }
 0x209   :  { %v1037_v33 = vpop.f32.mrb[136].mxu0  ;;  %v3020_v62 = vpop.f32.mrb[136].mxu1 }
 0x20a   :  { %2305 = vst [vmem:[#allocation5 + $0x660] sm:$0xff] %v1037_v33  ;;  %2322 = vst [vmem:[#allocation5 + $0x6e8] sm:$0xff] %v3020_v62  ;;  %v1039_v34 = vpop.f32.mrb[137].mxu0  ;;  %v1822_v36 = vpop.f32.mrb[137].mxu1 }
 0x20b   :  { %2306 = vst [vmem:[#allocation5 + $0x668] sm:$0xff] %v1039_v34  ;;  %2319 = vst [vmem:[#allocation5 + $0x6d0] sm:$0xff] %v1822_v36 }
 0x20d   :  { %v1043_v37 = vpop.f32.mrb[138].mxu0  ;;  %v3023_v39 = vpop.f32.mrb[138].mxu1 }
 0x20e   :  { %2308 = vst [vmem:[#allocation5 + $0x678] sm:$0xff] %v1043_v37  ;;  %2328 = vst [vmem:[#allocation5 + $0x718] sm:$0xff] %v3023_v39  ;;  %v1045_v40 = vpop.f32.mrb[139].mxu0  ;;  %v1832_v4 = vpop.f32.mrb[139].mxu1 }
 0x20f   :  { %2309 = vst [vmem:[#allocation5 + $0x680] sm:$0xff] %v1045_v40  ;;  %2325 = vst [vmem:[#allocation5 + $0x700] sm:$0xff] %v1832_v4 }
 0x211   :  { %v1049_v30 = vpop.f32.mrb[140].mxu0  ;;  %v3026_v35 = vpop.f32.mrb[140].mxu1 }
 0x212   :  { %2311 = vst [vmem:[#allocation5 + $0x690] sm:$0xff] %v1049_v30  ;;  %2334 = vst [vmem:[#allocation5 + $0x748] sm:$0xff] %v3026_v35  ;;  %v1051_v38 = vpop.f32.mrb[141].mxu0  ;;  %v1842_v42 = vpop.f32.mrb[141].mxu1 }
 0x213   :  { %2312 = vst [vmem:[#allocation5 + $0x698] sm:$0xff] %v1051_v38  ;;  %2331 = vst [vmem:[#allocation5 + $0x730] sm:$0xff] %v1842_v42 }
 0x215   :  { %v1055_v41 = vpop.f32.mrb[142].mxu0  ;;  %v3029_v5 = vpop.f32.mrb[142].mxu1 }
 0x216   :  { %2314 = vst [vmem:[#allocation5 + $0x6a8] sm:$0xff] %v1055_v41  ;;  %2340 = vst [vmem:[#allocation5 + $0x778] sm:$0xff] %v3029_v5  ;;  %v1057_v45 = vpop.f32.mrb[143].mxu0  ;;  %v1852_v46 = vpop.f32.mrb[143].mxu1 }
 0x217   :  { %2315 = vst [vmem:[#allocation5 + $0x6b0] sm:$0xff] %v1057_v45  ;;  %2337 = vst [vmem:[#allocation5 + $0x760] sm:$0xff] %v1852_v46 }
 0x219   :  { %v1061_v47 = vpop.f32.mrb[144].mxu0  ;;  %v3032_v48 = vpop.f32.mrb[144].mxu1 }
 0x21a   :  { %2317 = vst [vmem:[#allocation5 + $0x6c0] sm:$0xff] %v1061_v47  ;;  %2346 = vst [vmem:[#allocation5 + $0x7a8] sm:$0xff] %v3032_v48  ;;  %v1063_v51 = vpop.f32.mrb[145].mxu0  ;;  %v1862_v10 = vpop.f32.mrb[145].mxu1 }
 0x21b   :  { %2318 = vst [vmem:[#allocation5 + $0x6c8] sm:$0xff] %v1063_v51  ;;  %2343 = vst [vmem:[#allocation5 + $0x790] sm:$0xff] %v1862_v10 }
 0x21d   :  { %v1067_v43 = vpop.f32.mrb[146].mxu0  ;;  %v3035_v52 = vpop.f32.mrb[146].mxu1 }
 0x21e   :  { %2320 = vst [vmem:[#allocation5 + $0x6d8] sm:$0xff] %v1067_v43  ;;  %2352 = vst [vmem:[#allocation5 + $0x7d8] sm:$0xff] %v3035_v52  ;;  %v1069_v53 = vpop.f32.mrb[147].mxu0  ;;  %v1872_v54 = vpop.f32.mrb[147].mxu1 }
 0x21f   :  { %2321 = vst [vmem:[#allocation5 + $0x6e0] sm:$0xff] %v1069_v53  ;;  %2349 = vst [vmem:[#allocation5 + $0x7c0] sm:$0xff] %v1872_v54 }
 0x221   :  { %v1073_v57 = vpop.f32.mrb[148].mxu0  ;;  %v3038_v11 = vpop.f32.mrb[148].mxu1 }
 0x222   :  { %2323 = vst [vmem:[#allocation5 + $0x6f0] sm:$0xff] %v1073_v57  ;;  %2358 = vst [vmem:[#allocation5 + $0x808] sm:$0xff] %v3038_v11  ;;  %v1075_v58 = vpop.f32.mrb[149].mxu0  ;;  %v1882_v44 = vpop.f32.mrb[149].mxu1 }
 0x223   :  { %2324 = vst [vmem:[#allocation5 + $0x6f8] sm:$0xff] %v1075_v58  ;;  %2355 = vst [vmem:[#allocation5 + $0x7f0] sm:$0xff] %v1882_v44 }
 0x225   :  { %v1079_v0 = vpop.f32.mrb[150].mxu0  ;;  %v3041_v59 = vpop.f32.mrb[150].mxu1 }
 0x226   :  { %2326 = vst [vmem:[#allocation5 + $0x708] sm:$0xff] %v1079_v0  ;;  %2364 = vst [vmem:[#allocation5 + $0x838] sm:$0xff] %v3041_v59  ;;  %v1081_v60 = vpop.f32.mrb[151].mxu0  ;;  %v1892_v63 = vpop.f32.mrb[151].mxu1 }
 0x227   :  { %2327 = vst [vmem:[#allocation5 + $0x710] sm:$0xff] %v1081_v60  ;;  %2361 = vst [vmem:[#allocation5 + $0x820] sm:$0xff] %v1892_v63 }
 0x229   :  { %v1085_v1 = vpop.f32.mrb[152].mxu0  ;;  %v3044_v2 = vpop.f32.mrb[152].mxu1 }
 0x22a   :  { %2329 = vst [vmem:[#allocation5 + $0x720] sm:$0xff] %v1085_v1  ;;  %2370 = vst [vmem:[#allocation5 + $0x868] sm:$0xff] %v3044_v2  ;;  %v1087_v16 = vpop.f32.mrb[153].mxu0  ;;  %v1902_v49 = vpop.f32.mrb[153].mxu1 }
 0x22b   :  { %2330 = vst [vmem:[#allocation5 + $0x728] sm:$0xff] %v1087_v16  ;;  %2367 = vst [vmem:[#allocation5 + $0x850] sm:$0xff] %v1902_v49 }
 0x22d   :  { %v1091_v3 = vpop.f32.mrb[154].mxu0  ;;  %v3047_v6 = vpop.f32.mrb[154].mxu1 }
 0x22e   :  { %2332 = vst [vmem:[#allocation5 + $0x738] sm:$0xff] %v1091_v3  ;;  %2376 = vst [vmem:[#allocation5 + $0x898] sm:$0xff] %v3047_v6  ;;  %v1093_v7 = vpop.f32.mrb[155].mxu0  ;;  %v1912_v8 = vpop.f32.mrb[155].mxu1 }
 0x22f   :  { %2333 = vst [vmem:[#allocation5 + $0x740] sm:$0xff] %v1093_v7  ;;  %2373 = vst [vmem:[#allocation5 + $0x880] sm:$0xff] %v1912_v8 }
 0x231   :  { %v1097_v9 = vpop.f32.mrb[156].mxu0  ;;  %v3050_v50 = vpop.f32.mrb[156].mxu1 }
 0x232   :  { %2335 = vst [vmem:[#allocation5 + $0x750] sm:$0xff] %v1097_v9  ;;  %2382 = vst [vmem:[#allocation5 + $0x8c8] sm:$0xff] %v3050_v50  ;;  %v1099_v12 = vpop.f32.mrb[157].mxu0  ;;  %v1922_v13 = vpop.f32.mrb[157].mxu1 }
 0x233   :  { %2336 = vst [vmem:[#allocation5 + $0x758] sm:$0xff] %v1099_v12  ;;  %2379 = vst [vmem:[#allocation5 + $0x8b0] sm:$0xff] %v1922_v13 }
 0x235   :  { %v1103_v14 = vpop.f32.mrb[158].mxu0  ;;  %v3053_v15 = vpop.f32.mrb[158].mxu1 }
 0x236   :  { %2338 = vst [vmem:[#allocation5 + $0x768] sm:$0xff] %v1103_v14  ;;  %2388 = vst [vmem:[#allocation5 + $0x8f8] sm:$0xff] %v3053_v15  ;;  %v1105_v17 = vpop.f32.mrb[159].mxu0  ;;  %v1932_v55 = vpop.f32.mrb[159].mxu1 }
 0x237   :  { %2339 = vst [vmem:[#allocation5 + $0x770] sm:$0xff] %v1105_v17  ;;  %2385 = vst [vmem:[#allocation5 + $0x8e0] sm:$0xff] %v1932_v55 }
 0x239   :  { %v1109_v18 = vpop.f32.mrb[160].mxu0  ;;  %v3056_v19 = vpop.f32.mrb[160].mxu1 }
 0x23a   :  { %2341 = vst [vmem:[#allocation5 + $0x780] sm:$0xff] %v1109_v18  ;;  %2394 = vst [vmem:[#allocation5 + $0x928] sm:$0xff] %v3056_v19  ;;  %v1111_v20 = vpop.f32.mrb[161].mxu0  ;;  %v1942_v21 = vpop.f32.mrb[161].mxu1 }
 0x23b   :  { %2342 = vst [vmem:[#allocation5 + $0x788] sm:$0xff] %v1111_v20  ;;  %2391 = vst [vmem:[#allocation5 + $0x910] sm:$0xff] %v1942_v21 }
 0x23d   :  { %v1115_v22 = vpop.f32.mrb[162].mxu0  ;;  %v3059_v56 = vpop.f32.mrb[162].mxu1 }
 0x23e   :  { %2344 = vst [vmem:[#allocation5 + $0x798] sm:$0xff] %v1115_v22  ;;  %2400 = vst [vmem:[#allocation5 + $0x958] sm:$0xff] %v3059_v56  ;;  %v1117_v23 = vpop.f32.mrb[163].mxu0  ;;  %v1952_v24 = vpop.f32.mrb[163].mxu1 }
 0x23f   :  { %2345 = vst [vmem:[#allocation5 + $0x7a0] sm:$0xff] %v1117_v23  ;;  %2397 = vst [vmem:[#allocation5 + $0x940] sm:$0xff] %v1952_v24 }
 0x241   :  { %v1121_v25 = vpop.f32.mrb[164].mxu0  ;;  %v3062_v26 = vpop.f32.mrb[164].mxu1 }
 0x242   :  { %2347 = vst [vmem:[#allocation5 + $0x7b0] sm:$0xff] %v1121_v25  ;;  %2406 = vst [vmem:[#allocation5 + $0x988] sm:$0xff] %v3062_v26  ;;  %v1123_v27 = vpop.f32.mrb[165].mxu0  ;;  %v1962_v61 = vpop.f32.mrb[165].mxu1 }
 0x243   :  { %2348 = vst [vmem:[#allocation5 + $0x7b8] sm:$0xff] %v1123_v27  ;;  %2403 = vst [vmem:[#allocation5 + $0x970] sm:$0xff] %v1962_v61 }
 0x245   :  { %v1127_v28 = vpop.f32.mrb[166].mxu0  ;;  %v3065_v29 = vpop.f32.mrb[166].mxu1 }
 0x246   :  { %2350 = vst [vmem:[#allocation5 + $0x7c8] sm:$0xff] %v1127_v28  ;;  %2412 = vst [vmem:[#allocation5 + $0x9b8] sm:$0xff] %v3065_v29  ;;  %v1129_v31 = vpop.f32.mrb[167].mxu0  ;;  %v1972_v32 = vpop.f32.mrb[167].mxu1 }
 0x247   :  { %2351 = vst [vmem:[#allocation5 + $0x7d0] sm:$0xff] %v1129_v31  ;;  %2409 = vst [vmem:[#allocation5 + $0x9a0] sm:$0xff] %v1972_v32 }
 0x249   :  { %v1133_v33 = vpop.f32.mrb[168].mxu0  ;;  %v3068_v62 = vpop.f32.mrb[168].mxu1 }
 0x24a   :  { %2353 = vst [vmem:[#allocation5 + $0x7e0] sm:$0xff] %v1133_v33  ;;  %2418 = vst [vmem:[#allocation5 + $0x9e8] sm:$0xff] %v3068_v62  ;;  %v1135_v34 = vpop.f32.mrb[169].mxu0  ;;  %v1982_v36 = vpop.f32.mrb[169].mxu1 }
 0x24b   :  { %2354 = vst [vmem:[#allocation5 + $0x7e8] sm:$0xff] %v1135_v34  ;;  %2415 = vst [vmem:[#allocation5 + $0x9d0] sm:$0xff] %v1982_v36 }
 0x24d   :  { %v1139_v37 = vpop.f32.mrb[170].mxu0  ;;  %v3071_v39 = vpop.f32.mrb[170].mxu1 }
 0x24e   :  { %2356 = vst [vmem:[#allocation5 + $0x7f8] sm:$0xff] %v1139_v37  ;;  %2424 = vst [vmem:[#allocation5 + $0xa18] sm:$0xff] %v3071_v39  ;;  %v1141_v40 = vpop.f32.mrb[171].mxu0  ;;  %v1992_v4 = vpop.f32.mrb[171].mxu1 }
 0x24f   :  { %2357 = vst [vmem:[#allocation5 + $0x800] sm:$0xff] %v1141_v40  ;;  %2421 = vst [vmem:[#allocation5 + $0xa00] sm:$0xff] %v1992_v4 }
 0x251   :  { %v1145_v30 = vpop.f32.mrb[172].mxu0  ;;  %v3074_v35 = vpop.f32.mrb[172].mxu1 }
 0x252   :  { %2359 = vst [vmem:[#allocation5 + $0x810] sm:$0xff] %v1145_v30  ;;  %2430 = vst [vmem:[#allocation5 + $0xa48] sm:$0xff] %v3074_v35  ;;  %v1147_v38 = vpop.f32.mrb[173].mxu0  ;;  %v2002_v42 = vpop.f32.mrb[173].mxu1 }
 0x253   :  { %2360 = vst [vmem:[#allocation5 + $0x818] sm:$0xff] %v1147_v38  ;;  %2427 = vst [vmem:[#allocation5 + $0xa30] sm:$0xff] %v2002_v42 }
 0x255   :  { %v1151_v41 = vpop.f32.mrb[174].mxu0  ;;  %v3077_v5 = vpop.f32.mrb[174].mxu1 }
 0x256   :  { %2362 = vst [vmem:[#allocation5 + $0x828] sm:$0xff] %v1151_v41  ;;  %2436 = vst [vmem:[#allocation5 + $0xa78] sm:$0xff] %v3077_v5  ;;  %v1153_v45 = vpop.f32.mrb[175].mxu0  ;;  %v2012_v46 = vpop.f32.mrb[175].mxu1 }
 0x257   :  { %2363 = vst [vmem:[#allocation5 + $0x830] sm:$0xff] %v1153_v45  ;;  %2433 = vst [vmem:[#allocation5 + $0xa60] sm:$0xff] %v2012_v46 }
 0x259   :  { %v1157_v47 = vpop.f32.mrb[176].mxu0  ;;  %v3080_v48 = vpop.f32.mrb[176].mxu1 }
 0x25a   :  { %2365 = vst [vmem:[#allocation5 + $0x840] sm:$0xff] %v1157_v47  ;;  %2442 = vst [vmem:[#allocation5 + $0xaa8] sm:$0xff] %v3080_v48  ;;  %v1159_v51 = vpop.f32.mrb[177].mxu0  ;;  %v2022_v10 = vpop.f32.mrb[177].mxu1 }
 0x25b   :  { %2366 = vst [vmem:[#allocation5 + $0x848] sm:$0xff] %v1159_v51  ;;  %2439 = vst [vmem:[#allocation5 + $0xa90] sm:$0xff] %v2022_v10 }
 0x25d   :  { %v1163_v43 = vpop.f32.mrb[178].mxu0  ;;  %v3083_v52 = vpop.f32.mrb[178].mxu1 }
 0x25e   :  { %2368 = vst [vmem:[#allocation5 + $0x858] sm:$0xff] %v1163_v43  ;;  %2448 = vst [vmem:[#allocation5 + $0xad8] sm:$0xff] %v3083_v52  ;;  %v1165_v53 = vpop.f32.mrb[179].mxu0  ;;  %v2032_v54 = vpop.f32.mrb[179].mxu1 }
 0x25f   :  { %2369 = vst [vmem:[#allocation5 + $0x860] sm:$0xff] %v1165_v53  ;;  %2445 = vst [vmem:[#allocation5 + $0xac0] sm:$0xff] %v2032_v54 }
 0x261   :  { %v1169_v57 = vpop.f32.mrb[180].mxu0  ;;  %v3086_v11 = vpop.f32.mrb[180].mxu1 }
 0x262   :  { %2371 = vst [vmem:[#allocation5 + $0x870] sm:$0xff] %v1169_v57  ;;  %2454 = vst [vmem:[#allocation5 + $0xb08] sm:$0xff] %v3086_v11  ;;  %v1171_v58 = vpop.f32.mrb[181].mxu0  ;;  %v2042_v44 = vpop.f32.mrb[181].mxu1 }
 0x263   :  { %2372 = vst [vmem:[#allocation5 + $0x878] sm:$0xff] %v1171_v58  ;;  %2451 = vst [vmem:[#allocation5 + $0xaf0] sm:$0xff] %v2042_v44 }
 0x265   :  { %v1175_v0 = vpop.f32.mrb[182].mxu0  ;;  %v3089_v59 = vpop.f32.mrb[182].mxu1 }
 0x266   :  { %2374 = vst [vmem:[#allocation5 + $0x888] sm:$0xff] %v1175_v0  ;;  %2460 = vst [vmem:[#allocation5 + $0xb38] sm:$0xff] %v3089_v59  ;;  %v1177_v60 = vpop.f32.mrb[183].mxu0  ;;  %v2052_v63 = vpop.f32.mrb[183].mxu1 }
 0x267   :  { %2375 = vst [vmem:[#allocation5 + $0x890] sm:$0xff] %v1177_v60  ;;  %2457 = vst [vmem:[#allocation5 + $0xb20] sm:$0xff] %v2052_v63 }
 0x269   :  { %v1181_v1 = vpop.f32.mrb[184].mxu0  ;;  %v3092_v2 = vpop.f32.mrb[184].mxu1 }
 0x26a   :  { %2377 = vst [vmem:[#allocation5 + $0x8a0] sm:$0xff] %v1181_v1  ;;  %2466 = vst [vmem:[#allocation5 + $0xb68] sm:$0xff] %v3092_v2  ;;  %v1183_v16 = vpop.f32.mrb[185].mxu0  ;;  %v2062_v49 = vpop.f32.mrb[185].mxu1 }
 0x26b   :  { %2378 = vst [vmem:[#allocation5 + $0x8a8] sm:$0xff] %v1183_v16  ;;  %2463 = vst [vmem:[#allocation5 + $0xb50] sm:$0xff] %v2062_v49 }
 0x26d   :  { %v1187_v3 = vpop.f32.mrb[186].mxu0  ;;  %v3095_v6 = vpop.f32.mrb[186].mxu1 }
 0x26e   :  { %2380 = vst [vmem:[#allocation5 + $0x8b8] sm:$0xff] %v1187_v3  ;;  %2472 = vst [vmem:[#allocation5 + $0xb98] sm:$0xff] %v3095_v6  ;;  %v1189_v7 = vpop.f32.mrb[187].mxu0  ;;  %v2072_v8 = vpop.f32.mrb[187].mxu1 }
 0x26f   :  { %2381 = vst [vmem:[#allocation5 + $0x8c0] sm:$0xff] %v1189_v7  ;;  %2469 = vst [vmem:[#allocation5 + $0xb80] sm:$0xff] %v2072_v8 }
 0x271   :  { %v1193_v9 = vpop.f32.mrb[188].mxu0  ;;  %v3098_v50 = vpop.f32.mrb[188].mxu1 }
 0x272   :  { %2383 = vst [vmem:[#allocation5 + $0x8d0] sm:$0xff] %v1193_v9  ;;  %2478 = vst [vmem:[#allocation5 + $0xbc8] sm:$0xff] %v3098_v50  ;;  %v1195_v12 = vpop.f32.mrb[189].mxu0  ;;  %v2082_v13 = vpop.f32.mrb[189].mxu1 }
 0x273   :  { %2384 = vst [vmem:[#allocation5 + $0x8d8] sm:$0xff] %v1195_v12  ;;  %2475 = vst [vmem:[#allocation5 + $0xbb0] sm:$0xff] %v2082_v13 }
 0x275   :  { %v1199_v14 = vpop.f32.mrb[190].mxu0  ;;  %v3101_v15 = vpop.f32.mrb[190].mxu1 }
 0x276   :  { %2386 = vst [vmem:[#allocation5 + $0x8e8] sm:$0xff] %v1199_v14  ;;  %2484 = vst [vmem:[#allocation5 + $0xbf8] sm:$0xff] %v3101_v15  ;;  %v1201_v17 = vpop.f32.mrb[191].mxu0  ;;  %v2092_v55 = vpop.f32.mrb[191].mxu1 }
 0x277   :  { %2387 = vst [vmem:[#allocation5 + $0x8f0] sm:$0xff] %v1201_v17  ;;  %2481 = vst [vmem:[#allocation5 + $0xbe0] sm:$0xff] %v2092_v55 }
 0x278   :  { %3212 = shalt.err (!%p3209_p12)
}
 0x279   :  { %s3213_s1 = scalar_lea.hbm %s4431_s2, 49152 }
 0x27a   :  { %p3214_p13 = scmp.ne.s32.totalorder %s4431_s2, %s3213_s1  ;;  %p3217_p0 = scmp.lt.u32.totalorder %s3213_s1, %s4431_s2 }
 0x27c   :  { %p3219_p1 = pnand %p3217_p0, %p3214_p13 }
 0x27e   :  { %3222 = shalt.err (!%p3219_p1)
}
 0x27f   :  { %2496 = dma.vmem_to_hbm [thread:$0]  %s2491_s17, 49152, %s4431_s2, [#allocation4], %s3228_s19, %s3228_s19, %s3229_s20  }
 0x280   :  { %3225 = dma.done.wait [#allocation4], 49152  }
 0x281   :  { %3226 = vsyncadd [#allocation4], 4294918144 }
 0x282   :  { %2500 = vsyncpa [#allocation3], 1 }
 0x283   :  { %2501 = vsyncpa [#allocation4], 1 }

// kernel: tpu_custom_call.1
= control target key start
LH: loop header
LB: loop body
LE: loop exit
PB: predicated region body
PF: predicated region fallthrough
CT: control target
= control target key end

     0   :  { %7 = vsyncpa [#allocation3], 0  ;;  %s4429_s0 = inlined_call_operand.vmem [shape: f32[1024,64], index: 0, kind: input, shape index: {}]   ;;  %s4430_s1 = inlined_call_operand.hbm [shape: f32[64,384], index: 1, kind: input, shape index: {}]   ;;  %s4431_s2 = inlined_call_operand.hbm [shape: f32[1024,384], index: 2, kind: output, shape index: {}]  }
   0x1   :  { %8 = vsyncpa [#allocation4], 0  ;;  %s3227_s9 = smov [#allocation2]   ;;  %s3179_s13 = scalar_lea.hbm %s4430_s1, 3072 }
   0x2   :  { %s16_s10 = sshll.u32 %s3227_s9, 4  ;;  %p3180_p0 = scmp.ne.s32.totalorder %s4430_s1, %s3179_s13  ;;  %s17_s10 = int_to_ptr.vmem [resolvable:$true] %s16_s10 }
   0x3   :  { %p3183_p1 = scmp.lt.u32.totalorder %s3179_s13, %s4430_s1 }
   0x5   :  { %p3185_p2 = pnand %p3183_p1, %p3180_p0 }
   0x7   :  { %3188 = shalt.err (!%p3185_p2)
}
   0x8   :  { %s3189_s18 = scalar_lea.vmem %s17_s10, 3072  ;;  %p3194_p4 = scmp.lt.s32.totalorder %s17_s10, %s17_s10 }
   0x9   :  { %p3190_p3 = scmp.ne.s32.totalorder %s17_s10, %s3189_s18  ;;  %p3195_p5 = scmp.lt.s32.totalorder %s3189_s18, %s3189_s18 }
   0xb   :  { %p3196_p6 = por %p3195_p5, %p3194_p4 }
   0xd   :  { %p3197_p7 = pnand %p3196_p6, %p3190_p3 }
   0xf   :  { %3200 = shalt.err (!%p3197_p7)
}
  0x10   :  { %s3228_s19 = smov 384   ;;  %s3229_s20 = smov 24  }
  0x11   :  { %22 = dma.hbm_to_vmem [thread:$0]  %s4430_s1, 3072, %s17_s10, [#allocation3], %s3228_s19, %s3228_s19, %s3229_s20  }
  0x12   :  { %3223 = dma.done.wait [#allocation3], 3072  }
  0x13   :  { %3224 = vsyncadd [#allocation3], 4294964224  ;;  %v3230_v0 = vmov 0.0   ;;  %v155_v1 = vld [vmem:[#allocation2 + $0x8] sm:$0xff]  ;;  %v158_v2 = vld [vmem:[#allocation2 + $0x20] sm:$0xff]  ;;  %vm178_vm0 = vcmask 523264  }
  0x14   :  { %627 = vmatprep.mubr.f32.mxu0 %v3230_v0  ;;  %1203 = vmatprep.mubr.f32.mxu1 %v3230_v0  ;;  %v154_v3 = vld [vmem:[#allocation2] sm:$0xff]  ;;  %v3102_v4 = vpack.c.bf16 %v158_v2, %v155_v1  ;;  %v157_v5 = vld [vmem:[#allocation2 + $0x18] sm:$0xff]  ;;  %v164_v7 = vld [vmem:[#allocation2 + $0x50] sm:$0xff] }
  0x15   :  { %v161_v6 = vld [vmem:[#allocation2 + $0x38] sm:$0xff]  ;;  %v3104_v8 = vpack.c.bf16 %v157_v5, %v154_v3  ;;  %v160_v10 = vld [vmem:[#allocation2 + $0x30] sm:$0xff]  ;;  %v163_v11 = vld [vmem:[#allocation2 + $0x48] sm:$0xff] }
  0x16   :  { %v3106_v9 = vpack.c.bf16 %v164_v7, %v161_v6  ;;  %v167_v12 = vld [vmem:[#allocation2 + $0x68] sm:$0xff]  ;;  %3103 = vmatprep.subr.bf16.mxu0 %v3102_v4  ;;  %3134 = vmatprep.subr.bf16.mxu1 %v3102_v4  ;;  %v170_v13 = vld [vmem:[#allocation2 + $0x80] sm:$0xff]  ;;  %v3108_v14 = vpack.c.bf16 %v163_v11, %v160_v10  ;;  %v169_v17 = vld [vmem:[#allocation2 + $0x78] sm:$0xff] }
  0x17   :  { %3105 = vmatpush1.bf16.msra.mxu0 %v3104_v8  ;;  %3138 = vmatpush1.bf16.msra.mxu1 %v3104_v8  ;;  %v3110_v15 = vpack.c.bf16 %v170_v13, %v167_v12  ;;  %v166_v16 = vld [vmem:[#allocation2 + $0x60] sm:$0xff]  ;;  %v173_v18 = vld [vmem:[#allocation2 + $0x98] sm:$0xff]  ;;  %v176_v19 = vld [vmem:[#allocation2 + $0xb0] sm:$0xff] }
  0x18   :  { %3107 = vmatprep.subr.bf16.mxu0 %v3106_v9  ;;  %3135 = vmatprep.subr.bf16.mxu1 %v3106_v9  ;;  %v3112_v20 = vpack.c.bf16 %v169_v17, %v166_v16  ;;  %v3114_v21 = vpack.c.bf16 %v176_v19, %v173_v18  ;;  %v172_v22 = vld [vmem:[#allocation2 + $0x90] sm:$0xff]  ;;  %v175_v23 = vld [vmem:[#allocation2 + $0xa8] sm:$0xff]  ;;  %v162_v28 = vld [vmem:[#allocation2 + $0x40] sm:$0xff] }
  0x19   :  { %v156_v24 = vld [vmem:[#allocation2 + $0x10] sm:$0xff]  ;;  %v159_v25 = vld [vmem:[#allocation2 + $0x28] sm:$0xff]  ;;  %v3116_v26 = vpack.c.bf16 %v175_v23, %v172_v22  ;;  %v165_v29 = vld [vmem:[#allocation2 + $0x58] sm:$0xff] }
  0x1a   :  { %v3118_v27 = vpack.c.bf16 %v159_v25, %v156_v24  ;;  %v3267_v30 = vld [vmem:[%s4429_s0] sm:$0xff]  ;;  %v3122_v32 = vpack.c.bf16 %v165_v29, %v162_v28  ;;  %v168_v33 = vld [vmem:[#allocation2 + $0x70] sm:$0xff]  ;;  %v171_v34 = vld [vmem:[#allocation2 + $0x88] sm:$0xff] }
  0x1b   :  { %3109 = vmatpush1.bf16.msra.mxu0 %v3108_v14  ;;  %3139 = vmatpush1.bf16.msra.mxu1 %v3108_v14  ;;  %v122_v31 = vld [vmem:[%s4429_s0 + $0x300] sm:$0xff]  ;;  %v3279_v35 = vld [vmem:[%s4429_s0 + $0x8] sm:$0xff]  ;;  %v3126_v37 = vpack.c.bf16 %v171_v34, %v168_v33  ;;  %v3291_v38 = vld [vmem:[%s4429_s0 + $0x10] sm:$0xff] }
  0x1c   :  { %3111 = vmatprep.subr.bf16.mxu0 %v3110_v15  ;;  %3136 = vmatprep.subr.bf16.mxu1 %v3110_v15  ;;  %v123_v36 = vld [vmem:[%s4429_s0 + $0x308] sm:$0xff]  ;;  %v124_v39 = vld [vmem:[%s4429_s0 + $0x310] sm:$0xff]  ;;  %v174_v40 = vld [vmem:[#allocation2 + $0xa0] sm:$0xff] }
  0x1d   :  { %v177_v41 = vld [vmem:[#allocation2 + $0xb8] sm:$0xff]  ;;  %v3319_v45 = vld [vmem:[%s4429_s0 + $0x20] sm:$0xff]  ;;  %v3332_v47 = vld [vmem:[%s4429_s0 + $0x28] sm:$0xff] }
  0x1e   :  { %v3130_v42 = vpack.c.bf16 %v177_v41, %v174_v40  ;;  %v3306_v43 = vld [vmem:[%s4429_s0 + $0x18] sm:$0xff]  ;;  %v126_v46 = vld [vmem:[%s4429_s0 + $0x320] sm:$0xff]  ;;  %v127_v48 = vld [vmem:[%s4429_s0 + $0x328] sm:$0xff] }
  0x1f   :  { %3113 = vmatpush1.bf16.msra.mxu0 %v3112_v20  ;;  %3140 = vmatpush1.bf16.msra.mxu1 %v3112_v20  ;;  %v125_v44 = vld [vmem:[%s4429_s0 + $0x318] sm:$0xff]  ;;  %v3345_v49 = vld [vmem:[%s4429_s0 + $0x30] sm:$0xff]  ;;  %v3371_v53 = vld [vmem:[%s4429_s0 + $0x40] sm:$0xff] }
  0x20   :  { %3115 = vmatprep.subr.bf16.mxu0 %v3114_v21  ;;  %3137 = vmatprep.subr.bf16.mxu1 %v3114_v21  ;;  %v128_v50 = vld [vmem:[%s4429_s0 + $0x330] sm:$0xff]  ;;  %v3358_v51 = vld [vmem:[%s4429_s0 + $0x38] sm:$0xff]  ;;  %v130_v54 = vld [vmem:[%s4429_s0 + $0x340] sm:$0xff] }
  0x21   :  { %v129_v52 = vld [vmem:[%s4429_s0 + $0x338] sm:$0xff]  ;;  %v3384_v55 = vld [vmem:[%s4429_s0 + $0x48] sm:$0xff]  ;;  %v3397_v57 = vld [vmem:[%s4429_s0 + $0x50] sm:$0xff] }
  0x22   :  { %v131_v56 = vld [vmem:[%s4429_s0 + $0x348] sm:$0xff]  ;;  %v132_v58 = vld [vmem:[%s4429_s0 + $0x350] sm:$0xff]  ;;  %v3410_v59 = vld [vmem:[%s4429_s0 + $0x58] sm:$0xff] }
  0x23   :  { %3117 = vmatpush1.bf16.msra.mxu0 %v3116_v26  ;;  %3141 = vmatpush1.bf16.msra.mxu1 %v3116_v26  ;;  %v133_v60 = vld [vmem:[%s4429_s0 + $0x358] sm:$0xff]  ;;  %v3423_v61 = vld [vmem:[%s4429_s0 + $0x60] sm:$0xff]  ;;  %v3436_v63 = vld [vmem:[%s4429_s0 + $0x68] sm:$0xff] }
  0x24   :  { %3119 = vmatprep.subr.bf16.mxu1 %v3118_v27  ;;  %v134_v62 = vld [vmem:[%s4429_s0 + $0x360] sm:$0xff]  ;;  %v135_v1 = vld [vmem:[%s4429_s0 + $0x368] sm:$0xff]  ;;  %v3449_v2 = vld [vmem:[%s4429_s0 + $0x70] sm:$0xff] }
  0x25   :  { %v136_v3 = vld [vmem:[%s4429_s0 + $0x370] sm:$0xff]  ;;  %v3462_v4 = vld [vmem:[%s4429_s0 + $0x78] sm:$0xff]  ;;  %v3475_v6 = vld [vmem:[%s4429_s0 + $0x80] sm:$0xff] }
  0x26   :  { %2502 = vmatmul.mubr.msk.f32.vlgmr.msra.gmra.mrb[0].mxu0 %vm178_vm0, %v3267_v30  ;;  %2598 = vmatmul.mubr.msk.f32.vlgmr.msra.gmra.mrb[0].mxu1 %vm178_vm0, %v122_v31  ;;  %v137_v5 = vld [vmem:[%s4429_s0 + $0x378] sm:$0xff]  ;;  %v138_v7 = vld [vmem:[%s4429_s0 + $0x380] sm:$0xff]  ;;  %v3488_v8 = vld [vmem:[%s4429_s0 + $0x88] sm:$0xff] }
  0x27   :  { %3121 = vmatpush3.bf16.msra.mxu1 %v3118_v27  ;;  %633 = vmatprep.mubr.f32.mxu0 %v3230_v0  ;;  %v139_v9 = vld [vmem:[%s4429_s0 + $0x388] sm:$0xff]  ;;  %v3501_v10 = vld [vmem:[%s4429_s0 + $0x90] sm:$0xff]  ;;  %v3514_v12 = vld [vmem:[%s4429_s0 + $0x98] sm:$0xff] }
  0x28   :  { %1209 = vmatprep.mubr.f32.mxu1 %v3230_v0  ;;  %3123 = vmatprep.subr.bf16.mxu1 %v3122_v32  ;;  %v140_v11 = vld [vmem:[%s4429_s0 + $0x390] sm:$0xff]  ;;  %v141_v13 = vld [vmem:[%s4429_s0 + $0x398] sm:$0xff]  ;;  %v3527_v14 = vld [vmem:[%s4429_s0 + $0xa0] sm:$0xff] }
  0x29   :  { %v142_v15 = vld [vmem:[%s4429_s0 + $0x3a0] sm:$0xff]  ;;  %v3540_v16 = vld [vmem:[%s4429_s0 + $0xa8] sm:$0xff]  ;;  %v3553_v18 = vld [vmem:[%s4429_s0 + $0xb0] sm:$0xff] }
  0x2a   :  { %2503 = vmatmul.mubr.msk.f32.gmra.mrb[2].mxu0 %vm178_vm0, %v3279_v35  ;;  %2599 = vmatmul.mubr.msk.f32.gmra.mrb[2].mxu1 %vm178_vm0, %v123_v36  ;;  %v143_v17 = vld [vmem:[%s4429_s0 + $0x3a8] sm:$0xff]  ;;  %v144_v19 = vld [vmem:[%s4429_s0 + $0x3b0] sm:$0xff]  ;;  %v3566_v20 = vld [vmem:[%s4429_s0 + $0xb8] sm:$0xff] }
  0x2b   :  { %639 = vmatprep.mubr.f32.mxu0 %v3230_v0  ;;  %1215 = vmatprep.mubr.f32.mxu1 %v3230_v0  ;;  %v145_v21 = vld [vmem:[%s4429_s0 + $0x3b8] sm:$0xff]  ;;  %v3579_v22 = vld [vmem:[%s4429_s0 + $0xc0] sm:$0xff]  ;;  %v3592_v24 = vld [vmem:[%s4429_s0 + $0xc8] sm:$0xff] }
  0x2c   :  { %3125 = vmatpush3.bf16.msra.mxu1 %v3122_v32  ;;  %v146_v23 = vld [vmem:[%s4429_s0 + $0x3c0] sm:$0xff]  ;;  %v147_v25 = vld [vmem:[%s4429_s0 + $0x3c8] sm:$0xff]  ;;  %v3605_v26 = vld [vmem:[%s4429_s0 + $0xd0] sm:$0xff] }
  0x2d   :  { %3127 = vmatprep.subr.bf16.mxu1 %v3126_v37  ;;  %v148_v27 = vld [vmem:[%s4429_s0 + $0x3d0] sm:$0xff]  ;;  %v3618_v28 = vld [vmem:[%s4429_s0 + $0xd8] sm:$0xff]  ;;  %v3631_v31 = vld [vmem:[%s4429_s0 + $0xe0] sm:$0xff] }
  0x2e   :  { %2504 = vmatmul.mubr.msk.f32.gmra.mrb[4].mxu0 %vm178_vm0, %v3291_v38  ;;  %2600 = vmatmul.mubr.msk.f32.gmra.mrb[4].mxu1 %vm178_vm0, %v124_v39  ;;  %v149_v29 = vld [vmem:[%s4429_s0 + $0x3d8] sm:$0xff]  ;;  %v150_v32 = vld [vmem:[%s4429_s0 + $0x3e0] sm:$0xff]  ;;  %v3644_v33 = vld [vmem:[%s4429_s0 + $0xe8] sm:$0xff] }
  0x2f   :  { %645 = vmatprep.mubr.f32.mxu0 %v3230_v0  ;;  %1221 = vmatprep.mubr.f32.mxu1 %v3230_v0  ;;  %v151_v34 = vld [vmem:[%s4429_s0 + $0x3e8] sm:$0xff]  ;;  %v3657_v36 = vld [vmem:[%s4429_s0 + $0xf0] sm:$0xff]  ;;  %v3670_v39 = vld [vmem:[%s4429_s0 + $0xf8] sm:$0xff] }
  0x30   :  { %3129 = vmatpush3.bf16.msra.mxu1 %v3126_v37  ;;  %v152_v37 = vld [vmem:[%s4429_s0 + $0x3f0] sm:$0xff]  ;;  %v153_v40 = vld [vmem:[%s4429_s0 + $0x3f8] sm:$0xff]  ;;  %v3684_v41 = vld [vmem:[%s4429_s0 + $0x100] sm:$0xff] }
  0x31   :  { %3131 = vmatprep.subr.bf16.mxu1 %v3130_v42 }
  0x32   :  { %2505 = vmatmul.mubr.msk.f32.gmra.mrb[6].mxu0 %vm178_vm0, %v3306_v43  ;;  %2601 = vmatmul.mubr.msk.f32.gmra.mrb[6].mxu1 %vm178_vm0, %v125_v44  ;;  %v3756_v44 = vld [vmem:[%s4429_s0 + $0x130] sm:$0xff] }
  0x33   :  { %651 = vmatprep.mubr.f32.mxu0 %v3230_v0  ;;  %1227 = vmatprep.mubr.f32.mxu1 %v3230_v0 }
  0x34   :  { %3133 = vmatpush3.bf16.msra.mxu1 %v3130_v42  ;;  %v3732_v42 = vld [vmem:[%s4429_s0 + $0x120] sm:$0xff] }
  0x36   :  { %2506 = vmatmul.mubr.msk.f32.gmra.mrb[8].mxu0 %vm178_vm0, %v3319_v45  ;;  %2602 = vmatmul.mubr.msk.f32.gmra.mrb[8].mxu1 %vm178_vm0, %v126_v46  ;;  %v66_v46 = vld [vmem:[%s4429_s0 + $0x140] sm:$0xff] }
  0x37   :  { %657 = vmatprep.mubr.f32.mxu0 %v3230_v0  ;;  %1233 = vmatprep.mubr.f32.mxu1 %v3230_v0 }
  0x3a   :  { %2507 = vmatmul.mubr.msk.f32.gmra.mrb[10].mxu0 %vm178_vm0, %v3332_v47  ;;  %2603 = vmatmul.mubr.msk.f32.gmra.mrb[10].mxu1 %vm178_vm0, %v127_v48  ;;  %v68_v48 = vld [vmem:[%s4429_s0 + $0x150] sm:$0xff] }
  0x3b   :  { %663 = vmatprep.mubr.f32.mxu0 %v3230_v0  ;;  %1239 = vmatprep.mubr.f32.mxu1 %v3230_v0 }
  0x3e   :  { %2508 = vmatmul.mubr.msk.f32.gmra.mrb[12].mxu0 %vm178_vm0, %v3345_v49  ;;  %2604 = vmatmul.mubr.msk.f32.gmra.mrb[12].mxu1 %vm178_vm0, %v128_v50  ;;  %v70_v50 = vld [vmem:[%s4429_s0 + $0x160] sm:$0xff] }
  0x3f   :  { %669 = vmatprep.mubr.f32.mxu0 %v3230_v0  ;;  %1245 = vmatprep.mubr.f32.mxu1 %v3230_v0 }
  0x42   :  { %2509 = vmatmul.mubr.msk.f32.gmra.mrb[14].mxu0 %vm178_vm0, %v3358_v51  ;;  %2605 = vmatmul.mubr.msk.f32.gmra.mrb[14].mxu1 %vm178_vm0, %v129_v52  ;;  %v72_v52 = vld [vmem:[%s4429_s0 + $0x170] sm:$0xff] }
  0x43   :  { %675 = vmatprep.mubr.f32.mxu0 %v3230_v0  ;;  %1251 = vmatprep.mubr.f32.mxu1 %v3230_v0 }
  0x46   :  { %2510 = vmatmul.mubr.msk.f32.gmra.mrb[16].mxu0 %vm178_vm0, %v3371_v53  ;;  %2606 = vmatmul.mubr.msk.f32.gmra.mrb[16].mxu1 %vm178_vm0, %v130_v54  ;;  %v3852_v54 = vld [vmem:[%s4429_s0 + $0x180] sm:$0xff] }
  0x47   :  { %681 = vmatprep.mubr.f32.mxu0 %v3230_v0  ;;  %1257 = vmatprep.mubr.f32.mxu1 %v3230_v0 }
  0x4a   :  { %2511 = vmatmul.mubr.msk.f32.gmra.mrb[18].mxu0 %vm178_vm0, %v3384_v55  ;;  %2607 = vmatmul.mubr.msk.f32.gmra.mrb[18].mxu1 %vm178_vm0, %v131_v56  ;;  %v3876_v56 = vld [vmem:[%s4429_s0 + $0x190] sm:$0xff] }
  0x4b   :  { %687 = vmatprep.mubr.f32.mxu0 %v3230_v0  ;;  %1263 = vmatprep.mubr.f32.mxu1 %v3230_v0 }
  0x4e   :  { %2512 = vmatmul.mubr.msk.f32.gmra.mrb[20].mxu0 %vm178_vm0, %v3397_v57  ;;  %2608 = vmatmul.mubr.msk.f32.gmra.mrb[20].mxu1 %vm178_vm0, %v132_v58  ;;  %v3898_v58 = vld [vmem:[%s4429_s0 + $0x1a0] sm:$0xff] }
  0x4f   :  { %693 = vmatprep.mubr.f32.mxu0 %v3230_v0  ;;  %1269 = vmatprep.mubr.f32.mxu1 %v3230_v0 }
  0x52   :  { %2513 = vmatmul.mubr.msk.f32.gmra.mrb[22].mxu0 %vm178_vm0, %v3410_v59  ;;  %2609 = vmatmul.mubr.msk.f32.gmra.mrb[22].mxu1 %vm178_vm0, %v133_v60 }
  0x53   :  { %699 = vmatprep.mubr.f32.mxu0 %v3230_v0  ;;  %1275 = vmatprep.mubr.f32.mxu1 %v3230_v0 }
  0x56   :  { %2514 = vmatmul.mubr.msk.f32.gmra.mrb[24].mxu0 %vm178_vm0, %v3423_v61  ;;  %2610 = vmatmul.mubr.msk.f32.gmra.mrb[24].mxu1 %vm178_vm0, %v134_v62 }
  0x57   :  { %705 = vmatprep.mubr.f32.mxu0 %v3230_v0  ;;  %1281 = vmatprep.mubr.f32.mxu1 %v3230_v0 }
  0x5a   :  { %2515 = vmatmul.mubr.msk.f32.gmra.mrb[26].mxu0 %vm178_vm0, %v3436_v63  ;;  %2611 = vmatmul.mubr.msk.f32.gmra.mrb[26].mxu1 %vm178_vm0, %v135_v1  ;;  %v3918_v1 = vld [vmem:[%s4429_s0 + $0x1b0] sm:$0xff] }
  0x5b   :  { %711 = vmatprep.mubr.f32.mxu0 %v3230_v0  ;;  %1287 = vmatprep.mubr.f32.mxu1 %v3230_v0 }
  0x5e   :  { %2516 = vmatmul.mubr.msk.f32.gmra.mrb[28].mxu0 %vm178_vm0, %v3449_v2  ;;  %2612 = vmatmul.mubr.msk.f32.gmra.mrb[28].mxu1 %vm178_vm0, %v136_v3 }
  0x5f   :  { %717 = vmatprep.mubr.f32.mxu0 %v3230_v0  ;;  %1293 = vmatprep.mubr.f32.mxu1 %v3230_v0 }
  0x62   :  { %2517 = vmatmul.mubr.msk.f32.gmra.mrb[30].mxu0 %vm178_vm0, %v3462_v4  ;;  %2613 = vmatmul.mubr.msk.f32.gmra.mrb[30].mxu1 %vm178_vm0, %v137_v5 }
  0x63   :  { %723 = vmatprep.mubr.f32.mxu0 %v3230_v0  ;;  %1299 = vmatprep.mubr.f32.mxu1 %v3230_v0 }
  0x66   :  { %2518 = vmatmul.mubr.msk.f32.gmra.mrb[32].mxu0 %vm178_vm0, %v3475_v6  ;;  %2614 = vmatmul.mubr.msk.f32.gmra.mrb[32].mxu1 %vm178_vm0, %v138_v7 }
  0x67   :  { %729 = vmatprep.mubr.f32.mxu0 %v3230_v0  ;;  %1305 = vmatprep.mubr.f32.mxu1 %v3230_v0 }
  0x6a   :  { %2519 = vmatmul.mubr.msk.f32.gmra.mrb[34].mxu0 %vm178_vm0, %v3488_v8  ;;  %2615 = vmatmul.mubr.msk.f32.gmra.mrb[34].mxu1 %vm178_vm0, %v139_v9 }
  0x6b   :  { %735 = vmatprep.mubr.f32.mxu0 %v3230_v0  ;;  %1311 = vmatprep.mubr.f32.mxu1 %v3230_v0 }
  0x6e   :  { %2520 = vmatmul.mubr.msk.f32.gmra.mrb[36].mxu0 %vm178_vm0, %v3501_v10  ;;  %2616 = vmatmul.mubr.msk.f32.gmra.mrb[36].mxu1 %vm178_vm0, %v140_v11  ;;  %v82_v11 = vld [vmem:[%s4429_s0 + $0x1c0] sm:$0xff] }
  0x6f   :  { %741 = vmatprep.mubr.f32.mxu0 %v3230_v0  ;;  %1317 = vmatprep.mubr.f32.mxu1 %v3230_v0 }
  0x72   :  { %2521 = vmatmul.mubr.msk.f32.gmra.mrb[38].mxu0 %vm178_vm0, %v3514_v12  ;;  %2617 = vmatmul.mubr.msk.f32.gmra.mrb[38].mxu1 %vm178_vm0, %v141_v13 }
  0x73   :  { %747 = vmatprep.mubr.f32.mxu0 %v3230_v0  ;;  %1323 = vmatprep.mubr.f32.mxu1 %v3230_v0 }
  0x76   :  { %2522 = vmatmul.mubr.msk.f32.gmra.mrb[40].mxu0 %vm178_vm0, %v3527_v14  ;;  %2618 = vmatmul.mubr.msk.f32.gmra.mrb[40].mxu1 %vm178_vm0, %v142_v15 }
  0x77   :  { %753 = vmatprep.mubr.f32.mxu0 %v3230_v0  ;;  %1329 = vmatprep.mubr.f32.mxu1 %v3230_v0 }
  0x7a   :  { %2523 = vmatmul.mubr.msk.f32.gmra.mrb[42].mxu0 %vm178_vm0, %v3540_v16  ;;  %2619 = vmatmul.mubr.msk.f32.gmra.mrb[42].mxu1 %vm178_vm0, %v143_v17 }
  0x7b   :  { %759 = vmatprep.mubr.f32.mxu0 %v3230_v0  ;;  %1335 = vmatprep.mubr.f32.mxu1 %v3230_v0 }
  0x7e   :  { %2524 = vmatmul.mubr.msk.f32.gmra.mrb[44].mxu0 %vm178_vm0, %v3553_v18  ;;  %2620 = vmatmul.mubr.msk.f32.gmra.mrb[44].mxu1 %vm178_vm0, %v144_v19 }
  0x7f   :  { %765 = vmatprep.mubr.f32.mxu0 %v3230_v0  ;;  %1341 = vmatprep.mubr.f32.mxu1 %v3230_v0 }
  0x82   :  { %2525 = vmatmul.mubr.msk.f32.gmra.mrb[46].mxu0 %vm178_vm0, %v3566_v20  ;;  %2621 = vmatmul.mubr.msk.f32.gmra.mrb[46].mxu1 %vm178_vm0, %v145_v21  ;;  %v84_v21 = vld [vmem:[%s4429_s0 + $0x1d0] sm:$0xff] }
  0x83   :  { %771 = vmatprep.mubr.f32.mxu0 %v3230_v0  ;;  %1347 = vmatprep.mubr.f32.mxu1 %v3230_v0 }
  0x86   :  { %2526 = vmatmul.mubr.msk.f32.gmra.mrb[48].mxu0 %vm178_vm0, %v3579_v22  ;;  %2622 = vmatmul.mubr.msk.f32.gmra.mrb[48].mxu1 %vm178_vm0, %v146_v23 }
  0x87   :  { %777 = vmatprep.mubr.f32.mxu0 %v3230_v0  ;;  %1353 = vmatprep.mubr.f32.mxu1 %v3230_v0 }
  0x8a   :  { %2527 = vmatmul.mubr.msk.f32.gmra.mrb[50].mxu0 %vm178_vm0, %v3592_v24  ;;  %2623 = vmatmul.mubr.msk.f32.gmra.mrb[50].mxu1 %vm178_vm0, %v147_v25 }
  0x8b   :  { %783 = vmatprep.mubr.f32.mxu0 %v3230_v0  ;;  %1359 = vmatprep.mubr.f32.mxu1 %v3230_v0 }
  0x8e   :  { %2528 = vmatmul.mubr.msk.f32.gmra.mrb[52].mxu0 %vm178_vm0, %v3605_v26  ;;  %2624 = vmatmul.mubr.msk.f32.gmra.mrb[52].mxu1 %vm178_vm0, %v148_v27 }
  0x8f   :  { %789 = vmatprep.mubr.f32.mxu0 %v3230_v0  ;;  %1365 = vmatprep.mubr.f32.mxu1 %v3230_v0 }
  0x92   :  { %2529 = vmatmul.mubr.msk.f32.gmra.mrb[54].mxu0 %vm178_vm0, %v3618_v28  ;;  %2625 = vmatmul.mubr.msk.f32.gmra.mrb[54].mxu1 %vm178_vm0, %v149_v29 }
  0x93   :  { %795 = vmatprep.mubr.f32.mxu0 %v3230_v0  ;;  %1371 = vmatprep.mubr.f32.mxu1 %v3230_v0 }
  0x96   :  { %2530 = vmatmul.mubr.msk.f32.gmra.mrb[56].mxu0 %vm178_vm0, %v3631_v31  ;;  %2626 = vmatmul.mubr.msk.f32.gmra.mrb[56].mxu1 %vm178_vm0, %v150_v32  ;;  %v86_v32 = vld [vmem:[%s4429_s0 + $0x1e0] sm:$0xff] }
  0x97   :  { %801 = vmatprep.mubr.f32.mxu0 %v3230_v0  ;;  %1377 = vmatprep.mubr.f32.mxu1 %v3230_v0 }
  0x9a   :  { %2531 = vmatmul.mubr.msk.f32.gmra.mrb[58].mxu0 %vm178_vm0, %v3644_v33  ;;  %2627 = vmatmul.mubr.msk.f32.gmra.mrb[58].mxu1 %vm178_vm0, %v151_v34 }
  0x9b   :  { %807 = vmatprep.mubr.f32.mxu0 %v3230_v0  ;;  %1383 = vmatprep.mubr.f32.mxu1 %v3230_v0 }
  0x9e   :  { %2532 = vmatmul.mubr.msk.f32.gmra.mrb[60].mxu0 %vm178_vm0, %v3657_v36  ;;  %2628 = vmatmul.mubr.msk.f32.gmra.mrb[60].mxu1 %vm178_vm0, %v152_v37 }
  0x9f   :  { %813 = vmatprep.mubr.f32.mxu0 %v3230_v0  ;;  %1389 = vmatprep.mubr.f32.mxu1 %v3230_v0 }
  0xa2   :  { %2533 = vmatmul.mubr.msk.f32.gmra.mrb[62].mxu0 %vm178_vm0, %v3670_v39  ;;  %2629 = vmatmul.mubr.msk.f32.gmra.mrb[62].mxu1 %vm178_vm0, %v153_v40 }
  0xa3   :  { %819 = vmatprep.mubr.f32.mxu0 %v3230_v0  ;;  %2910 = vmatprep.mubr.msk.f32.mxu1 %vm178_vm0, %v3267_v30  ;;  %v3696_v30 = vld [vmem:[%s4429_s0 + $0x108] sm:$0xff] }
  0xa6   :  { %2534 = vmatmul.mubr.msk.f32.gmra.mrb[64].mxu0 %vm178_vm0, %v3684_v41  ;;  %2911 = vmatmul.mubr.msk.f32.vlgmr.msra.gmra.mrb[64].mxu1 %vm178_vm0, %v3279_v35  ;;  %v3708_v35 = vld [vmem:[%s4429_s0 + $0x110] sm:$0xff] }
  0xa7   :  { %825 = vmatprep.mubr.f32.mxu0 %v3230_v0  ;;  %2913 = vmatprep.mubr.msk.f32.mxu1 %vm178_vm0, %v3291_v38  ;;  %v3720_v38 = vld [vmem:[%s4429_s0 + $0x118] sm:$0xff] }
  0xaa   :  { %2535 = vmatmul.mubr.msk.f32.gmra.mrb[66].mxu0 %vm178_vm0, %v3696_v30  ;;  %2914 = vmatmul.mubr.msk.f32.gmra.mrb[66].mxu1 %vm178_vm0, %v3306_v43  ;;  %v3744_v43 = vld [vmem:[%s4429_s0 + $0x128] sm:$0xff] }
  0xab   :  { %831 = vmatprep.mubr.f32.mxu0 %v3230_v0  ;;  %2916 = vmatprep.mubr.msk.f32.mxu1 %vm178_vm0, %v3319_v45  ;;  %v65_v45 = vld [vmem:[%s4429_s0 + $0x138] sm:$0xff] }
  0xae   :  { %2536 = vmatmul.mubr.msk.f32.gmra.mrb[68].mxu0 %vm178_vm0, %v3708_v35  ;;  %2917 = vmatmul.mubr.msk.f32.gmra.mrb[68].mxu1 %vm178_vm0, %v3332_v47  ;;  %v67_v47 = vld [vmem:[%s4429_s0 + $0x148] sm:$0xff] }
  0xaf   :  { %837 = vmatprep.mubr.f32.mxu0 %v3230_v0  ;;  %2919 = vmatprep.mubr.msk.f32.mxu1 %vm178_vm0, %v3345_v49  ;;  %v69_v49 = vld [vmem:[%s4429_s0 + $0x158] sm:$0xff] }
  0xb2   :  { %2537 = vmatmul.mubr.msk.f32.gmra.mrb[70].mxu0 %vm178_vm0, %v3720_v38  ;;  %2920 = vmatmul.mubr.msk.f32.gmra.mrb[70].mxu1 %vm178_vm0, %v3358_v51  ;;  %v71_v51 = vld [vmem:[%s4429_s0 + $0x168] sm:$0xff] }
  0xb3   :  { %843 = vmatprep.mubr.f32.mxu0 %v3230_v0  ;;  %2922 = vmatprep.mubr.msk.f32.mxu1 %vm178_vm0, %v3371_v53  ;;  %v3840_v53 = vld [vmem:[%s4429_s0 + $0x178] sm:$0xff] }
  0xb6   :  { %2538 = vmatmul.mubr.msk.f32.gmra.mrb[72].mxu0 %vm178_vm0, %v3732_v42  ;;  %2923 = vmatmul.mubr.msk.f32.gmra.mrb[72].mxu1 %vm178_vm0, %v3384_v55  ;;  %v3864_v55 = vld [vmem:[%s4429_s0 + $0x188] sm:$0xff] }
  0xb7   :  { %849 = vmatprep.mubr.f32.mxu0 %v3230_v0  ;;  %2925 = vmatprep.mubr.msk.f32.mxu1 %vm178_vm0, %v3397_v57  ;;  %v3888_v57 = vld [vmem:[%s4429_s0 + $0x198] sm:$0xff] }
  0xba   :  { %2539 = vmatmul.mubr.msk.f32.gmra.mrb[74].mxu0 %vm178_vm0, %v3744_v43  ;;  %2926 = vmatmul.mubr.msk.f32.gmra.mrb[74].mxu1 %vm178_vm0, %v3410_v59  ;;  %v3908_v59 = vld [vmem:[%s4429_s0 + $0x1a8] sm:$0xff] }
  0xbb   :  { %855 = vmatprep.mubr.f32.mxu0 %v3230_v0  ;;  %2928 = vmatprep.mubr.msk.f32.mxu1 %vm178_vm0, %v3423_v61 }
  0xbe   :  { %2540 = vmatmul.mubr.msk.f32.gmra.mrb[76].mxu0 %vm178_vm0, %v3756_v44  ;;  %2929 = vmatmul.mubr.msk.f32.gmra.mrb[76].mxu1 %vm178_vm0, %v3436_v63 }
  0xbf   :  { %861 = vmatprep.mubr.f32.mxu0 %v3230_v0  ;;  %2931 = vmatprep.mubr.msk.f32.mxu1 %vm178_vm0, %v3449_v2 }
  0xc2   :  { %2541 = vmatmul.mubr.msk.f32.gmra.mrb[78].mxu0 %vm178_vm0, %v65_v45  ;;  %2932 = vmatmul.mubr.msk.f32.gmra.mrb[78].mxu1 %vm178_vm0, %v3462_v4 }
  0xc3   :  { %867 = vmatprep.mubr.f32.mxu0 %v3230_v0  ;;  %2934 = vmatprep.mubr.msk.f32.mxu1 %vm178_vm0, %v3475_v6  ;;  %v81_v6 = vld [vmem:[%s4429_s0 + $0x1b8] sm:$0xff] }
  0xc6   :  { %2542 = vmatmul.mubr.msk.f32.gmra.mrb[80].mxu0 %vm178_vm0, %v66_v46  ;;  %2935 = vmatmul.mubr.msk.f32.gmra.mrb[80].mxu1 %vm178_vm0, %v3488_v8 }
  0xc7   :  { %873 = vmatprep.mubr.f32.mxu0 %v3230_v0  ;;  %2937 = vmatprep.mubr.msk.f32.mxu1 %vm178_vm0, %v3501_v10 }
  0xca   :  { %2543 = vmatmul.mubr.msk.f32.gmra.mrb[82].mxu0 %vm178_vm0, %v67_v47  ;;  %2938 = vmatmul.mubr.msk.f32.gmra.mrb[82].mxu1 %vm178_vm0, %v3514_v12 }
  0xcb   :  { %879 = vmatprep.mubr.f32.mxu0 %v3230_v0  ;;  %2940 = vmatprep.mubr.msk.f32.mxu1 %vm178_vm0, %v3527_v14 }
  0xce   :  { %2544 = vmatmul.mubr.msk.f32.gmra.mrb[84].mxu0 %vm178_vm0, %v68_v48  ;;  %2941 = vmatmul.mubr.msk.f32.gmra.mrb[84].mxu1 %vm178_vm0, %v3540_v16  ;;  %v83_v16 = vld [vmem:[%s4429_s0 + $0x1c8] sm:$0xff] }
  0xcf   :  { %885 = vmatprep.mubr.f32.mxu0 %v3230_v0  ;;  %2943 = vmatprep.mubr.msk.f32.mxu1 %vm178_vm0, %v3553_v18 }
  0xd2   :  { %2545 = vmatmul.mubr.msk.f32.gmra.mrb[86].mxu0 %vm178_vm0, %v69_v49  ;;  %2944 = vmatmul.mubr.msk.f32.gmra.mrb[86].mxu1 %vm178_vm0, %v3566_v20 }
  0xd3   :  { %891 = vmatprep.mubr.f32.mxu0 %v3230_v0  ;;  %2946 = vmatprep.mubr.msk.f32.mxu1 %vm178_vm0, %v3579_v22 }
  0xd6   :  { %2546 = vmatmul.mubr.msk.f32.gmra.mrb[88].mxu0 %vm178_vm0, %v70_v50  ;;  %2947 = vmatmul.mubr.msk.f32.gmra.mrb[88].mxu1 %vm178_vm0, %v3592_v24 }
  0xd7   :  { %897 = vmatprep.mubr.f32.mxu0 %v3230_v0  ;;  %2949 = vmatprep.mubr.msk.f32.mxu1 %vm178_vm0, %v3605_v26  ;;  %v85_v26 = vld [vmem:[%s4429_s0 + $0x1d8] sm:$0xff] }
  0xda   :  { %2547 = vmatmul.mubr.msk.f32.gmra.mrb[90].mxu0 %vm178_vm0, %v71_v51  ;;  %2950 = vmatmul.mubr.msk.f32.gmra.mrb[90].mxu1 %vm178_vm0, %v3618_v28 }
  0xdb   :  { %903 = vmatprep.mubr.f32.mxu0 %v3230_v0  ;;  %2952 = vmatprep.mubr.msk.f32.mxu1 %vm178_vm0, %v3631_v31 }
  0xde   :  { %2548 = vmatmul.mubr.msk.f32.gmra.mrb[92].mxu0 %vm178_vm0, %v72_v52  ;;  %2953 = vmatmul.mubr.msk.f32.gmra.mrb[92].mxu1 %vm178_vm0, %v3644_v33 }
  0xdf   :  { %909 = vmatprep.mubr.f32.mxu0 %v3230_v0  ;;  %2955 = vmatprep.mubr.msk.f32.mxu1 %vm178_vm0, %v3657_v36 }
  0xe2   :  { %2549 = vmatmul.mubr.msk.f32.gmra.mrb[94].mxu0 %vm178_vm0, %v3840_v53  ;;  %2956 = vmatmul.mubr.msk.f32.gmra.mrb[94].mxu1 %vm178_vm0, %v3670_v39  ;;  %v87_v39 = vld [vmem:[%s4429_s0 + $0x1e8] sm:$0xff] }
  0xe3   :  { %915 = vmatprep.mubr.f32.mxu0 %v3230_v0  ;;  %2958 = vmatprep.mubr.msk.f32.mxu1 %vm178_vm0, %v3684_v41 }
  0xe6   :  { %2550 = vmatmul.mubr.msk.f32.gmra.mrb[96].mxu0 %vm178_vm0, %v3852_v54  ;;  %2959 = vmatmul.mubr.msk.f32.gmra.mrb[96].mxu1 %vm178_vm0, %v3696_v30 }
  0xe7   :  { %921 = vmatprep.mubr.f32.mxu0 %v3230_v0  ;;  %2961 = vmatprep.mubr.msk.f32.mxu1 %vm178_vm0, %v3708_v35 }
  0xea   :  { %2551 = vmatmul.mubr.msk.f32.gmra.mrb[98].mxu0 %vm178_vm0, %v3864_v55  ;;  %2962 = vmatmul.mubr.msk.f32.gmra.mrb[98].mxu1 %vm178_vm0, %v3720_v38  ;;  %v88_v38 = vld [vmem:[%s4429_s0 + $0x1f0] sm:$0xff] }
  0xeb   :  { %927 = vmatprep.mubr.f32.mxu0 %v3230_v0  ;;  %2964 = vmatprep.mubr.msk.f32.mxu1 %vm178_vm0, %v3732_v42 }
  0xee   :  { %2552 = vmatmul.mubr.msk.f32.gmra.mrb[100].mxu0 %vm178_vm0, %v3876_v56  ;;  %2965 = vmatmul.mubr.msk.f32.gmra.mrb[100].mxu1 %vm178_vm0, %v3744_v43 }
  0xef   :  { %933 = vmatprep.mubr.f32.mxu0 %v3230_v0  ;;  %2967 = vmatprep.mubr.msk.f32.mxu1 %vm178_vm0, %v3756_v44 }
  0xf2   :  { %2553 = vmatmul.mubr.msk.f32.gmra.mrb[102].mxu0 %vm178_vm0, %v3888_v57  ;;  %2968 = vmatmul.mubr.msk.f32.gmra.mrb[102].mxu1 %vm178_vm0, %v65_v45 }
  0xf3   :  { %939 = vmatprep.mubr.f32.mxu0 %v3230_v0  ;;  %2970 = vmatprep.mubr.msk.f32.mxu1 %vm178_vm0, %v66_v46  ;;  %v89_v46 = vld [vmem:[%s4429_s0 + $0x1f8] sm:$0xff] }
  0xf6   :  { %2554 = vmatmul.mubr.msk.f32.gmra.mrb[104].mxu0 %vm178_vm0, %v3898_v58  ;;  %2971 = vmatmul.mubr.msk.f32.gmra.mrb[104].mxu1 %vm178_vm0, %v67_v47  ;;  %v90_v47 = vld [vmem:[%s4429_s0 + $0x200] sm:$0xff] }
  0xf7   :  { %945 = vmatprep.mubr.f32.mxu0 %v3230_v0  ;;  %2973 = vmatprep.mubr.msk.f32.mxu1 %vm178_vm0, %v68_v48 }
  0xf9   :  { %v629_v60 = vpop.f32.mrb[0].mxu0  ;;  %v1205_v61 = vpop.f32.mrb[0].mxu1 }
  0xfa   :  { %2101 = vst [vmem:[#allocation5] sm:$0xff] %v629_v60  ;;  %2389 = vst [vmem:[#allocation5 + $0x900] sm:$0xff] %v1205_v61  ;;  %v631_v62 = vpop.f32.mrb[1].mxu0  ;;  %2555 = vmatmul.mubr.msk.f32.gmra.mrb[106].mxu0 %vm178_vm0, %v3908_v59  ;;  %v1207_v63 = vpop.f32.mrb[1].mxu1  ;;  %2974 = vmatmul.mubr.msk.f32.gmra.mrb[106].mxu1 %vm178_vm0, %v69_v49 }
  0xfb   :  { %2102 = vst [vmem:[#allocation5 + $0x8] sm:$0xff] %v631_v62  ;;  %2390 = vst [vmem:[#allocation5 + $0x908] sm:$0xff] %v1207_v63  ;;  %951 = vmatprep.mubr.f32.mxu0 %v3230_v0  ;;  %2976 = vmatprep.mubr.msk.f32.mxu1 %vm178_vm0, %v70_v50 }
  0xfd   :  { %v635_v2 = vpop.f32.mrb[2].mxu0  ;;  %v1211_v3 = vpop.f32.mrb[2].mxu1 }
  0xfe   :  { %2104 = vst [vmem:[#allocation5 + $0x18] sm:$0xff] %v635_v2  ;;  %2392 = vst [vmem:[#allocation5 + $0x918] sm:$0xff] %v1211_v3  ;;  %v637_v4 = vpop.f32.mrb[3].mxu0  ;;  %2556 = vmatmul.mubr.msk.f32.gmra.mrb[108].mxu0 %vm178_vm0, %v3918_v1  ;;  %v1213_v5 = vpop.f32.mrb[3].mxu1  ;;  %2977 = vmatmul.mubr.msk.f32.gmra.mrb[108].mxu1 %vm178_vm0, %v71_v51  ;;  %v96_v2 = vld [vmem:[%s4429_s0 + $0x230] sm:$0xff] }
  0xff   :  { %2105 = vst [vmem:[#allocation5 + $0x20] sm:$0xff] %v637_v4  ;;  %2393 = vst [vmem:[#allocation5 + $0x920] sm:$0xff] %v1213_v5  ;;  %957 = vmatprep.mubr.f32.mxu0 %v3230_v0  ;;  %2979 = vmatprep.mubr.msk.f32.mxu1 %vm178_vm0, %v72_v52  ;;  %v91_v52 = vld [vmem:[%s4429_s0 + $0x208] sm:$0xff] }
 0x101   :  { %v641_v7 = vpop.f32.mrb[4].mxu0  ;;  %v1217_v8 = vpop.f32.mrb[4].mxu1 }
 0x102   :  { %2107 = vst [vmem:[#allocation5 + $0x30] sm:$0xff] %v641_v7  ;;  %2395 = vst [vmem:[#allocation5 + $0x930] sm:$0xff] %v1217_v8  ;;  %v643_v9 = vpop.f32.mrb[5].mxu0  ;;  %2557 = vmatmul.mubr.msk.f32.gmra.mrb[110].mxu0 %vm178_vm0, %v81_v6  ;;  %v1219_v10 = vpop.f32.mrb[5].mxu1  ;;  %2980 = vmatmul.mubr.msk.f32.gmra.mrb[110].mxu1 %vm178_vm0, %v3840_v53  ;;  %v92_v53 = vld [vmem:[%s4429_s0 + $0x210] sm:$0xff]  ;;  %v4032_v7 = vld [vmem:[%s4429_s0 + $0x238] sm:$0xff] }
 0x103   :  { %2108 = vst [vmem:[#allocation5 + $0x38] sm:$0xff] %v643_v9  ;;  %2396 = vst [vmem:[#allocation5 + $0x938] sm:$0xff] %v1219_v10  ;;  %963 = vmatprep.mubr.f32.mxu0 %v3230_v0  ;;  %2982 = vmatprep.mubr.msk.f32.mxu1 %vm178_vm0, %v3852_v54  ;;  %v4037_v8 = vld [vmem:[%s4429_s0 + $0x240] sm:$0xff] }
 0x105   :  { %v647_v12 = vpop.f32.mrb[6].mxu0  ;;  %v1223_v13 = vpop.f32.mrb[6].mxu1 }
 0x106   :  { %2110 = vst [vmem:[#allocation5 + $0x48] sm:$0xff] %v647_v12  ;;  %2398 = vst [vmem:[#allocation5 + $0x948] sm:$0xff] %v1223_v13  ;;  %v649_v14 = vpop.f32.mrb[7].mxu0  ;;  %2558 = vmatmul.mubr.msk.f32.gmra.mrb[112].mxu0 %vm178_vm0, %v82_v11  ;;  %v1225_v15 = vpop.f32.mrb[7].mxu1  ;;  %2983 = vmatmul.mubr.msk.f32.gmra.mrb[112].mxu1 %vm178_vm0, %v3864_v55  ;;  %v4048_v13 = vld [vmem:[%s4429_s0 + $0x248] sm:$0xff] }
 0x107   :  { %2111 = vst [vmem:[#allocation5 + $0x50] sm:$0xff] %v649_v14  ;;  %2399 = vst [vmem:[#allocation5 + $0x950] sm:$0xff] %v1225_v15  ;;  %969 = vmatprep.mubr.f32.mxu0 %v3230_v0  ;;  %2985 = vmatprep.mubr.msk.f32.mxu1 %vm178_vm0, %v3876_v56  ;;  %v4053_v14 = vld [vmem:[%s4429_s0 + $0x250] sm:$0xff] }
 0x109   :  { %v653_v17 = vpop.f32.mrb[8].mxu0  ;;  %v1229_v18 = vpop.f32.mrb[8].mxu1 }
 0x10a   :  { %2113 = vst [vmem:[#allocation5 + $0x60] sm:$0xff] %v653_v17  ;;  %2401 = vst [vmem:[#allocation5 + $0x960] sm:$0xff] %v1229_v18  ;;  %v655_v19 = vpop.f32.mrb[9].mxu0  ;;  %2559 = vmatmul.mubr.msk.f32.gmra.mrb[114].mxu0 %vm178_vm0, %v83_v16  ;;  %v1231_v20 = vpop.f32.mrb[9].mxu1  ;;  %2986 = vmatmul.mubr.msk.f32.gmra.mrb[114].mxu1 %vm178_vm0, %v3888_v57 }
 0x10b   :  { %2114 = vst [vmem:[#allocation5 + $0x68] sm:$0xff] %v655_v19  ;;  %2402 = vst [vmem:[#allocation5 + $0x968] sm:$0xff] %v1231_v20  ;;  %975 = vmatprep.mubr.f32.mxu0 %v3230_v0  ;;  %2988 = vmatprep.mubr.msk.f32.mxu1 %vm178_vm0, %v3898_v58  ;;  %v93_v58 = vld [vmem:[%s4429_s0 + $0x218] sm:$0xff]  ;;  %v4069_v20 = vld [vmem:[%s4429_s0 + $0x260] sm:$0xff] }
 0x10c   :  { %v4064_v19 = vld [vmem:[%s4429_s0 + $0x258] sm:$0xff] }
 0x10d   :  { %v659_v22 = vpop.f32.mrb[10].mxu0  ;;  %v1235_v23 = vpop.f32.mrb[10].mxu1 }
 0x10e   :  { %2116 = vst [vmem:[#allocation5 + $0x78] sm:$0xff] %v659_v22  ;;  %2404 = vst [vmem:[#allocation5 + $0x978] sm:$0xff] %v1235_v23  ;;  %v661_v24 = vpop.f32.mrb[11].mxu0  ;;  %2560 = vmatmul.mubr.msk.f32.gmra.mrb[116].mxu0 %vm178_vm0, %v84_v21  ;;  %v1237_v25 = vpop.f32.mrb[11].mxu1  ;;  %2989 = vmatmul.mubr.msk.f32.gmra.mrb[116].mxu1 %vm178_vm0, %v3908_v59  ;;  %v94_v59 = vld [vmem:[%s4429_s0 + $0x220] sm:$0xff] }
 0x10f   :  { %2117 = vst [vmem:[#allocation5 + $0x80] sm:$0xff] %v661_v24  ;;  %2405 = vst [vmem:[#allocation5 + $0x980] sm:$0xff] %v1237_v25  ;;  %981 = vmatprep.mubr.f32.mxu0 %v3230_v0  ;;  %2991 = vmatprep.mubr.msk.f32.mxu1 %vm178_vm0, %v3918_v1  ;;  %v95_v1 = vld [vmem:[%s4429_s0 + $0x228] sm:$0xff] }
 0x110   :  { %v4080_v25 = vld [vmem:[%s4429_s0 + $0x268] sm:$0xff] }
 0x111   :  { %v665_v27 = vpop.f32.mrb[12].mxu0  ;;  %v1241_v28 = vpop.f32.mrb[12].mxu1 }
 0x112   :  { %2119 = vst [vmem:[#allocation5 + $0x90] sm:$0xff] %v665_v27  ;;  %2407 = vst [vmem:[#allocation5 + $0x990] sm:$0xff] %v1241_v28  ;;  %v667_v29 = vpop.f32.mrb[13].mxu0  ;;  %2561 = vmatmul.mubr.msk.f32.gmra.mrb[118].mxu0 %vm178_vm0, %v85_v26  ;;  %v1243_v31 = vpop.f32.mrb[13].mxu1  ;;  %2992 = vmatmul.mubr.msk.f32.gmra.mrb[118].mxu1 %vm178_vm0, %v81_v6 }
 0x113   :  { %2120 = vst [vmem:[#allocation5 + $0x98] sm:$0xff] %v667_v29  ;;  %2408 = vst [vmem:[#allocation5 + $0x998] sm:$0xff] %v1243_v31  ;;  %987 = vmatprep.mubr.f32.mxu0 %v3230_v0  ;;  %2994 = vmatprep.mubr.msk.f32.mxu1 %vm178_vm0, %v82_v11 }
 0x115   :  { %v671_v33 = vpop.f32.mrb[14].mxu0  ;;  %v1247_v34 = vpop.f32.mrb[14].mxu1 }
 0x116   :  { %2122 = vst [vmem:[#allocation5 + $0xa8] sm:$0xff] %v671_v33  ;;  %2410 = vst [vmem:[#allocation5 + $0x9a8] sm:$0xff] %v1247_v34  ;;  %v673_v36 = vpop.f32.mrb[15].mxu0  ;;  %2562 = vmatmul.mubr.msk.f32.gmra.mrb[120].mxu0 %vm178_vm0, %v86_v32  ;;  %v1249_v37 = vpop.f32.mrb[15].mxu1  ;;  %2995 = vmatmul.mubr.msk.f32.gmra.mrb[120].mxu1 %vm178_vm0, %v83_v16  ;;  %v4101_v33 = vld [vmem:[%s4429_s0 + $0x280] sm:$0xff] }
 0x117   :  { %2123 = vst [vmem:[#allocation5 + $0xb0] sm:$0xff] %v673_v36  ;;  %2411 = vst [vmem:[#allocation5 + $0x9b0] sm:$0xff] %v1249_v37  ;;  %993 = vmatprep.mubr.f32.mxu0 %v3230_v0  ;;  %2997 = vmatprep.mubr.msk.f32.mxu1 %vm178_vm0, %v84_v21 }
 0x119   :  { %v677_v40 = vpop.f32.mrb[16].mxu0  ;;  %v1253_v41 = vpop.f32.mrb[16].mxu1 }
 0x11a   :  { %2125 = vst [vmem:[#allocation5 + $0xc0] sm:$0xff] %v677_v40  ;;  %2413 = vst [vmem:[#allocation5 + $0x9c0] sm:$0xff] %v1253_v41  ;;  %v679_v30 = vpop.f32.mrb[17].mxu0  ;;  %2563 = vmatmul.mubr.msk.f32.gmra.mrb[122].mxu0 %vm178_vm0, %v87_v39  ;;  %v1255_v35 = vpop.f32.mrb[17].mxu1  ;;  %2998 = vmatmul.mubr.msk.f32.gmra.mrb[122].mxu1 %vm178_vm0, %v85_v26  ;;  %v4085_v26 = vld [vmem:[%s4429_s0 + $0x270] sm:$0xff]  ;;  %v4113_v40 = vld [vmem:[%s4429_s0 + $0x288] sm:$0xff] }
 0x11b   :  { %2126 = vst [vmem:[#allocation5 + $0xc8] sm:$0xff] %v679_v30  ;;  %2414 = vst [vmem:[#allocation5 + $0x9c8] sm:$0xff] %v1255_v35  ;;  %999 = vmatprep.mubr.f32.mxu0 %v3230_v0  ;;  %3000 = vmatprep.mubr.msk.f32.mxu1 %vm178_vm0, %v86_v32  ;;  %v4096_v32 = vld [vmem:[%s4429_s0 + $0x278] sm:$0xff]  ;;  %v4118_v41 = vld [vmem:[%s4429_s0 + $0x290] sm:$0xff] }
 0x11d   :  { %v683_v42 = vpop.f32.mrb[18].mxu0  ;;  %v1259_v43 = vpop.f32.mrb[18].mxu1 }
 0x11e   :  { %2128 = vst [vmem:[#allocation5 + $0xd8] sm:$0xff] %v683_v42  ;;  %2416 = vst [vmem:[#allocation5 + $0x9d8] sm:$0xff] %v1259_v43  ;;  %v685_v44 = vpop.f32.mrb[19].mxu0  ;;  %2564 = vmatmul.mubr.msk.f32.gmra.mrb[124].mxu0 %vm178_vm0, %v88_v38  ;;  %v1261_v45 = vpop.f32.mrb[19].mxu1  ;;  %3001 = vmatmul.mubr.msk.f32.gmra.mrb[124].mxu1 %vm178_vm0, %v87_v39  ;;  %v4130_v43 = vld [vmem:[%s4429_s0 + $0x298] sm:$0xff] }
 0x11f   :  { %2129 = vst [vmem:[#allocation5 + $0xe0] sm:$0xff] %v685_v44  ;;  %2417 = vst [vmem:[#allocation5 + $0x9e0] sm:$0xff] %v1261_v45  ;;  %1005 = vmatprep.mubr.f32.mxu0 %v3230_v0  ;;  %3003 = vmatprep.mubr.msk.f32.mxu1 %vm178_vm0, %v88_v38  ;;  %v4135_v44 = vld [vmem:[%s4429_s0 + $0x2a0] sm:$0xff] }
 0x121   :  { %v689_v48 = vpop.f32.mrb[20].mxu0  ;;  %v1265_v49 = vpop.f32.mrb[20].mxu1 }
 0x122   :  { %2131 = vst [vmem:[#allocation5 + $0xf0] sm:$0xff] %v689_v48  ;;  %2419 = vst [vmem:[#allocation5 + $0x9f0] sm:$0xff] %v1265_v49  ;;  %v691_v50 = vpop.f32.mrb[21].mxu0  ;;  %2565 = vmatmul.mubr.msk.f32.gmra.mrb[126].mxu0 %vm178_vm0, %v89_v46  ;;  %v1267_v51 = vpop.f32.mrb[21].mxu1  ;;  %3004 = vmatmul.mubr.msk.f32.gmra.mrb[126].mxu1 %vm178_vm0, %v89_v46  ;;  %v4147_v49 = vld [vmem:[%s4429_s0 + $0x2a8] sm:$0xff] }
 0x123   :  { %2132 = vst [vmem:[#allocation5 + $0xf8] sm:$0xff] %v691_v50  ;;  %2420 = vst [vmem:[#allocation5 + $0x9f8] sm:$0xff] %v1267_v51  ;;  %1011 = vmatprep.mubr.f32.mxu0 %v3230_v0  ;;  %3006 = vmatprep.mubr.msk.f32.mxu1 %vm178_vm0, %v90_v47  ;;  %v4152_v50 = vld [vmem:[%s4429_s0 + $0x2b0] sm:$0xff] }
 0x125   :  { %v695_v54 = vpop.f32.mrb[22].mxu0  ;;  %v1271_v55 = vpop.f32.mrb[22].mxu1 }
 0x126   :  { %2134 = vst [vmem:[#allocation5 + $0x108] sm:$0xff] %v695_v54  ;;  %2422 = vst [vmem:[#allocation5 + $0xa08] sm:$0xff] %v1271_v55  ;;  %v697_v56 = vpop.f32.mrb[23].mxu0  ;;  %2566 = vmatmul.mubr.msk.f32.gmra.mrb[128].mxu0 %vm178_vm0, %v90_v47  ;;  %v1273_v57 = vpop.f32.mrb[23].mxu1  ;;  %3007 = vmatmul.mubr.msk.f32.gmra.mrb[128].mxu1 %vm178_vm0, %v91_v52  ;;  %v4164_v55 = vld [vmem:[%s4429_s0 + $0x2b8] sm:$0xff] }
 0x127   :  { %2135 = vst [vmem:[#allocation5 + $0x110] sm:$0xff] %v697_v56  ;;  %2423 = vst [vmem:[#allocation5 + $0xa10] sm:$0xff] %v1273_v57  ;;  %1017 = vmatprep.mubr.f32.mxu0 %v3230_v0  ;;  %3009 = vmatprep.mubr.msk.f32.mxu1 %vm178_vm0, %v92_v53  ;;  %v4169_v56 = vld [vmem:[%s4429_s0 + $0x2c0] sm:$0xff] }
 0x129   :  { %v701_v60 = vpop.f32.mrb[24].mxu0  ;;  %v1277_v61 = vpop.f32.mrb[24].mxu1 }
 0x12a   :  { %2137 = vst [vmem:[#allocation5 + $0x120] sm:$0xff] %v701_v60  ;;  %2425 = vst [vmem:[#allocation5 + $0xa20] sm:$0xff] %v1277_v61  ;;  %v703_v62 = vpop.f32.mrb[25].mxu0  ;;  %2567 = vmatmul.mubr.msk.f32.gmra.mrb[130].mxu0 %vm178_vm0, %v91_v52  ;;  %v1279_v63 = vpop.f32.mrb[25].mxu1  ;;  %3010 = vmatmul.mubr.msk.f32.gmra.mrb[130].mxu1 %vm178_vm0, %v93_v58  ;;  %v4181_v61 = vld [vmem:[%s4429_s0 + $0x2c8] sm:$0xff] }
 0x12b   :  { %2138 = vst [vmem:[#allocation5 + $0x128] sm:$0xff] %v703_v62  ;;  %2426 = vst [vmem:[#allocation5 + $0xa28] sm:$0xff] %v1279_v63  ;;  %1023 = vmatprep.mubr.f32.mxu0 %v3230_v0  ;;  %3012 = vmatprep.mubr.msk.f32.mxu1 %vm178_vm0, %v94_v59  ;;  %v4186_v62 = vld [vmem:[%s4429_s0 + $0x2d0] sm:$0xff] }
 0x12d   :  { %v707_v3 = vpop.f32.mrb[26].mxu0  ;;  %v1283_v4 = vpop.f32.mrb[26].mxu1 }
 0x12e   :  { %2140 = vst [vmem:[#allocation5 + $0x138] sm:$0xff] %v707_v3  ;;  %2428 = vst [vmem:[#allocation5 + $0xa38] sm:$0xff] %v1283_v4  ;;  %v709_v5 = vpop.f32.mrb[27].mxu0  ;;  %2568 = vmatmul.mubr.msk.f32.gmra.mrb[132].mxu0 %vm178_vm0, %v92_v53  ;;  %v1285_v6 = vpop.f32.mrb[27].mxu1  ;;  %3013 = vmatmul.mubr.msk.f32.gmra.mrb[132].mxu1 %vm178_vm0, %v95_v1  ;;  %v4198_v4 = vld [vmem:[%s4429_s0 + $0x2d8] sm:$0xff] }
 0x12f   :  { %2141 = vst [vmem:[#allocation5 + $0x140] sm:$0xff] %v709_v5  ;;  %2429 = vst [vmem:[#allocation5 + $0xa40] sm:$0xff] %v1285_v6  ;;  %1029 = vmatprep.mubr.f32.mxu0 %v3230_v0  ;;  %3015 = vmatprep.mubr.msk.f32.mxu1 %vm178_vm0, %v96_v2  ;;  %v4203_v5 = vld [vmem:[%s4429_s0 + $0x2e0] sm:$0xff] }
 0x131   :  { %v713_v9 = vpop.f32.mrb[28].mxu0  ;;  %v1289_v10 = vpop.f32.mrb[28].mxu1 }
 0x132   :  { %2143 = vst [vmem:[#allocation5 + $0x150] sm:$0xff] %v713_v9  ;;  %2431 = vst [vmem:[#allocation5 + $0xa50] sm:$0xff] %v1289_v10  ;;  %v715_v11 = vpop.f32.mrb[29].mxu0  ;;  %2569 = vmatmul.mubr.msk.f32.gmra.mrb[134].mxu0 %vm178_vm0, %v93_v58  ;;  %v1291_v12 = vpop.f32.mrb[29].mxu1  ;;  %3016 = vmatmul.mubr.msk.f32.gmra.mrb[134].mxu1 %vm178_vm0, %v4032_v7  ;;  %v4215_v10 = vld [vmem:[%s4429_s0 + $0x2e8] sm:$0xff] }
 0x133   :  { %2144 = vst [vmem:[#allocation5 + $0x158] sm:$0xff] %v715_v11  ;;  %2432 = vst [vmem:[#allocation5 + $0xa58] sm:$0xff] %v1291_v12  ;;  %1035 = vmatprep.mubr.f32.mxu0 %v3230_v0  ;;  %3018 = vmatprep.mubr.msk.f32.mxu1 %vm178_vm0, %v4037_v8  ;;  %v4220_v11 = vld [vmem:[%s4429_s0 + $0x2f0] sm:$0xff] }
 0x135   :  { %v719_v15 = vpop.f32.mrb[30].mxu0  ;;  %v1295_v16 = vpop.f32.mrb[30].mxu1 }
 0x136   :  { %2146 = vst [vmem:[#allocation5 + $0x168] sm:$0xff] %v719_v15  ;;  %2434 = vst [vmem:[#allocation5 + $0xa68] sm:$0xff] %v1295_v16  ;;  %v721_v17 = vpop.f32.mrb[31].mxu0  ;;  %2570 = vmatmul.mubr.msk.f32.gmra.mrb[136].mxu0 %vm178_vm0, %v94_v59  ;;  %v1297_v18 = vpop.f32.mrb[31].mxu1  ;;  %3019 = vmatmul.mubr.msk.f32.gmra.mrb[136].mxu1 %vm178_vm0, %v4048_v13  ;;  %v4232_v16 = vld [vmem:[%s4429_s0 + $0x2f8] sm:$0xff] }
 0x137   :  { %2147 = vst [vmem:[#allocation5 + $0x170] sm:$0xff] %v721_v17  ;;  %2435 = vst [vmem:[#allocation5 + $0xa70] sm:$0xff] %v1297_v18  ;;  %1041 = vmatprep.mubr.f32.mxu0 %v3230_v0  ;;  %3021 = vmatprep.mubr.msk.f32.mxu1 %vm178_vm0, %v4053_v14 }
 0x139   :  { %v725_v21 = vpop.f32.mrb[32].mxu0  ;;  %v1301_v22 = vpop.f32.mrb[32].mxu1 }
 0x13a   :  { %2149 = vst [vmem:[#allocation5 + $0x180] sm:$0xff] %v725_v21  ;;  %2437 = vst [vmem:[#allocation5 + $0xa80] sm:$0xff] %v1301_v22  ;;  %v727_v23 = vpop.f32.mrb[33].mxu0  ;;  %2571 = vmatmul.mubr.msk.f32.gmra.mrb[138].mxu0 %vm178_vm0, %v95_v1  ;;  %v1303_v24 = vpop.f32.mrb[33].mxu1  ;;  %3022 = vmatmul.mubr.msk.f32.gmra.mrb[138].mxu1 %vm178_vm0, %v4064_v19  ;;  %v3147_v21 = vld [vmem:[%s4429_s0 + $0x300] sm:$0xff] }
 0x13b   :  { %2150 = vst [vmem:[#allocation5 + $0x188] sm:$0xff] %v727_v23  ;;  %2438 = vst [vmem:[#allocation5 + $0xa88] sm:$0xff] %v1303_v24  ;;  %1047 = vmatprep.mubr.f32.mxu0 %v3230_v0  ;;  %3024 = vmatprep.mubr.msk.f32.mxu1 %vm178_vm0, %v4069_v20 }
 0x13d   :  { %v731_v27 = vpop.f32.mrb[34].mxu0  ;;  %v1307_v28 = vpop.f32.mrb[34].mxu1 }
 0x13e   :  { %2152 = vst [vmem:[#allocation5 + $0x198] sm:$0xff] %v731_v27  ;;  %2440 = vst [vmem:[#allocation5 + $0xa98] sm:$0xff] %v1307_v28  ;;  %v733_v29 = vpop.f32.mrb[35].mxu0  ;;  %2572 = vmatmul.mubr.msk.f32.gmra.mrb[140].mxu0 %vm178_vm0, %v96_v2  ;;  %v1309_v31 = vpop.f32.mrb[35].mxu1  ;;  %3025 = vmatmul.mubr.msk.f32.gmra.mrb[140].mxu1 %vm178_vm0, %v4080_v25  ;;  %v3149_v27 = vld [vmem:[%s4429_s0 + $0x310] sm:$0xff] }
 0x13f   :  { %2153 = vst [vmem:[#allocation5 + $0x1a0] sm:$0xff] %v733_v29  ;;  %2441 = vst [vmem:[#allocation5 + $0xaa0] sm:$0xff] %v1309_v31  ;;  %1053 = vmatprep.mubr.f32.mxu0 %v3230_v0  ;;  %3027 = vmatprep.mubr.msk.f32.mxu1 %vm178_vm0, %v4085_v26 }
 0x141   :  { %v737_v34 = vpop.f32.mrb[36].mxu0  ;;  %v1313_v36 = vpop.f32.mrb[36].mxu1 }
 0x142   :  { %2155 = vst [vmem:[#allocation5 + $0x1b0] sm:$0xff] %v737_v34  ;;  %2443 = vst [vmem:[#allocation5 + $0xab0] sm:$0xff] %v1313_v36  ;;  %v739_v37 = vpop.f32.mrb[37].mxu0  ;;  %2573 = vmatmul.mubr.msk.f32.gmra.mrb[142].mxu0 %vm178_vm0, %v4032_v7  ;;  %v1315_v39 = vpop.f32.mrb[37].mxu1  ;;  %3028 = vmatmul.mubr.msk.f32.gmra.mrb[142].mxu1 %vm178_vm0, %v4096_v32  ;;  %v3151_v34 = vld [vmem:[%s4429_s0 + $0x320] sm:$0xff] }
 0x143   :  { %2156 = vst [vmem:[#allocation5 + $0x1b8] sm:$0xff] %v739_v37  ;;  %2444 = vst [vmem:[#allocation5 + $0xab8] sm:$0xff] %v1315_v39  ;;  %1059 = vmatprep.mubr.f32.mxu0 %v3230_v0  ;;  %3030 = vmatprep.mubr.msk.f32.mxu1 %vm178_vm0, %v4101_v33 }
 0x145   :  { %v743_v30 = vpop.f32.mrb[38].mxu0  ;;  %v1319_v35 = vpop.f32.mrb[38].mxu1 }
 0x146   :  { %2158 = vst [vmem:[#allocation5 + $0x1c8] sm:$0xff] %v743_v30  ;;  %2446 = vst [vmem:[#allocation5 + $0xac8] sm:$0xff] %v1319_v35  ;;  %v745_v38 = vpop.f32.mrb[39].mxu0  ;;  %2574 = vmatmul.mubr.msk.f32.gmra.mrb[144].mxu0 %vm178_vm0, %v4037_v8  ;;  %v1321_v42 = vpop.f32.mrb[39].mxu1  ;;  %3031 = vmatmul.mubr.msk.f32.gmra.mrb[144].mxu1 %vm178_vm0, %v4113_v40  ;;  %v3152_v30 = vld [vmem:[%s4429_s0 + $0x328] sm:$0xff]  ;;  %v3153_v35 = vld [vmem:[%s4429_s0 + $0x330] sm:$0xff] }
 0x147   :  { %2159 = vst [vmem:[#allocation5 + $0x1d0] sm:$0xff] %v745_v38  ;;  %2447 = vst [vmem:[#allocation5 + $0xad0] sm:$0xff] %v1321_v42  ;;  %1065 = vmatprep.mubr.f32.mxu0 %v3230_v0  ;;  %3033 = vmatprep.mubr.msk.f32.mxu1 %vm178_vm0, %v4118_v41 }
 0x149   :  { %v749_v45 = vpop.f32.mrb[40].mxu0  ;;  %v1325_v46 = vpop.f32.mrb[40].mxu1 }
 0x14a   :  { %2161 = vst [vmem:[#allocation5 + $0x1e0] sm:$0xff] %v749_v45  ;;  %2449 = vst [vmem:[#allocation5 + $0xae0] sm:$0xff] %v1325_v46  ;;  %v751_v47 = vpop.f32.mrb[41].mxu0  ;;  %2575 = vmatmul.mubr.msk.f32.gmra.mrb[146].mxu0 %vm178_vm0, %v4048_v13  ;;  %v1327_v48 = vpop.f32.mrb[41].mxu1  ;;  %3034 = vmatmul.mubr.msk.f32.gmra.mrb[146].mxu1 %vm178_vm0, %v4130_v43  ;;  %v3154_v46 = vld [vmem:[%s4429_s0 + $0x338] sm:$0xff] }
 0x14b   :  { %2162 = vst [vmem:[#allocation5 + $0x1e8] sm:$0xff] %v751_v47  ;;  %2450 = vst [vmem:[#allocation5 + $0xae8] sm:$0xff] %v1327_v48  ;;  %1071 = vmatprep.mubr.f32.mxu0 %v3230_v0  ;;  %3036 = vmatprep.mubr.msk.f32.mxu1 %vm178_vm0, %v4135_v44  ;;  %v3155_v47 = vld [vmem:[%s4429_s0 + $0x340] sm:$0xff] }
 0x14d   :  { %v755_v51 = vpop.f32.mrb[42].mxu0  ;;  %v1331_v52 = vpop.f32.mrb[42].mxu1 }
 0x14e   :  { %2164 = vst [vmem:[#allocation5 + $0x1f8] sm:$0xff] %v755_v51  ;;  %2452 = vst [vmem:[#allocation5 + $0xaf8] sm:$0xff] %v1331_v52  ;;  %v757_v53 = vpop.f32.mrb[43].mxu0  ;;  %2576 = vmatmul.mubr.msk.f32.gmra.mrb[148].mxu0 %vm178_vm0, %v4053_v14  ;;  %v1333_v54 = vpop.f32.mrb[43].mxu1  ;;  %3037 = vmatmul.mubr.msk.f32.gmra.mrb[148].mxu1 %vm178_vm0, %v4147_v49 }
 0x14f   :  { %2165 = vst [vmem:[#allocation5 + $0x200] sm:$0xff] %v757_v53  ;;  %2453 = vst [vmem:[#allocation5 + $0xb00] sm:$0xff] %v1333_v54  ;;  %1077 = vmatprep.mubr.f32.mxu0 %v3230_v0  ;;  %3039 = vmatprep.mubr.msk.f32.mxu1 %vm178_vm0, %v4152_v50  ;;  %v3156_v53 = vld [vmem:[%s4429_s0 + $0x348] sm:$0xff]  ;;  %v3157_v54 = vld [vmem:[%s4429_s0 + $0x350] sm:$0xff] }
 0x151   :  { %v761_v57 = vpop.f32.mrb[44].mxu0  ;;  %v1337_v58 = vpop.f32.mrb[44].mxu1 }
 0x152   :  { %2167 = vst [vmem:[#allocation5 + $0x210] sm:$0xff] %v761_v57  ;;  %2455 = vst [vmem:[#allocation5 + $0xb10] sm:$0xff] %v1337_v58  ;;  %v763_v59 = vpop.f32.mrb[45].mxu0  ;;  %2577 = vmatmul.mubr.msk.f32.gmra.mrb[150].mxu0 %vm178_vm0, %v4064_v19  ;;  %v1339_v60 = vpop.f32.mrb[45].mxu1  ;;  %3040 = vmatmul.mubr.msk.f32.gmra.mrb[150].mxu1 %vm178_vm0, %v4164_v55 }
 0x153   :  { %2168 = vst [vmem:[#allocation5 + $0x218] sm:$0xff] %v763_v59  ;;  %2456 = vst [vmem:[#allocation5 + $0xb18] sm:$0xff] %v1339_v60  ;;  %1083 = vmatprep.mubr.f32.mxu0 %v3230_v0  ;;  %3042 = vmatprep.mubr.msk.f32.mxu1 %vm178_vm0, %v4169_v56  ;;  %v3158_v60 = vld [vmem:[%s4429_s0 + $0x358] sm:$0xff] }
 0x155   :  { %v767_v63 = vpop.f32.mrb[46].mxu0  ;;  %v1343_v1 = vpop.f32.mrb[46].mxu1 }
 0x156   :  { %2170 = vst [vmem:[#allocation5 + $0x228] sm:$0xff] %v767_v63  ;;  %2458 = vst [vmem:[#allocation5 + $0xb28] sm:$0xff] %v1343_v1  ;;  %v769_v2 = vpop.f32.mrb[47].mxu0  ;;  %2578 = vmatmul.mubr.msk.f32.gmra.mrb[152].mxu0 %vm178_vm0, %v4069_v20  ;;  %v1345_v3 = vpop.f32.mrb[47].mxu1  ;;  %3043 = vmatmul.mubr.msk.f32.gmra.mrb[152].mxu1 %vm178_vm0, %v4181_v61  ;;  %v3159_v63 = vld [vmem:[%s4429_s0 + $0x360] sm:$0xff] }
 0x157   :  { %2171 = vst [vmem:[#allocation5 + $0x230] sm:$0xff] %v769_v2  ;;  %2459 = vst [vmem:[#allocation5 + $0xb30] sm:$0xff] %v1345_v3  ;;  %1089 = vmatprep.mubr.f32.mxu0 %v3230_v0  ;;  %3045 = vmatprep.mubr.msk.f32.mxu1 %vm178_vm0, %v4186_v62 }
 0x159   :  { %v773_v6 = vpop.f32.mrb[48].mxu0  ;;  %v1349_v7 = vpop.f32.mrb[48].mxu1 }
 0x15a   :  { %2173 = vst [vmem:[#allocation5 + $0x240] sm:$0xff] %v773_v6  ;;  %2461 = vst [vmem:[#allocation5 + $0xb40] sm:$0xff] %v1349_v7  ;;  %v775_v8 = vpop.f32.mrb[49].mxu0  ;;  %2579 = vmatmul.mubr.msk.f32.gmra.mrb[154].mxu0 %vm178_vm0, %v4080_v25  ;;  %v1351_v9 = vpop.f32.mrb[49].mxu1  ;;  %3046 = vmatmul.mubr.msk.f32.gmra.mrb[154].mxu1 %vm178_vm0, %v4198_v4  ;;  %v3160_v6 = vld [vmem:[%s4429_s0 + $0x368] sm:$0xff]  ;;  %v3161_v7 = vld [vmem:[%s4429_s0 + $0x370] sm:$0xff] }
 0x15b   :  { %2174 = vst [vmem:[#allocation5 + $0x248] sm:$0xff] %v775_v8  ;;  %2462 = vst [vmem:[#allocation5 + $0xb48] sm:$0xff] %v1351_v9  ;;  %1095 = vmatprep.mubr.f32.mxu0 %v3230_v0  ;;  %3048 = vmatprep.mubr.msk.f32.mxu1 %vm178_vm0, %v4203_v5 }
 0x15d   :  { %v779_v12 = vpop.f32.mrb[50].mxu0  ;;  %v1355_v13 = vpop.f32.mrb[50].mxu1 }
 0x15e   :  { %2176 = vst [vmem:[#allocation5 + $0x258] sm:$0xff] %v779_v12  ;;  %2464 = vst [vmem:[#allocation5 + $0xb58] sm:$0xff] %v1355_v13  ;;  %v781_v14 = vpop.f32.mrb[51].mxu0  ;;  %2580 = vmatmul.mubr.msk.f32.gmra.mrb[156].mxu0 %vm178_vm0, %v4085_v26  ;;  %v1357_v15 = vpop.f32.mrb[51].mxu1  ;;  %3049 = vmatmul.mubr.msk.f32.gmra.mrb[156].mxu1 %vm178_vm0, %v4215_v10  ;;  %v3148_v26 = vld [vmem:[%s4429_s0 + $0x308] sm:$0xff]  ;;  %v3162_v13 = vld [vmem:[%s4429_s0 + $0x378] sm:$0xff] }
 0x15f   :  { %2177 = vst [vmem:[#allocation5 + $0x260] sm:$0xff] %v781_v14  ;;  %2465 = vst [vmem:[#allocation5 + $0xb60] sm:$0xff] %v1357_v15  ;;  %1101 = vmatprep.mubr.f32.mxu0 %v3230_v0  ;;  %3051 = vmatprep.mubr.msk.f32.mxu1 %vm178_vm0, %v4220_v11  ;;  %v3163_v14 = vld [vmem:[%s4429_s0 + $0x380] sm:$0xff] }
 0x161   :  { %v785_v17 = vpop.f32.mrb[52].mxu0  ;;  %v1361_v18 = vpop.f32.mrb[52].mxu1 }
 0x162   :  { %2179 = vst [vmem:[#allocation5 + $0x270] sm:$0xff] %v785_v17  ;;  %2467 = vst [vmem:[#allocation5 + $0xb70] sm:$0xff] %v1361_v18  ;;  %v787_v19 = vpop.f32.mrb[53].mxu0  ;;  %2581 = vmatmul.mubr.msk.f32.gmra.mrb[158].mxu0 %vm178_vm0, %v4096_v32  ;;  %v1363_v20 = vpop.f32.mrb[53].mxu1  ;;  %3052 = vmatmul.mubr.msk.f32.gmra.mrb[158].mxu1 %vm178_vm0, %v4232_v16 }
 0x163   :  { %2180 = vst [vmem:[#allocation5 + $0x278] sm:$0xff] %v787_v19  ;;  %2468 = vst [vmem:[#allocation5 + $0xb78] sm:$0xff] %v1363_v20  ;;  %1107 = vmatprep.mubr.f32.mxu0 %v3230_v0  ;;  %3054 = vmatprep.mubr.msk.f32.mxu1 %vm178_vm0, %v3147_v21  ;;  %v3164_v19 = vld [vmem:[%s4429_s0 + $0x388] sm:$0xff]  ;;  %v3165_v20 = vld [vmem:[%s4429_s0 + $0x390] sm:$0xff] }
 0x165   :  { %v791_v22 = vpop.f32.mrb[54].mxu0  ;;  %v1367_v23 = vpop.f32.mrb[54].mxu1 }
 0x166   :  { %2182 = vst [vmem:[#allocation5 + $0x288] sm:$0xff] %v791_v22  ;;  %2470 = vst [vmem:[#allocation5 + $0xb88] sm:$0xff] %v1367_v23  ;;  %v793_v24 = vpop.f32.mrb[55].mxu0  ;;  %2582 = vmatmul.mubr.msk.f32.gmra.mrb[160].mxu0 %vm178_vm0, %v4101_v33  ;;  %v1369_v25 = vpop.f32.mrb[55].mxu1  ;;  %3055 = vmatmul.mubr.msk.f32.gmra.mrb[160].mxu1 %vm178_vm0, %v3148_v26  ;;  %v3150_v33 = vld [vmem:[%s4429_s0 + $0x318] sm:$0xff] }
 0x167   :  { %2183 = vst [vmem:[#allocation5 + $0x290] sm:$0xff] %v793_v24  ;;  %2471 = vst [vmem:[#allocation5 + $0xb90] sm:$0xff] %v1369_v25  ;;  %1113 = vmatprep.mubr.f32.mxu0 %v3230_v0  ;;  %3057 = vmatprep.mubr.msk.f32.mxu1 %vm178_vm0, %v3149_v27  ;;  %v3166_v24 = vld [vmem:[%s4429_s0 + $0x398] sm:$0xff]  ;;  %v3167_v25 = vld [vmem:[%s4429_s0 + $0x3a0] sm:$0xff] }
 0x169   :  { %v797_v28 = vpop.f32.mrb[56].mxu0  ;;  %v1373_v29 = vpop.f32.mrb[56].mxu1 }
 0x16a   :  { %2185 = vst [vmem:[#allocation5 + $0x2a0] sm:$0xff] %v797_v28  ;;  %2473 = vst [vmem:[#allocation5 + $0xba0] sm:$0xff] %v1373_v29  ;;  %v799_v31 = vpop.f32.mrb[57].mxu0  ;;  %2583 = vmatmul.mubr.msk.f32.gmra.mrb[162].mxu0 %vm178_vm0, %v4113_v40  ;;  %v1375_v32 = vpop.f32.mrb[57].mxu1  ;;  %3058 = vmatmul.mubr.msk.f32.gmra.mrb[162].mxu1 %vm178_vm0, %v3150_v33  ;;  %v3168_v29 = vld [vmem:[%s4429_s0 + $0x3a8] sm:$0xff] }
 0x16b   :  { %2186 = vst [vmem:[#allocation5 + $0x2a8] sm:$0xff] %v799_v31  ;;  %2474 = vst [vmem:[#allocation5 + $0xba8] sm:$0xff] %v1375_v32  ;;  %1119 = vmatprep.mubr.f32.mxu0 %v3230_v0  ;;  %3060 = vmatprep.mubr.msk.f32.mxu1 %vm178_vm0, %v3151_v34  ;;  %v3169_v31 = vld [vmem:[%s4429_s0 + $0x3b0] sm:$0xff] }
 0x16d   :  { %v803_v36 = vpop.f32.mrb[58].mxu0  ;;  %v1379_v37 = vpop.f32.mrb[58].mxu1 }
 0x16e   :  { %2188 = vst [vmem:[#allocation5 + $0x2b8] sm:$0xff] %v803_v36  ;;  %2476 = vst [vmem:[#allocation5 + $0xbb8] sm:$0xff] %v1379_v37  ;;  %v805_v39 = vpop.f32.mrb[59].mxu0  ;;  %2584 = vmatmul.mubr.msk.f32.gmra.mrb[164].mxu0 %vm178_vm0, %v4118_v41  ;;  %v1381_v40 = vpop.f32.mrb[59].mxu1  ;;  %3061 = vmatmul.mubr.msk.f32.gmra.mrb[164].mxu1 %vm178_vm0, %v3152_v30  ;;  %v3170_v36 = vld [vmem:[%s4429_s0 + $0x3b8] sm:$0xff]  ;;  %v3171_v37 = vld [vmem:[%s4429_s0 + $0x3c0] sm:$0xff] }
 0x16f   :  { %2189 = vst [vmem:[#allocation5 + $0x2c0] sm:$0xff] %v805_v39  ;;  %2477 = vst [vmem:[#allocation5 + $0xbc0] sm:$0xff] %v1381_v40  ;;  %1125 = vmatprep.mubr.f32.mxu0 %v3230_v0  ;;  %3063 = vmatprep.mubr.msk.f32.mxu1 %vm178_vm0, %v3153_v35  ;;  %v3172_v35 = vld [vmem:[%s4429_s0 + $0x3c8] sm:$0xff] }
 0x171   :  { %v809_v38 = vpop.f32.mrb[60].mxu0  ;;  %v1385_v42 = vpop.f32.mrb[60].mxu1 }
 0x172   :  { %2191 = vst [vmem:[#allocation5 + $0x2d0] sm:$0xff] %v809_v38  ;;  %2479 = vst [vmem:[#allocation5 + $0xbd0] sm:$0xff] %v1385_v42  ;;  %v811_v41 = vpop.f32.mrb[61].mxu0  ;;  %2585 = vmatmul.mubr.msk.f32.gmra.mrb[166].mxu0 %vm178_vm0, %v4130_v43  ;;  %v1387_v45 = vpop.f32.mrb[61].mxu1  ;;  %3064 = vmatmul.mubr.msk.f32.gmra.mrb[166].mxu1 %vm178_vm0, %v3154_v46  ;;  %v3173_v38 = vld [vmem:[%s4429_s0 + $0x3d0] sm:$0xff]  ;;  %v3174_v46 = vld [vmem:[%s4429_s0 + $0x3d8] sm:$0xff] }
 0x173   :  { %2192 = vst [vmem:[#allocation5 + $0x2d8] sm:$0xff] %v811_v41  ;;  %2480 = vst [vmem:[#allocation5 + $0xbd8] sm:$0xff] %v1387_v45  ;;  %1131 = vmatprep.mubr.f32.mxu0 %v3230_v0  ;;  %3066 = vmatprep.mubr.msk.f32.mxu1 %vm178_vm0, %v3155_v47  ;;  %v3175_v47 = vld [vmem:[%s4429_s0 + $0x3e0] sm:$0xff] }
 0x175   :  { %v815_v48 = vpop.f32.mrb[62].mxu0  ;;  %v1391_v51 = vpop.f32.mrb[62].mxu1 }
 0x176   :  { %2194 = vst [vmem:[#allocation5 + $0x2e8] sm:$0xff] %v815_v48  ;;  %2482 = vst [vmem:[#allocation5 + $0xbe8] sm:$0xff] %v1391_v51  ;;  %v817_v43 = vpop.f32.mrb[63].mxu0  ;;  %2586 = vmatmul.mubr.msk.f32.gmra.mrb[168].mxu0 %vm178_vm0, %v4135_v44  ;;  %v1393_v52 = vpop.f32.mrb[63].mxu1  ;;  %3067 = vmatmul.mubr.msk.f32.gmra.mrb[168].mxu1 %vm178_vm0, %v3156_v53  ;;  %v3177_v53 = vld [vmem:[%s4429_s0 + $0x3f0] sm:$0xff] }
 0x177   :  { %2195 = vst [vmem:[#allocation5 + $0x2f0] sm:$0xff] %v817_v43  ;;  %2483 = vst [vmem:[#allocation5 + $0xbf0] sm:$0xff] %v1393_v52  ;;  %1137 = vmatprep.mubr.f32.mxu0 %v3230_v0  ;;  %3069 = vmatprep.mubr.msk.f32.mxu1 %vm178_vm0, %v3157_v54  ;;  %v3176_v52 = vld [vmem:[%s4429_s0 + $0x3e8] sm:$0xff] }
 0x179   :  { %v821_v57 = vpop.f32.mrb[64].mxu0  ;;  %v2912_v58 = vpop.f32.mrb[64].mxu1 }
 0x17a   :  { %2197 = vst [vmem:[#allocation5 + $0x300] sm:$0xff] %v821_v57  ;;  %2106 = vst [vmem:[#allocation5 + $0x28] sm:$0xff] %v2912_v58  ;;  %v823_v44 = vpop.f32.mrb[65].mxu0  ;;  %2587 = vmatmul.mubr.msk.f32.gmra.mrb[170].mxu0 %vm178_vm0, %v4147_v49  ;;  %v1462_v59 = vpop.f32.mrb[65].mxu1  ;;  %3070 = vmatmul.mubr.msk.f32.gmra.mrb[170].mxu1 %vm178_vm0, %v3158_v60 }
 0x17b   :  { %2198 = vst [vmem:[#allocation5 + $0x308] sm:$0xff] %v823_v44  ;;  %2103 = vst [vmem:[#allocation5 + $0x10] sm:$0xff] %v1462_v59  ;;  %1143 = vmatprep.mubr.f32.mxu0 %v3230_v0  ;;  %3072 = vmatprep.mubr.msk.f32.mxu1 %vm178_vm0, %v3159_v63  ;;  %v3178_v44 = vld [vmem:[%s4429_s0 + $0x3f8] sm:$0xff]  ;;  %s3231_s0 = smov [#allocation5]  }
 0x17c   :  { %s2490_s17 = sshll.u32 %s3231_s0, 4  ;;  %s2491_s17 = int_to_ptr.vmem [resolvable:$true] %s2490_s17 }
 0x17d   :  { %v827_v1 = vpop.f32.mrb[66].mxu0  ;;  %v2915_v2 = vpop.f32.mrb[66].mxu1  ;;  %s3201_s18 = scalar_lea.vmem %s2491_s17, 49152  ;;  %p3206_p9 = scmp.lt.s32.totalorder %s2491_s17, %s2491_s17 }
 0x17e   :  { %2200 = vst [vmem:[#allocation5 + $0x318] sm:$0xff] %v827_v1  ;;  %2112 = vst [vmem:[#allocation5 + $0x58] sm:$0xff] %v2915_v2  ;;  %v829_v49 = vpop.f32.mrb[67].mxu0  ;;  %2588 = vmatmul.mubr.msk.f32.gmra.mrb[172].mxu0 %vm178_vm0, %v4152_v50  ;;  %v1472_v3 = vpop.f32.mrb[67].mxu1  ;;  %3073 = vmatmul.mubr.msk.f32.gmra.mrb[172].mxu1 %vm178_vm0, %v3160_v6  ;;  %p3202_p8 = scmp.ne.s32.totalorder %s2491_s17, %s3201_s18  ;;  %p3207_p10 = scmp.lt.s32.totalorder %s3201_s18, %s3201_s18 }
 0x17f   :  { %2201 = vst [vmem:[#allocation5 + $0x320] sm:$0xff] %v829_v49  ;;  %2109 = vst [vmem:[#allocation5 + $0x40] sm:$0xff] %v1472_v3  ;;  %1149 = vmatprep.mubr.f32.mxu0 %v3230_v0  ;;  %3075 = vmatprep.mubr.msk.f32.mxu1 %vm178_vm0, %v3161_v7 }
 0x180   :  { %p3208_p11 = por %p3207_p10, %p3206_p9 }
 0x181   :  { %v833_v8 = vpop.f32.mrb[68].mxu0  ;;  %v2918_v9 = vpop.f32.mrb[68].mxu1 }
 0x182   :  { %2203 = vst [vmem:[#allocation5 + $0x330] sm:$0xff] %v833_v8  ;;  %2118 = vst [vmem:[#allocation5 + $0x88] sm:$0xff] %v2918_v9  ;;  %v835_v50 = vpop.f32.mrb[69].mxu0  ;;  %2589 = vmatmul.mubr.msk.f32.gmra.mrb[174].mxu0 %vm178_vm0, %v4164_v55  ;;  %v1482_v12 = vpop.f32.mrb[69].mxu1  ;;  %3076 = vmatmul.mubr.msk.f32.gmra.mrb[174].mxu1 %vm178_vm0, %v3162_v13  ;;  %p3209_p12 = pnand %p3208_p11, %p3202_p8 }
 0x183   :  { %2204 = vst [vmem:[#allocation5 + $0x338] sm:$0xff] %v835_v50  ;;  %2115 = vst [vmem:[#allocation5 + $0x70] sm:$0xff] %v1482_v12  ;;  %1155 = vmatprep.mubr.f32.mxu0 %v3230_v0  ;;  %3078 = vmatprep.mubr.msk.f32.mxu1 %vm178_vm0, %v3163_v14 }
 0x185   :  { %v839_v15 = vpop.f32.mrb[70].mxu0  ;;  %v2921_v17 = vpop.f32.mrb[70].mxu1 }
 0x186   :  { %2206 = vst [vmem:[#allocation5 + $0x348] sm:$0xff] %v839_v15  ;;  %2124 = vst [vmem:[#allocation5 + $0xb8] sm:$0xff] %v2921_v17  ;;  %v841_v55 = vpop.f32.mrb[71].mxu0  ;;  %2590 = vmatmul.mubr.msk.f32.gmra.mrb[176].mxu0 %vm178_vm0, %v4169_v56  ;;  %v1492_v18 = vpop.f32.mrb[71].mxu1  ;;  %3079 = vmatmul.mubr.msk.f32.gmra.mrb[176].mxu1 %vm178_vm0, %v3164_v19 }
 0x187   :  { %2207 = vst [vmem:[#allocation5 + $0x350] sm:$0xff] %v841_v55  ;;  %2121 = vst [vmem:[#allocation5 + $0xa0] sm:$0xff] %v1492_v18  ;;  %1161 = vmatprep.mubr.f32.mxu0 %v3230_v0  ;;  %3081 = vmatprep.mubr.msk.f32.mxu1 %vm178_vm0, %v3165_v20 }
 0x189   :  { %v845_v21 = vpop.f32.mrb[72].mxu0  ;;  %v2924_v22 = vpop.f32.mrb[72].mxu1 }
 0x18a   :  { %2209 = vst [vmem:[#allocation5 + $0x360] sm:$0xff] %v845_v21  ;;  %2130 = vst [vmem:[#allocation5 + $0xe8] sm:$0xff] %v2924_v22  ;;  %v847_v56 = vpop.f32.mrb[73].mxu0  ;;  %2591 = vmatmul.mubr.msk.f32.gmra.mrb[178].mxu0 %vm178_vm0, %v4181_v61  ;;  %v1502_v23 = vpop.f32.mrb[73].mxu1  ;;  %3082 = vmatmul.mubr.msk.f32.gmra.mrb[178].mxu1 %vm178_vm0, %v3166_v24 }
 0x18b   :  { %2210 = vst [vmem:[#allocation5 + $0x368] sm:$0xff] %v847_v56  ;;  %2127 = vst [vmem:[#allocation5 + $0xd0] sm:$0xff] %v1502_v23  ;;  %1167 = vmatprep.mubr.f32.mxu0 %v3230_v0  ;;  %3084 = vmatprep.mubr.msk.f32.mxu1 %vm178_vm0, %v3167_v25 }
 0x18d   :  { %v851_v26 = vpop.f32.mrb[74].mxu0  ;;  %v2927_v27 = vpop.f32.mrb[74].mxu1 }
 0x18e   :  { %2212 = vst [vmem:[#allocation5 + $0x378] sm:$0xff] %v851_v26  ;;  %2136 = vst [vmem:[#allocation5 + $0x118] sm:$0xff] %v2927_v27  ;;  %v853_v61 = vpop.f32.mrb[75].mxu0  ;;  %2592 = vmatmul.mubr.msk.f32.gmra.mrb[180].mxu0 %vm178_vm0, %v4186_v62  ;;  %v1512_v28 = vpop.f32.mrb[75].mxu1  ;;  %3085 = vmatmul.mubr.msk.f32.gmra.mrb[180].mxu1 %vm178_vm0, %v3168_v29 }
 0x18f   :  { %2213 = vst [vmem:[#allocation5 + $0x380] sm:$0xff] %v853_v61  ;;  %2133 = vst [vmem:[#allocation5 + $0x100] sm:$0xff] %v1512_v28  ;;  %1173 = vmatprep.mubr.f32.mxu0 %v3230_v0  ;;  %3087 = vmatprep.mubr.msk.f32.mxu1 %vm178_vm0, %v3169_v31 }
 0x191   :  { %v857_v32 = vpop.f32.mrb[76].mxu0  ;;  %v2930_v33 = vpop.f32.mrb[76].mxu1 }
 0x192   :  { %2215 = vst [vmem:[#allocation5 + $0x390] sm:$0xff] %v857_v32  ;;  %2142 = vst [vmem:[#allocation5 + $0x148] sm:$0xff] %v2930_v33  ;;  %v859_v62 = vpop.f32.mrb[77].mxu0  ;;  %2593 = vmatmul.mubr.msk.f32.gmra.mrb[182].mxu0 %vm178_vm0, %v4198_v4  ;;  %v1522_v34 = vpop.f32.mrb[77].mxu1  ;;  %3088 = vmatmul.mubr.msk.f32.gmra.mrb[182].mxu1 %vm178_vm0, %v3170_v36 }
 0x193   :  { %2216 = vst [vmem:[#allocation5 + $0x398] sm:$0xff] %v859_v62  ;;  %2139 = vst [vmem:[#allocation5 + $0x130] sm:$0xff] %v1522_v34  ;;  %1179 = vmatprep.mubr.f32.mxu0 %v3230_v0  ;;  %3090 = vmatprep.mubr.msk.f32.mxu1 %vm178_vm0, %v3171_v37 }
 0x195   :  { %v863_v39 = vpop.f32.mrb[78].mxu0  ;;  %v2933_v40 = vpop.f32.mrb[78].mxu1 }
 0x196   :  { %2218 = vst [vmem:[#allocation5 + $0x3a8] sm:$0xff] %v863_v39  ;;  %2148 = vst [vmem:[#allocation5 + $0x178] sm:$0xff] %v2933_v40  ;;  %v865_v4 = vpop.f32.mrb[79].mxu0  ;;  %2594 = vmatmul.mubr.msk.f32.gmra.mrb[184].mxu0 %vm178_vm0, %v4203_v5  ;;  %v1532_v30 = vpop.f32.mrb[79].mxu1  ;;  %3091 = vmatmul.mubr.msk.f32.gmra.mrb[184].mxu1 %vm178_vm0, %v3172_v35 }
 0x197   :  { %2219 = vst [vmem:[#allocation5 + $0x3b0] sm:$0xff] %v865_v4  ;;  %2145 = vst [vmem:[#allocation5 + $0x160] sm:$0xff] %v1532_v30  ;;  %1185 = vmatprep.mubr.f32.mxu0 %v3230_v0  ;;  %3093 = vmatprep.mubr.msk.f32.mxu1 %vm178_vm0, %v3173_v38 }
 0x199   :  { %v869_v42 = vpop.f32.mrb[80].mxu0  ;;  %v2936_v41 = vpop.f32.mrb[80].mxu1 }
 0x19a   :  { %2221 = vst [vmem:[#allocation5 + $0x3c0] sm:$0xff] %v869_v42  ;;  %2154 = vst [vmem:[#allocation5 + $0x1a8] sm:$0xff] %v2936_v41  ;;  %v871_v5 = vpop.f32.mrb[81].mxu0  ;;  %2595 = vmatmul.mubr.msk.f32.gmra.mrb[186].mxu0 %vm178_vm0, %v4215_v10  ;;  %v1542_v45 = vpop.f32.mrb[81].mxu1  ;;  %3094 = vmatmul.mubr.msk.f32.gmra.mrb[186].mxu1 %vm178_vm0, %v3174_v46 }
 0x19b   :  { %2222 = vst [vmem:[#allocation5 + $0x3c8] sm:$0xff] %v871_v5  ;;  %2151 = vst [vmem:[#allocation5 + $0x190] sm:$0xff] %v1542_v45  ;;  %1191 = vmatprep.mubr.f32.mxu0 %v3230_v0  ;;  %3096 = vmatprep.mubr.msk.f32.mxu1 %vm178_vm0, %v3175_v47 }
 0x19d   :  { %v875_v48 = vpop.f32.mrb[82].mxu0  ;;  %v2939_v51 = vpop.f32.mrb[82].mxu1 }
 0x19e   :  { %2224 = vst [vmem:[#allocation5 + $0x3d8] sm:$0xff] %v875_v48  ;;  %2160 = vst [vmem:[#allocation5 + $0x1d8] sm:$0xff] %v2939_v51  ;;  %v877_v10 = vpop.f32.mrb[83].mxu0  ;;  %2596 = vmatmul.mubr.msk.f32.gmra.mrb[188].mxu0 %vm178_vm0, %v4220_v11  ;;  %v1552_v43 = vpop.f32.mrb[83].mxu1  ;;  %3097 = vmatmul.mubr.msk.f32.gmra.mrb[188].mxu1 %vm178_vm0, %v3176_v52 }
 0x19f   :  { %2225 = vst [vmem:[#allocation5 + $0x3e0] sm:$0xff] %v877_v10  ;;  %2157 = vst [vmem:[#allocation5 + $0x1c0] sm:$0xff] %v1552_v43  ;;  %1197 = vmatprep.mubr.f32.mxu0 %v3230_v0  ;;  %3099 = vmatprep.mubr.msk.f32.mxu1 %vm178_vm0, %v3177_v53 }
 0x1a1   :  { %v881_v54 = vpop.f32.mrb[84].mxu0  ;;  %v2942_v57 = vpop.f32.mrb[84].mxu1 }
 0x1a2   :  { %2227 = vst [vmem:[#allocation5 + $0x3f0] sm:$0xff] %v881_v54  ;;  %2166 = vst [vmem:[#allocation5 + $0x208] sm:$0xff] %v2942_v57  ;;  %v883_v11 = vpop.f32.mrb[85].mxu0  ;;  %2597 = vmatmul.mubr.msk.f32.gmra.mrb[190].mxu0 %vm178_vm0, %v4232_v16  ;;  %v1562_v58 = vpop.f32.mrb[85].mxu1  ;;  %3100 = vmatmul.mubr.msk.f32.gmra.mrb[190].mxu1 %vm178_vm0, %v3178_v44 }
 0x1a3   :  { %2228 = vst [vmem:[#allocation5 + $0x3f8] sm:$0xff] %v883_v11  ;;  %2163 = vst [vmem:[#allocation5 + $0x1f0] sm:$0xff] %v1562_v58 }
 0x1a5   :  { %v887_v0 = vpop.f32.mrb[86].mxu0  ;;  %v2945_v59 = vpop.f32.mrb[86].mxu1 }
 0x1a6   :  { %2230 = vst [vmem:[#allocation5 + $0x408] sm:$0xff] %v887_v0  ;;  %2172 = vst [vmem:[#allocation5 + $0x238] sm:$0xff] %v2945_v59  ;;  %v889_v60 = vpop.f32.mrb[87].mxu0  ;;  %v1572_v63 = vpop.f32.mrb[87].mxu1 }
 0x1a7   :  { %2231 = vst [vmem:[#allocation5 + $0x410] sm:$0xff] %v889_v60  ;;  %2169 = vst [vmem:[#allocation5 + $0x220] sm:$0xff] %v1572_v63 }
 0x1a9   :  { %v893_v1 = vpop.f32.mrb[88].mxu0  ;;  %v2948_v2 = vpop.f32.mrb[88].mxu1 }
 0x1aa   :  { %2233 = vst [vmem:[#allocation5 + $0x420] sm:$0xff] %v893_v1  ;;  %2178 = vst [vmem:[#allocation5 + $0x268] sm:$0xff] %v2948_v2  ;;  %v895_v16 = vpop.f32.mrb[89].mxu0  ;;  %v1582_v49 = vpop.f32.mrb[89].mxu1 }
 0x1ab   :  { %2234 = vst [vmem:[#allocation5 + $0x428] sm:$0xff] %v895_v16  ;;  %2175 = vst [vmem:[#allocation5 + $0x250] sm:$0xff] %v1582_v49 }
 0x1ad   :  { %v899_v3 = vpop.f32.mrb[90].mxu0  ;;  %v2951_v6 = vpop.f32.mrb[90].mxu1 }
 0x1ae   :  { %2236 = vst [vmem:[#allocation5 + $0x438] sm:$0xff] %v899_v3  ;;  %2184 = vst [vmem:[#allocation5 + $0x298] sm:$0xff] %v2951_v6  ;;  %v901_v7 = vpop.f32.mrb[91].mxu0  ;;  %v1592_v8 = vpop.f32.mrb[91].mxu1 }
 0x1af   :  { %2237 = vst [vmem:[#allocation5 + $0x440] sm:$0xff] %v901_v7  ;;  %2181 = vst [vmem:[#allocation5 + $0x280] sm:$0xff] %v1592_v8 }
 0x1b1   :  { %v905_v9 = vpop.f32.mrb[92].mxu0  ;;  %v2954_v50 = vpop.f32.mrb[92].mxu1 }
 0x1b2   :  { %2239 = vst [vmem:[#allocation5 + $0x450] sm:$0xff] %v905_v9  ;;  %2190 = vst [vmem:[#allocation5 + $0x2c8] sm:$0xff] %v2954_v50  ;;  %v907_v12 = vpop.f32.mrb[93].mxu0  ;;  %v1602_v13 = vpop.f32.mrb[93].mxu1 }
 0x1b3   :  { %2240 = vst [vmem:[#allocation5 + $0x458] sm:$0xff] %v907_v12  ;;  %2187 = vst [vmem:[#allocation5 + $0x2b0] sm:$0xff] %v1602_v13 }
 0x1b5   :  { %v911_v14 = vpop.f32.mrb[94].mxu0  ;;  %v2957_v15 = vpop.f32.mrb[94].mxu1 }
 0x1b6   :  { %2242 = vst [vmem:[#allocation5 + $0x468] sm:$0xff] %v911_v14  ;;  %2196 = vst [vmem:[#allocation5 + $0x2f8] sm:$0xff] %v2957_v15  ;;  %v913_v17 = vpop.f32.mrb[95].mxu0  ;;  %v1612_v55 = vpop.f32.mrb[95].mxu1 }
 0x1b7   :  { %2243 = vst [vmem:[#allocation5 + $0x470] sm:$0xff] %v913_v17  ;;  %2193 = vst [vmem:[#allocation5 + $0x2e0] sm:$0xff] %v1612_v55 }
 0x1b9   :  { %v917_v18 = vpop.f32.mrb[96].mxu0  ;;  %v2960_v19 = vpop.f32.mrb[96].mxu1 }
 0x1ba   :  { %2245 = vst [vmem:[#allocation5 + $0x480] sm:$0xff] %v917_v18  ;;  %2202 = vst [vmem:[#allocation5 + $0x328] sm:$0xff] %v2960_v19  ;;  %v919_v20 = vpop.f32.mrb[97].mxu0  ;;  %v1622_v21 = vpop.f32.mrb[97].mxu1 }
 0x1bb   :  { %2246 = vst [vmem:[#allocation5 + $0x488] sm:$0xff] %v919_v20  ;;  %2199 = vst [vmem:[#allocation5 + $0x310] sm:$0xff] %v1622_v21 }
 0x1bd   :  { %v923_v22 = vpop.f32.mrb[98].mxu0  ;;  %v2963_v56 = vpop.f32.mrb[98].mxu1 }
 0x1be   :  { %2248 = vst [vmem:[#allocation5 + $0x498] sm:$0xff] %v923_v22  ;;  %2208 = vst [vmem:[#allocation5 + $0x358] sm:$0xff] %v2963_v56  ;;  %v925_v23 = vpop.f32.mrb[99].mxu0  ;;  %v1632_v24 = vpop.f32.mrb[99].mxu1 }
 0x1bf   :  { %2249 = vst [vmem:[#allocation5 + $0x4a0] sm:$0xff] %v925_v23  ;;  %2205 = vst [vmem:[#allocation5 + $0x340] sm:$0xff] %v1632_v24 }
 0x1c1   :  { %v929_v25 = vpop.f32.mrb[100].mxu0  ;;  %v2966_v26 = vpop.f32.mrb[100].mxu1 }
 0x1c2   :  { %2251 = vst [vmem:[#allocation5 + $0x4b0] sm:$0xff] %v929_v25  ;;  %2214 = vst [vmem:[#allocation5 + $0x388] sm:$0xff] %v2966_v26  ;;  %v931_v27 = vpop.f32.mrb[101].mxu0  ;;  %v1642_v61 = vpop.f32.mrb[101].mxu1 }
 0x1c3   :  { %2252 = vst [vmem:[#allocation5 + $0x4b8] sm:$0xff] %v931_v27  ;;  %2211 = vst [vmem:[#allocation5 + $0x370] sm:$0xff] %v1642_v61 }
 0x1c5   :  { %v935_v28 = vpop.f32.mrb[102].mxu0  ;;  %v2969_v29 = vpop.f32.mrb[102].mxu1 }
 0x1c6   :  { %2254 = vst [vmem:[#allocation5 + $0x4c8] sm:$0xff] %v935_v28  ;;  %2220 = vst [vmem:[#allocation5 + $0x3b8] sm:$0xff] %v2969_v29  ;;  %v937_v31 = vpop.f32.mrb[103].mxu0  ;;  %v1652_v32 = vpop.f32.mrb[103].mxu1 }
 0x1c7   :  { %2255 = vst [vmem:[#allocation5 + $0x4d0] sm:$0xff] %v937_v31  ;;  %2217 = vst [vmem:[#allocation5 + $0x3a0] sm:$0xff] %v1652_v32 }
 0x1c9   :  { %v941_v33 = vpop.f32.mrb[104].mxu0  ;;  %v2972_v62 = vpop.f32.mrb[104].mxu1 }
 0x1ca   :  { %2257 = vst [vmem:[#allocation5 + $0x4e0] sm:$0xff] %v941_v33  ;;  %2226 = vst [vmem:[#allocation5 + $0x3e8] sm:$0xff] %v2972_v62  ;;  %v943_v34 = vpop.f32.mrb[105].mxu0  ;;  %v1662_v36 = vpop.f32.mrb[105].mxu1 }
 0x1cb   :  { %2258 = vst [vmem:[#allocation5 + $0x4e8] sm:$0xff] %v943_v34  ;;  %2223 = vst [vmem:[#allocation5 + $0x3d0] sm:$0xff] %v1662_v36 }
 0x1cd   :  { %v947_v37 = vpop.f32.mrb[106].mxu0  ;;  %v2975_v39 = vpop.f32.mrb[106].mxu1 }
 0x1ce   :  { %2260 = vst [vmem:[#allocation5 + $0x4f8] sm:$0xff] %v947_v37  ;;  %2232 = vst [vmem:[#allocation5 + $0x418] sm:$0xff] %v2975_v39  ;;  %v949_v40 = vpop.f32.mrb[107].mxu0  ;;  %v1672_v4 = vpop.f32.mrb[107].mxu1 }
 0x1cf   :  { %2261 = vst [vmem:[#allocation5 + $0x500] sm:$0xff] %v949_v40  ;;  %2229 = vst [vmem:[#allocation5 + $0x400] sm:$0xff] %v1672_v4 }
 0x1d1   :  { %v953_v30 = vpop.f32.mrb[108].mxu0  ;;  %v2978_v35 = vpop.f32.mrb[108].mxu1 }
 0x1d2   :  { %2263 = vst [vmem:[#allocation5 + $0x510] sm:$0xff] %v953_v30  ;;  %2238 = vst [vmem:[#allocation5 + $0x448] sm:$0xff] %v2978_v35  ;;  %v955_v38 = vpop.f32.mrb[109].mxu0  ;;  %v1682_v42 = vpop.f32.mrb[109].mxu1 }
 0x1d3   :  { %2264 = vst [vmem:[#allocation5 + $0x518] sm:$0xff] %v955_v38  ;;  %2235 = vst [vmem:[#allocation5 + $0x430] sm:$0xff] %v1682_v42 }
 0x1d5   :  { %v959_v41 = vpop.f32.mrb[110].mxu0  ;;  %v2981_v5 = vpop.f32.mrb[110].mxu1 }
 0x1d6   :  { %2266 = vst [vmem:[#allocation5 + $0x528] sm:$0xff] %v959_v41  ;;  %2244 = vst [vmem:[#allocation5 + $0x478] sm:$0xff] %v2981_v5  ;;  %v961_v45 = vpop.f32.mrb[111].mxu0  ;;  %v1692_v46 = vpop.f32.mrb[111].mxu1 }
 0x1d7   :  { %2267 = vst [vmem:[#allocation5 + $0x530] sm:$0xff] %v961_v45  ;;  %2241 = vst [vmem:[#allocation5 + $0x460] sm:$0xff] %v1692_v46 }
 0x1d9   :  { %v965_v47 = vpop.f32.mrb[112].mxu0  ;;  %v2984_v48 = vpop.f32.mrb[112].mxu1 }
 0x1da   :  { %2269 = vst [vmem:[#allocation5 + $0x540] sm:$0xff] %v965_v47  ;;  %2250 = vst [vmem:[#allocation5 + $0x4a8] sm:$0xff] %v2984_v48  ;;  %v967_v51 = vpop.f32.mrb[113].mxu0  ;;  %v1702_v10 = vpop.f32.mrb[113].mxu1 }
 0x1db   :  { %2270 = vst [vmem:[#allocation5 + $0x548] sm:$0xff] %v967_v51  ;;  %2247 = vst [vmem:[#allocation5 + $0x490] sm:$0xff] %v1702_v10 }
 0x1dd   :  { %v971_v43 = vpop.f32.mrb[114].mxu0  ;;  %v2987_v52 = vpop.f32.mrb[114].mxu1 }
 0x1de   :  { %2272 = vst [vmem:[#allocation5 + $0x558] sm:$0xff] %v971_v43  ;;  %2256 = vst [vmem:[#allocation5 + $0x4d8] sm:$0xff] %v2987_v52  ;;  %v973_v53 = vpop.f32.mrb[115].mxu0  ;;  %v1712_v54 = vpop.f32.mrb[115].mxu1 }
 0x1df   :  { %2273 = vst [vmem:[#allocation5 + $0x560] sm:$0xff] %v973_v53  ;;  %2253 = vst [vmem:[#allocation5 + $0x4c0] sm:$0xff] %v1712_v54 }
 0x1e1   :  { %v977_v57 = vpop.f32.mrb[116].mxu0  ;;  %v2990_v11 = vpop.f32.mrb[116].mxu1 }
 0x1e2   :  { %2275 = vst [vmem:[#allocation5 + $0x570] sm:$0xff] %v977_v57  ;;  %2262 = vst [vmem:[#allocation5 + $0x508] sm:$0xff] %v2990_v11  ;;  %v979_v58 = vpop.f32.mrb[117].mxu0  ;;  %v1722_v44 = vpop.f32.mrb[117].mxu1 }
 0x1e3   :  { %2276 = vst [vmem:[#allocation5 + $0x578] sm:$0xff] %v979_v58  ;;  %2259 = vst [vmem:[#allocation5 + $0x4f0] sm:$0xff] %v1722_v44 }
 0x1e5   :  { %v983_v0 = vpop.f32.mrb[118].mxu0  ;;  %v2993_v59 = vpop.f32.mrb[118].mxu1 }
 0x1e6   :  { %2278 = vst [vmem:[#allocation5 + $0x588] sm:$0xff] %v983_v0  ;;  %2268 = vst [vmem:[#allocation5 + $0x538] sm:$0xff] %v2993_v59  ;;  %v985_v60 = vpop.f32.mrb[119].mxu0  ;;  %v1732_v63 = vpop.f32.mrb[119].mxu1 }
 0x1e7   :  { %2279 = vst [vmem:[#allocation5 + $0x590] sm:$0xff] %v985_v60  ;;  %2265 = vst [vmem:[#allocation5 + $0x520] sm:$0xff] %v1732_v63 }
 0x1e9   :  { %v989_v1 = vpop.f32.mrb[120].mxu0  ;;  %v2996_v2 = vpop.f32.mrb[120].mxu1 }
 0x1ea   :  { %2281 = vst [vmem:[#allocation5 + $0x5a0] sm:$0xff] %v989_v1  ;;  %2274 = vst [vmem:[#allocation5 + $0x568] sm:$0xff] %v2996_v2  ;;  %v991_v16 = vpop.f32.mrb[121].mxu0  ;;  %v1742_v49 = vpop.f32.mrb[121].mxu1 }
 0x1eb   :  { %2282 = vst [vmem:[#allocation5 + $0x5a8] sm:$0xff] %v991_v16  ;;  %2271 = vst [vmem:[#allocation5 + $0x550] sm:$0xff] %v1742_v49 }
 0x1ed   :  { %v995_v3 = vpop.f32.mrb[122].mxu0  ;;  %v2999_v6 = vpop.f32.mrb[122].mxu1 }
 0x1ee   :  { %2284 = vst [vmem:[#allocation5 + $0x5b8] sm:$0xff] %v995_v3  ;;  %2280 = vst [vmem:[#allocation5 + $0x598] sm:$0xff] %v2999_v6  ;;  %v997_v7 = vpop.f32.mrb[123].mxu0  ;;  %v1752_v8 = vpop.f32.mrb[123].mxu1 }
 0x1ef   :  { %2285 = vst [vmem:[#allocation5 + $0x5c0] sm:$0xff] %v997_v7  ;;  %2277 = vst [vmem:[#allocation5 + $0x580] sm:$0xff] %v1752_v8 }
 0x1f1   :  { %v1001_v9 = vpop.f32.mrb[124].mxu0  ;;  %v3002_v50 = vpop.f32.mrb[124].mxu1 }
 0x1f2   :  { %2287 = vst [vmem:[#allocation5 + $0x5d0] sm:$0xff] %v1001_v9  ;;  %2286 = vst [vmem:[#allocation5 + $0x5c8] sm:$0xff] %v3002_v50  ;;  %v1003_v12 = vpop.f32.mrb[125].mxu0  ;;  %v1762_v13 = vpop.f32.mrb[125].mxu1 }
 0x1f3   :  { %2288 = vst [vmem:[#allocation5 + $0x5d8] sm:$0xff] %v1003_v12  ;;  %2283 = vst [vmem:[#allocation5 + $0x5b0] sm:$0xff] %v1762_v13 }
 0x1f5   :  { %v1007_v14 = vpop.f32.mrb[126].mxu0  ;;  %v3005_v15 = vpop.f32.mrb[126].mxu1 }
 0x1f6   :  { %2290 = vst [vmem:[#allocation5 + $0x5e8] sm:$0xff] %v1007_v14  ;;  %2292 = vst [vmem:[#allocation5 + $0x5f8] sm:$0xff] %v3005_v15  ;;  %v1009_v17 = vpop.f32.mrb[127].mxu0  ;;  %v1772_v55 = vpop.f32.mrb[127].mxu1 }
 0x1f7   :  { %2291 = vst [vmem:[#allocation5 + $0x5f0] sm:$0xff] %v1009_v17  ;;  %2289 = vst [vmem:[#allocation5 + $0x5e0] sm:$0xff] %v1772_v55 }
 0x1f9   :  { %v1013_v18 = vpop.f32.mrb[128].mxu0  ;;  %v3008_v19 = vpop.f32.mrb[128].mxu1 }
 0x1fa   :  { %2293 = vst [vmem:[#allocation5 + $0x600] sm:$0xff] %v1013_v18  ;;  %2298 = vst [vmem:[#allocation5 + $0x628] sm:$0xff] %v3008_v19  ;;  %v1015_v20 = vpop.f32.mrb[129].mxu0  ;;  %v1782_v21 = vpop.f32.mrb[129].mxu1 }
 0x1fb   :  { %2294 = vst [vmem:[#allocation5 + $0x608] sm:$0xff] %v1015_v20  ;;  %2295 = vst [vmem:[#allocation5 + $0x610] sm:$0xff] %v1782_v21 }
 0x1fd   :  { %v1019_v22 = vpop.f32.mrb[130].mxu0  ;;  %v3011_v56 = vpop.f32.mrb[130].mxu1 }
 0x1fe   :  { %2296 = vst [vmem:[#allocation5 + $0x618] sm:$0xff] %v1019_v22  ;;  %2304 = vst [vmem:[#allocation5 + $0x658] sm:$0xff] %v3011_v56  ;;  %v1021_v23 = vpop.f32.mrb[131].mxu0  ;;  %v1792_v24 = vpop.f32.mrb[131].mxu1 }
 0x1ff   :  { %2297 = vst [vmem:[#allocation5 + $0x620] sm:$0xff] %v1021_v23  ;;  %2301 = vst [vmem:[#allocation5 + $0x640] sm:$0xff] %v1792_v24 }
 0x201   :  { %v1025_v25 = vpop.f32.mrb[132].mxu0  ;;  %v3014_v26 = vpop.f32.mrb[132].mxu1 }
 0x202   :  { %2299 = vst [vmem:[#allocation5 + $0x630] sm:$0xff] %v1025_v25  ;;  %2310 = vst [vmem:[#allocation5 + $0x688] sm:$0xff] %v3014_v26  ;;  %v1027_v27 = vpop.f32.mrb[133].mxu0  ;;  %v1802_v61 = vpop.f32.mrb[133].mxu1 }
 0x203   :  { %2300 = vst [vmem:[#allocation5 + $0x638] sm:$0xff] %v1027_v27  ;;  %2307 = vst [vmem:[#allocation5 + $0x670] sm:$0xff] %v1802_v61 }
 0x205   :  { %v1031_v28 = vpop.f32.mrb[134].mxu0  ;;  %v3017_v29 = vpop.f32.mrb[134].mxu1 }
 0x206   :  { %2302 = vst [vmem:[#allocation5 + $0x648] sm:$0xff] %v1031_v28  ;;  %2316 = vst [vmem:[#allocation5 + $0x6b8] sm:$0xff] %v3017_v29  ;;  %v1033_v31 = vpop.f32.mrb[135].mxu0  ;;  %v1812_v32 = vpop.f32.mrb[135].mxu1 }
 0x207   :  { %2303 = vst [vmem:[#allocation5 + $0x650] sm:$0xff] %v1033_v31  ;;  %2313 = vst [vmem:[#allocation5 + $0x6a0] sm:$0xff] %v1812_v32 }
 0x209   :  { %v1037_v33 = vpop.f32.mrb[136].mxu0  ;;  %v3020_v62 = vpop.f32.mrb[136].mxu1 }
 0x20a   :  { %2305 = vst [vmem:[#allocation5 + $0x660] sm:$0xff] %v1037_v33  ;;  %2322 = vst [vmem:[#allocation5 + $0x6e8] sm:$0xff] %v3020_v62  ;;  %v1039_v34 = vpop.f32.mrb[137].mxu0  ;;  %v1822_v36 = vpop.f32.mrb[137].mxu1 }
 0x20b   :  { %2306 = vst [vmem:[#allocation5 + $0x668] sm:$0xff] %v1039_v34  ;;  %2319 = vst [vmem:[#allocation5 + $0x6d0] sm:$0xff] %v1822_v36 }
 0x20d   :  { %v1043_v37 = vpop.f32.mrb[138].mxu0  ;;  %v3023_v39 = vpop.f32.mrb[138].mxu1 }
 0x20e   :  { %2308 = vst [vmem:[#allocation5 + $0x678] sm:$0xff] %v1043_v37  ;;  %2328 = vst [vmem:[#allocation5 + $0x718] sm:$0xff] %v3023_v39  ;;  %v1045_v40 = vpop.f32.mrb[139].mxu0  ;;  %v1832_v4 = vpop.f32.mrb[139].mxu1 }
 0x20f   :  { %2309 = vst [vmem:[#allocation5 + $0x680] sm:$0xff] %v1045_v40  ;;  %2325 = vst [vmem:[#allocation5 + $0x700] sm:$0xff] %v1832_v4 }
 0x211   :  { %v1049_v30 = vpop.f32.mrb[140].mxu0  ;;  %v3026_v35 = vpop.f32.mrb[140].mxu1 }
 0x212   :  { %2311 = vst [vmem:[#allocation5 + $0x690] sm:$0xff] %v1049_v30  ;;  %2334 = vst [vmem:[#allocation5 + $0x748] sm:$0xff] %v3026_v35  ;;  %v1051_v38 = vpop.f32.mrb[141].mxu0  ;;  %v1842_v42 = vpop.f32.mrb[141].mxu1 }
 0x213   :  { %2312 = vst [vmem:[#allocation5 + $0x698] sm:$0xff] %v1051_v38  ;;  %2331 = vst [vmem:[#allocation5 + $0x730] sm:$0xff] %v1842_v42 }
 0x215   :  { %v1055_v41 = vpop.f32.mrb[142].mxu0  ;;  %v3029_v5 = vpop.f32.mrb[142].mxu1 }
 0x216   :  { %2314 = vst [vmem:[#allocation5 + $0x6a8] sm:$0xff] %v1055_v41  ;;  %2340 = vst [vmem:[#allocation5 + $0x778] sm:$0xff] %v3029_v5  ;;  %v1057_v45 = vpop.f32.mrb[143].mxu0  ;;  %v1852_v46 = vpop.f32.mrb[143].mxu1 }
 0x217   :  { %2315 = vst [vmem:[#allocation5 + $0x6b0] sm:$0xff] %v1057_v45  ;;  %2337 = vst [vmem:[#allocation5 + $0x760] sm:$0xff] %v1852_v46 }
 0x219   :  { %v1061_v47 = vpop.f32.mrb[144].mxu0  ;;  %v3032_v48 = vpop.f32.mrb[144].mxu1 }
 0x21a   :  { %2317 = vst [vmem:[#allocation5 + $0x6c0] sm:$0xff] %v1061_v47  ;;  %2346 = vst [vmem:[#allocation5 + $0x7a8] sm:$0xff] %v3032_v48  ;;  %v1063_v51 = vpop.f32.mrb[145].mxu0  ;;  %v1862_v10 = vpop.f32.mrb[145].mxu1 }
 0x21b   :  { %2318 = vst [vmem:[#allocation5 + $0x6c8] sm:$0xff] %v1063_v51  ;;  %2343 = vst [vmem:[#allocation5 + $0x790] sm:$0xff] %v1862_v10 }
 0x21d   :  { %v1067_v43 = vpop.f32.mrb[146].mxu0  ;;  %v3035_v52 = vpop.f32.mrb[146].mxu1 }
 0x21e   :  { %2320 = vst [vmem:[#allocation5 + $0x6d8] sm:$0xff] %v1067_v43  ;;  %2352 = vst [vmem:[#allocation5 + $0x7d8] sm:$0xff] %v3035_v52  ;;  %v1069_v53 = vpop.f32.mrb[147].mxu0  ;;  %v1872_v54 = vpop.f32.mrb[147].mxu1 }
 0x21f   :  { %2321 = vst [vmem:[#allocation5 + $0x6e0] sm:$0xff] %v1069_v53  ;;  %2349 = vst [vmem:[#allocation5 + $0x7c0] sm:$0xff] %v1872_v54 }
 0x221   :  { %v1073_v57 = vpop.f32.mrb[148].mxu0  ;;  %v3038_v11 = vpop.f32.mrb[148].mxu1 }
 0x222   :  { %2323 = vst [vmem:[#allocation5 + $0x6f0] sm:$0xff] %v1073_v57  ;;  %2358 = vst [vmem:[#allocation5 + $0x808] sm:$0xff] %v3038_v11  ;;  %v1075_v58 = vpop.f32.mrb[149].mxu0  ;;  %v1882_v44 = vpop.f32.mrb[149].mxu1 }
 0x223   :  { %2324 = vst [vmem:[#allocation5 + $0x6f8] sm:$0xff] %v1075_v58  ;;  %2355 = vst [vmem:[#allocation5 + $0x7f0] sm:$0xff] %v1882_v44 }
 0x225   :  { %v1079_v0 = vpop.f32.mrb[150].mxu0  ;;  %v3041_v59 = vpop.f32.mrb[150].mxu1 }
 0x226   :  { %2326 = vst [vmem:[#allocation5 + $0x708] sm:$0xff] %v1079_v0  ;;  %2364 = vst [vmem:[#allocation5 + $0x838] sm:$0xff] %v3041_v59  ;;  %v1081_v60 = vpop.f32.mrb[151].mxu0  ;;  %v1892_v63 = vpop.f32.mrb[151].mxu1 }
 0x227   :  { %2327 = vst [vmem:[#allocation5 + $0x710] sm:$0xff] %v1081_v60  ;;  %2361 = vst [vmem:[#allocation5 + $0x820] sm:$0xff] %v1892_v63 }
 0x229   :  { %v1085_v1 = vpop.f32.mrb[152].mxu0  ;;  %v3044_v2 = vpop.f32.mrb[152].mxu1 }
 0x22a   :  { %2329 = vst [vmem:[#allocation5 + $0x720] sm:$0xff] %v1085_v1  ;;  %2370 = vst [vmem:[#allocation5 + $0x868] sm:$0xff] %v3044_v2  ;;  %v1087_v16 = vpop.f32.mrb[153].mxu0  ;;  %v1902_v49 = vpop.f32.mrb[153].mxu1 }
 0x22b   :  { %2330 = vst [vmem:[#allocation5 + $0x728] sm:$0xff] %v1087_v16  ;;  %2367 = vst [vmem:[#allocation5 + $0x850] sm:$0xff] %v1902_v49 }
 0x22d   :  { %v1091_v3 = vpop.f32.mrb[154].mxu0  ;;  %v3047_v6 = vpop.f32.mrb[154].mxu1 }
 0x22e   :  { %2332 = vst [vmem:[#allocation5 + $0x738] sm:$0xff] %v1091_v3  ;;  %2376 = vst [vmem:[#allocation5 + $0x898] sm:$0xff] %v3047_v6  ;;  %v1093_v7 = vpop.f32.mrb[155].mxu0  ;;  %v1912_v8 = vpop.f32.mrb[155].mxu1 }
 0x22f   :  { %2333 = vst [vmem:[#allocation5 + $0x740] sm:$0xff] %v1093_v7  ;;  %2373 = vst [vmem:[#allocation5 + $0x880] sm:$0xff] %v1912_v8 }
 0x231   :  { %v1097_v9 = vpop.f32.mrb[156].mxu0  ;;  %v3050_v50 = vpop.f32.mrb[156].mxu1 }
 0x232   :  { %2335 = vst [vmem:[#allocation5 + $0x750] sm:$0xff] %v1097_v9  ;;  %2382 = vst [vmem:[#allocation5 + $0x8c8] sm:$0xff] %v3050_v50  ;;  %v1099_v12 = vpop.f32.mrb[157].mxu0  ;;  %v1922_v13 = vpop.f32.mrb[157].mxu1 }
 0x233   :  { %2336 = vst [vmem:[#allocation5 + $0x758] sm:$0xff] %v1099_v12  ;;  %2379 = vst [vmem:[#allocation5 + $0x8b0] sm:$0xff] %v1922_v13 }
 0x235   :  { %v1103_v14 = vpop.f32.mrb[158].mxu0  ;;  %v3053_v15 = vpop.f32.mrb[158].mxu1 }
 0x236   :  { %2338 = vst [vmem:[#allocation5 + $0x768] sm:$0xff] %v1103_v14  ;;  %2388 = vst [vmem:[#allocation5 + $0x8f8] sm:$0xff] %v3053_v15  ;;  %v1105_v17 = vpop.f32.mrb[159].mxu0  ;;  %v1932_v55 = vpop.f32.mrb[159].mxu1 }
 0x237   :  { %2339 = vst [vmem:[#allocation5 + $0x770] sm:$0xff] %v1105_v17  ;;  %2385 = vst [vmem:[#allocation5 + $0x8e0] sm:$0xff] %v1932_v55 }
 0x239   :  { %v1109_v18 = vpop.f32.mrb[160].mxu0  ;;  %v3056_v19 = vpop.f32.mrb[160].mxu1 }
 0x23a   :  { %2341 = vst [vmem:[#allocation5 + $0x780] sm:$0xff] %v1109_v18  ;;  %2394 = vst [vmem:[#allocation5 + $0x928] sm:$0xff] %v3056_v19  ;;  %v1111_v20 = vpop.f32.mrb[161].mxu0  ;;  %v1942_v21 = vpop.f32.mrb[161].mxu1 }
 0x23b   :  { %2342 = vst [vmem:[#allocation5 + $0x788] sm:$0xff] %v1111_v20  ;;  %2391 = vst [vmem:[#allocation5 + $0x910] sm:$0xff] %v1942_v21 }
 0x23d   :  { %v1115_v22 = vpop.f32.mrb[162].mxu0  ;;  %v3059_v56 = vpop.f32.mrb[162].mxu1 }
 0x23e   :  { %2344 = vst [vmem:[#allocation5 + $0x798] sm:$0xff] %v1115_v22  ;;  %2400 = vst [vmem:[#allocation5 + $0x958] sm:$0xff] %v3059_v56  ;;  %v1117_v23 = vpop.f32.mrb[163].mxu0  ;;  %v1952_v24 = vpop.f32.mrb[163].mxu1 }
 0x23f   :  { %2345 = vst [vmem:[#allocation5 + $0x7a0] sm:$0xff] %v1117_v23  ;;  %2397 = vst [vmem:[#allocation5 + $0x940] sm:$0xff] %v1952_v24 }
 0x241   :  { %v1121_v25 = vpop.f32.mrb[164].mxu0  ;;  %v3062_v26 = vpop.f32.mrb[164].mxu1 }
 0x242   :  { %2347 = vst [vmem:[#allocation5 + $0x7b0] sm:$0xff] %v1121_v25  ;;  %2406 = vst [vmem:[#allocation5 + $0x988] sm:$0xff] %v3062_v26  ;;  %v1123_v27 = vpop.f32.mrb[165].mxu0  ;;  %v1962_v61 = vpop.f32.mrb[165].mxu1 }
 0x243   :  { %2348 = vst [vmem:[#allocation5 + $0x7b8] sm:$0xff] %v1123_v27  ;;  %2403 = vst [vmem:[#allocation5 + $0x970] sm:$0xff] %v1962_v61 }
 0x245   :  { %v1127_v28 = vpop.f32.mrb[166].mxu0  ;;  %v3065_v29 = vpop.f32.mrb[166].mxu1 }
 0x246   :  { %2350 = vst [vmem:[#allocation5 + $0x7c8] sm:$0xff] %v1127_v28  ;;  %2412 = vst [vmem:[#allocation5 + $0x9b8] sm:$0xff] %v3065_v29  ;;  %v1129_v31 = vpop.f32.mrb[167].mxu0  ;;  %v1972_v32 = vpop.f32.mrb[167].mxu1 }
 0x247   :  { %2351 = vst [vmem:[#allocation5 + $0x7d0] sm:$0xff] %v1129_v31  ;;  %2409 = vst [vmem:[#allocation5 + $0x9a0] sm:$0xff] %v1972_v32 }
 0x249   :  { %v1133_v33 = vpop.f32.mrb[168].mxu0  ;;  %v3068_v62 = vpop.f32.mrb[168].mxu1 }
 0x24a   :  { %2353 = vst [vmem:[#allocation5 + $0x7e0] sm:$0xff] %v1133_v33  ;;  %2418 = vst [vmem:[#allocation5 + $0x9e8] sm:$0xff] %v3068_v62  ;;  %v1135_v34 = vpop.f32.mrb[169].mxu0  ;;  %v1982_v36 = vpop.f32.mrb[169].mxu1 }
 0x24b   :  { %2354 = vst [vmem:[#allocation5 + $0x7e8] sm:$0xff] %v1135_v34  ;;  %2415 = vst [vmem:[#allocation5 + $0x9d0] sm:$0xff] %v1982_v36 }
 0x24d   :  { %v1139_v37 = vpop.f32.mrb[170].mxu0  ;;  %v3071_v39 = vpop.f32.mrb[170].mxu1 }
 0x24e   :  { %2356 = vst [vmem:[#allocation5 + $0x7f8] sm:$0xff] %v1139_v37  ;;  %2424 = vst [vmem:[#allocation5 + $0xa18] sm:$0xff] %v3071_v39  ;;  %v1141_v40 = vpop.f32.mrb[171].mxu0  ;;  %v1992_v4 = vpop.f32.mrb[171].mxu1 }
 0x24f   :  { %2357 = vst [vmem:[#allocation5 + $0x800] sm:$0xff] %v1141_v40  ;;  %2421 = vst [vmem:[#allocation5 + $0xa00] sm:$0xff] %v1992_v4 }
 0x251   :  { %v1145_v30 = vpop.f32.mrb[172].mxu0  ;;  %v3074_v35 = vpop.f32.mrb[172].mxu1 }
 0x252   :  { %2359 = vst [vmem:[#allocation5 + $0x810] sm:$0xff] %v1145_v30  ;;  %2430 = vst [vmem:[#allocation5 + $0xa48] sm:$0xff] %v3074_v35  ;;  %v1147_v38 = vpop.f32.mrb[173].mxu0  ;;  %v2002_v42 = vpop.f32.mrb[173].mxu1 }
 0x253   :  { %2360 = vst [vmem:[#allocation5 + $0x818] sm:$0xff] %v1147_v38  ;;  %2427 = vst [vmem:[#allocation5 + $0xa30] sm:$0xff] %v2002_v42 }
 0x255   :  { %v1151_v41 = vpop.f32.mrb[174].mxu0  ;;  %v3077_v5 = vpop.f32.mrb[174].mxu1 }
 0x256   :  { %2362 = vst [vmem:[#allocation5 + $0x828] sm:$0xff] %v1151_v41  ;;  %2436 = vst [vmem:[#allocation5 + $0xa78] sm:$0xff] %v3077_v5  ;;  %v1153_v45 = vpop.f32.mrb[175].mxu0  ;;  %v2012_v46 = vpop.f32.mrb[175].mxu1 }
 0x257   :  { %2363 = vst [vmem:[#allocation5 + $0x830] sm:$0xff] %v1153_v45  ;;  %2433 = vst [vmem:[#allocation5 + $0xa60] sm:$0xff] %v2012_v46 }
 0x259   :  { %v1157_v47 = vpop.f32.mrb[176].mxu0  ;;  %v3080_v48 = vpop.f32.mrb[176].mxu1 }
 0x25a   :  { %2365 = vst [vmem:[#allocation5 + $0x840] sm:$0xff] %v1157_v47  ;;  %2442 = vst [vmem:[#allocation5 + $0xaa8] sm:$0xff] %v3080_v48  ;;  %v1159_v51 = vpop.f32.mrb[177].mxu0  ;;  %v2022_v10 = vpop.f32.mrb[177].mxu1 }
 0x25b   :  { %2366 = vst [vmem:[#allocation5 + $0x848] sm:$0xff] %v1159_v51  ;;  %2439 = vst [vmem:[#allocation5 + $0xa90] sm:$0xff] %v2022_v10 }
 0x25d   :  { %v1163_v43 = vpop.f32.mrb[178].mxu0  ;;  %v3083_v52 = vpop.f32.mrb[178].mxu1 }
 0x25e   :  { %2368 = vst [vmem:[#allocation5 + $0x858] sm:$0xff] %v1163_v43  ;;  %2448 = vst [vmem:[#allocation5 + $0xad8] sm:$0xff] %v3083_v52  ;;  %v1165_v53 = vpop.f32.mrb[179].mxu0  ;;  %v2032_v54 = vpop.f32.mrb[179].mxu1 }
 0x25f   :  { %2369 = vst [vmem:[#allocation5 + $0x860] sm:$0xff] %v1165_v53  ;;  %2445 = vst [vmem:[#allocation5 + $0xac0] sm:$0xff] %v2032_v54 }
 0x261   :  { %v1169_v57 = vpop.f32.mrb[180].mxu0  ;;  %v3086_v11 = vpop.f32.mrb[180].mxu1 }
 0x262   :  { %2371 = vst [vmem:[#allocation5 + $0x870] sm:$0xff] %v1169_v57  ;;  %2454 = vst [vmem:[#allocation5 + $0xb08] sm:$0xff] %v3086_v11  ;;  %v1171_v58 = vpop.f32.mrb[181].mxu0  ;;  %v2042_v44 = vpop.f32.mrb[181].mxu1 }
 0x263   :  { %2372 = vst [vmem:[#allocation5 + $0x878] sm:$0xff] %v1171_v58  ;;  %2451 = vst [vmem:[#allocation5 + $0xaf0] sm:$0xff] %v2042_v44 }
 0x265   :  { %v1175_v0 = vpop.f32.mrb[182].mxu0  ;;  %v3089_v59 = vpop.f32.mrb[182].mxu1 }
 0x266   :  { %2374 = vst [vmem:[#allocation5 + $0x888] sm:$0xff] %v1175_v0  ;;  %2460 = vst [vmem:[#allocation5 + $0xb38] sm:$0xff] %v3089_v59  ;;  %v1177_v60 = vpop.f32.mrb[183].mxu0  ;;  %v2052_v63 = vpop.f32.mrb[183].mxu1 }
 0x267   :  { %2375 = vst [vmem:[#allocation5 + $0x890] sm:$0xff] %v1177_v60  ;;  %2457 = vst [vmem:[#allocation5 + $0xb20] sm:$0xff] %v2052_v63 }
 0x269   :  { %v1181_v1 = vpop.f32.mrb[184].mxu0  ;;  %v3092_v2 = vpop.f32.mrb[184].mxu1 }
 0x26a   :  { %2377 = vst [vmem:[#allocation5 + $0x8a0] sm:$0xff] %v1181_v1  ;;  %2466 = vst [vmem:[#allocation5 + $0xb68] sm:$0xff] %v3092_v2  ;;  %v1183_v16 = vpop.f32.mrb[185].mxu0  ;;  %v2062_v49 = vpop.f32.mrb[185].mxu1 }
 0x26b   :  { %2378 = vst [vmem:[#allocation5 + $0x8a8] sm:$0xff] %v1183_v16  ;;  %2463 = vst [vmem:[#allocation5 + $0xb50] sm:$0xff] %v2062_v49 }
 0x26d   :  { %v1187_v3 = vpop.f32.mrb[186].mxu0  ;;  %v3095_v6 = vpop.f32.mrb[186].mxu1 }
 0x26e   :  { %2380 = vst [vmem:[#allocation5 + $0x8b8] sm:$0xff] %v1187_v3  ;;  %2472 = vst [vmem:[#allocation5 + $0xb98] sm:$0xff] %v3095_v6  ;;  %v1189_v7 = vpop.f32.mrb[187].mxu0  ;;  %v2072_v8 = vpop.f32.mrb[187].mxu1 }
 0x26f   :  { %2381 = vst [vmem:[#allocation5 + $0x8c0] sm:$0xff] %v1189_v7  ;;  %2469 = vst [vmem:[#allocation5 + $0xb80] sm:$0xff] %v2072_v8 }
 0x271   :  { %v1193_v9 = vpop.f32.mrb[188].mxu0  ;;  %v3098_v50 = vpop.f32.mrb[188].mxu1 }
 0x272   :  { %2383 = vst [vmem:[#allocation5 + $0x8d0] sm:$0xff] %v1193_v9  ;;  %2478 = vst [vmem:[#allocation5 + $0xbc8] sm:$0xff] %v3098_v50  ;;  %v1195_v12 = vpop.f32.mrb[189].mxu0  ;;  %v2082_v13 = vpop.f32.mrb[189].mxu1 }
 0x273   :  { %2384 = vst [vmem:[#allocation5 + $0x8d8] sm:$0xff] %v1195_v12  ;;  %2475 = vst [vmem:[#allocation5 + $0xbb0] sm:$0xff] %v2082_v13 }
 0x275   :  { %v1199_v14 = vpop.f32.mrb[190].mxu0  ;;  %v3101_v15 = vpop.f32.mrb[190].mxu1 }
 0x276   :  { %2386 = vst [vmem:[#allocation5 + $0x8e8] sm:$0xff] %v1199_v14  ;;  %2484 = vst [vmem:[#allocation5 + $0xbf8] sm:$0xff] %v3101_v15  ;;  %v1201_v17 = vpop.f32.mrb[191].mxu0  ;;  %v2092_v55 = vpop.f32.mrb[191].mxu1 }
 0x277   :  { %2387 = vst [vmem:[#allocation5 + $0x8f0] sm:$0xff] %v1201_v17  ;;  %2481 = vst [vmem:[#allocation5 + $0xbe0] sm:$0xff] %v2092_v55 }
 0x278   :  { %3212 = shalt.err (!%p3209_p12)
}
 0x279   :  { %s3213_s1 = scalar_lea.hbm %s4431_s2, 49152 }
 0x27a   :  { %p3214_p13 = scmp.ne.s32.totalorder %s4431_s2, %s3213_s1  ;;  %p3217_p0 = scmp.lt.u32.totalorder %s3213_s1, %s4431_s2 }
 0x27c   :  { %p3219_p1 = pnand %p3217_p0, %p3214_p13 }
 0x27e   :  { %3222 = shalt.err (!%p3219_p1)
}
 0x27f   :  { %2496 = dma.vmem_to_hbm [thread:$0]  %s2491_s17, 49152, %s4431_s2, [#allocation4], %s3228_s19, %s3228_s19, %s3229_s20  }
 0x280   :  { %3225 = dma.done.wait [#allocation4], 49152  }
 0x281   :  { %3226 = vsyncadd [#allocation4], 4294918144 }
 0x282   :  { %2500 = vsyncpa [#allocation3], 1 }
 0x283   :  { %2501 = vsyncpa [#allocation4], 1 }

</bundles_post_ra>
